<compile_context>
chip_gen: v7x
topology: tpu7x:2x2x1
jax: 0.10.0
libtpu: 0.0.40
codegen_flags: <defaults>
</compile_context>

<pallas_src>
import jax
import jax.numpy as jnp
from jax import lax
from jax.experimental import pallas as pl
from jax.experimental.pallas import tpu as pltpu

HIDDEN = 128
INPUT = 5
OUT = 3
FC_PAD = 128  # lane-dense padded width for the final FC output


def lstm_kernel(x_ref, wih0_ref, b0_ref, whh0_ref, w1_ref, b1_ref,
                wfc_ref, bfc_ref, out_ref, gx_s):
    Bp = out_ref.shape[0]
    H = HIDDEN
    T = x_ref.shape[0] // Bp

    # Hoisted layer-0 input projection (+ summed bias) for ALL timesteps:
    # one (T*Bp, 5) @ (5, 4H) matmul, off the serial recurrent path.
    gx_s[...] = (jnp.dot(x_ref[...], wih0_ref[...],
                         preferred_element_type=jnp.float32)
                 + b0_ref[...])

    # Layer-1 bias, already broadcast to (Bp, 4H) by the wrapper; loaded once.
    b1 = b1_ref[...]

    def gates(z):
        # PyTorch gate order: i, f, g, o
        i = jax.nn.sigmoid(z[:, 0 * H:1 * H])
        f = jax.nn.sigmoid(z[:, 1 * H:2 * H])
        g = jnp.tanh(z[:, 2 * H:3 * H])
        o = jax.nn.sigmoid(z[:, 3 * H:4 * H])
        return i, f, g, o

    h0 = jnp.zeros((Bp, H), jnp.float32)
    c0 = jnp.zeros((Bp, H), jnp.float32)
    h1 = jnp.zeros((Bp, H), jnp.float32)
    c1 = jnp.zeros((Bp, H), jnp.float32)

    # T is a static Python int -> fully unrolled at trace time (max ILP for the
    # latency-bound recurrence).
    for t in range(T):
        # ----- layer 0: only the recurrent K=128 bf16 matmul per step -----
        z0 = (gx_s[pl.ds(t * Bp, Bp), :]
              + jnp.dot(h0.astype(jnp.bfloat16), whh0_ref[...],
                        preferred_element_type=jnp.float32))
        i0, f0, g0, o0 = gates(z0)
        c0 = f0 * c0 + i0 * g0
        h0 = o0 * jnp.tanh(c0)

        # ----- layer 1: single fused K=2H bf16 matmul -----
        hcat = jnp.concatenate([h0, h1], axis=1).astype(jnp.bfloat16)
        z1 = (jnp.dot(hcat, w1_ref[...],
                      preferred_element_type=jnp.float32)
              + b1)
        i1, f1, g1, o1 = gates(z1)
        c1 = f1 * c1 + i1 * g1
        h1 = o1 * jnp.tanh(c1)

    # fc(out[:, -1, :]) == fc(h1_T); weights padded to 128 lanes -> dense store.
    out_ref[...] = (jnp.dot(h1, wfc_ref[...],
                            preferred_element_type=jnp.float32)
                    + bfc_ref[...])


def lstm_forward(x, params):
    """x: (B, T, INPUT) float32, batch_first, exactly like the PyTorch module."""
    B, T, D = x.shape
    assert D == INPUT
    (wih0, whh0, bih0, bhh0, wih1, whh1, bih1, bhh1, wfc, bfc) = params

    Bp = ((B + 7) // 8) * 8  # pad batch (sublanes) to a full 8-row tile

    # (B, T, D) -> time-major, batch-padded, flattened to (T*Bp, D).
    # Padded rows are zeros; the recurrence is row-independent so they never
    # contaminate real rows and are simply sliced off at the end.
    x_k = jnp.transpose(x, (1, 0, 2)).astype(jnp.float32)
    x_k = jnp.pad(x_k, ((0, 0), (0, Bp - B), (0, 0))).reshape(T * Bp, D)

    b0 = (bih0 + bhh0).astype(jnp.float32)[None, :]                         # (1, 4H)
    b1 = jnp.broadcast_to((bih1 + bhh1).astype(jnp.float32)[None, :],
                          (Bp, 4 * HIDDEN))                                 # (Bp, 4H)

    wih0_t = wih0.T.astype(jnp.float32)                                     # (D, 4H)
    whh0_t = whh0.T.astype(jnp.bfloat16)                                    # (H, 4H)
    w1 = jnp.concatenate([wih1.T, whh1.T], axis=0).astype(jnp.bfloat16)     # (2H, 4H)

    wfc_pad = jnp.zeros((HIDDEN, FC_PAD), jnp.float32).at[:, :OUT].set(
        wfc.T.astype(jnp.float32))
    bfc_pad = jnp.zeros((1, FC_PAD), jnp.float32).at[0, :OUT].set(
        bfc.astype(jnp.float32))

    args = (x_k, wih0_t, b0, whh0_t, w1, b1, wfc_pad, bfc_pad)
    vmem = pl.BlockSpec(memory_space=pltpu.MemorySpace.VMEM)

    # TODO(synk): for large B, add a batch grid axis with
    # dimension_semantics=("parallel",) so v7x's two TensorCores split the batch.
    out = pl.pallas_call(
        lstm_kernel,
        out_shape=jax.ShapeDtypeStruct((Bp, FC_PAD), jnp.float32),
        in_specs=[vmem] * len(args),
        out_specs=vmem,
        scratch_shapes=[pltpu.VMEM((T * Bp, 4 * HIDDEN), jnp.float32)],
    )(*args)
    return out[:B, :OUT]


def lstm_reference(x, params, recurrent_dtype=jnp.float32):
    """Pure-JAX reference with torch.nn.LSTM semantics (gate order i,f,g,o).

    recurrent_dtype=float32  -> exact module math.
    recurrent_dtype=bfloat16 -> mirrors the kernel's mixed precision (bf16
    recurrent matmul operands, f32 accumulation / gates / state).
    """
    (wih0, whh0, bih0, bhh0, wih1, whh1, bih1, bhh1, wfc, bfc) = params
    B, T, _ = x.shape
    H = HIDDEN
    hi = lax.Precision.HIGHEST

    w0r = whh0.T.astype(recurrent_dtype)
    w1 = jnp.concatenate([wih1.T, whh1.T], axis=0).astype(recurrent_dtype)
    b0 = (bih0 + bhh0).astype(jnp.float32)
    b1 = (bih1 + bhh1).astype(jnp.float32)

    def gates(z):
        i = jax.nn.sigmoid(z[:, 0 * H:1 * H])
        f = jax.nn.sigmoid(z[:, 1 * H:2 * H])
        g = jnp.tanh(z[:, 2 * H:3 * H])
        o = jax.nn.sigmoid(z[:, 3 * H:4 * H])
        return i, f, g, o

    h0 = jnp.zeros((B, H), jnp.float32)
    c0 = jnp.zeros((B, H), jnp.float32)
    h1 = jnp.zeros((B, H), jnp.float32)
    c1 = jnp.zeros((B, H), jnp.float32)
    for t in range(T):
        z0 = (jnp.dot(x[:, t, :], wih0.T, precision=hi,
                      preferred_element_type=jnp.float32) + b0
              + jnp.dot(h0.astype(recurrent_dtype), w0r, precision=hi,
                        preferred_element_type=jnp.float32))
        i0, f0, g0, o0 = gates(z0)
        c0 = f0 * c0 + i0 * g0
        h0 = o0 * jnp.tanh(c0)

        hcat = jnp.concatenate([h0, h1], axis=1).astype(recurrent_dtype)
        z1 = (jnp.dot(hcat, w1, precision=hi,
                      preferred_element_type=jnp.float32) + b1)
        i1, f1, g1, o1 = gates(z1)
        c1 = f1 * c1 + i1 * g1
        h1 = o1 * jnp.tanh(c1)
    return jnp.dot(h1, wfc.T, precision=hi,
                   preferred_element_type=jnp.float32) + bfc


def init_params(key):
    # PyTorch default init: U(-1/sqrt(H), 1/sqrt(H)) for LSTM and Linear.
    bound = 1.0 / (HIDDEN ** 0.5)
    keys = jax.random.split(key, 10)
    u = lambda kk, shape: jax.random.uniform(
        kk, shape, jnp.float32, minval=-bound, maxval=bound)
    wih0 = u(keys[0], (4 * HIDDEN, INPUT))
    whh0 = u(keys[1], (4 * HIDDEN, HIDDEN))
    bih0 = u(keys[2], (4 * HIDDEN,))
    bhh0 = u(keys[3], (4 * HIDDEN,))
    wih1 = u(keys[4], (4 * HIDDEN, HIDDEN))
    whh1 = u(keys[5], (4 * HIDDEN, HIDDEN))
    bih1 = u(keys[6], (4 * HIDDEN,))
    bhh1 = u(keys[7], (4 * HIDDEN,))
    wfc = u(keys[8], (OUT, HIDDEN))
    bfc = u(keys[9], (OUT,))
    return (wih0, whh0, bih0, bhh0, wih1, whh1, bih1, bhh1, wfc, bfc)


if __name__ == "__main__":
    key = jax.random.PRNGKey(0)
    kx, kp = jax.random.split(key)

    B, T = 2, 8
    x = jax.random.normal(kx, (B, T, INPUT), dtype=jnp.float32)
    params = init_params(kp)

    out = lstm_forward(x, params)
    out = jax.block_until_ready(out)
    assert out.shape == (B, OUT)

    # Tight check against a reference that mirrors the kernel's mixed precision.
    ref_mixed = lstm_reference(x, params, recurrent_dtype=jnp.bfloat16)
    assert jnp.allclose(out, ref_mixed, atol=1e-2, rtol=1e-2), (out, ref_mixed)

    # Loose sanity check against the exact f32 PyTorch-semantics math
    # (bf16 recurrent weights perturb the recurrence slightly).
    ref_f32 = lstm_reference(x, params, recurrent_dtype=jnp.float32)
    assert jnp.allclose(out, ref_f32, atol=5e-2, rtol=5e-2), (out, ref_f32)

    print("KERNEL_OK")
</pallas_src>

<mosaic_0001>
module attributes {stable_mosaic.version = 11 : i64} {
  func.func @lstm_kernel(%arg0: memref<64x5xf32, #tpu.memory_space<vmem>>, %arg1: memref<5x512xf32, #tpu.memory_space<vmem>>, %arg2: memref<1x512xf32, #tpu.memory_space<vmem>>, %arg3: memref<128x512xbf16, #tpu.memory_space<vmem>>, %arg4: memref<256x512xbf16, #tpu.memory_space<vmem>>, %arg5: memref<8x512xf32, #tpu.memory_space<vmem>>, %arg6: memref<128x128xf32, #tpu.memory_space<vmem>>, %arg7: memref<1x128xf32, #tpu.memory_space<vmem>>, %arg8: memref<8x128xf32, #tpu.memory_space<vmem>>, %arg9: memref<64x512xf32, #tpu.memory_space<vmem>>) attributes {dimension_semantics = [], scalar_prefetch = 0 : i64, scratch_operands = 1 : i64, tpu.core_type = #tpu.core_type<tc>} {
    %c0 = arith.constant 0 : index
    %c0_0 = arith.constant 0 : index
    %0 = vector.load %arg0[%c0, %c0_0] : memref<64x5xf32, #tpu.memory_space<vmem>>, vector<64x5xf32>
    %c0_1 = arith.constant 0 : index
    %c0_2 = arith.constant 0 : index
    %1 = vector.load %arg1[%c0_1, %c0_2] : memref<5x512xf32, #tpu.memory_space<vmem>>, vector<5x512xf32>
    %cst = arith.constant dense<0.000000e+00> : vector<64x512xf32>
    %2 = tpu.matmul %0, %1, %cst {dimension_numbers = #tpu.dot_dimension_numbers<[1], [0], [0], [1], [0, 0, 1, 1], [], []>} : vector<64x5xf32>, vector<5x512xf32>, vector<64x512xf32> -> vector<64x512xf32>
    %c0_3 = arith.constant 0 : index
    %c0_4 = arith.constant 0 : index
    %3 = vector.load %arg2[%c0_3, %c0_4] : memref<1x512xf32, #tpu.memory_space<vmem>>, vector<1x512xf32>
    %4 = vector.broadcast %3 : vector<1x512xf32> to vector<64x512xf32>
    %5 = arith.addf %2, %4 : vector<64x512xf32>
    %c0_5 = arith.constant 0 : index
    %c0_6 = arith.constant 0 : index
    %6 = vector.load %arg9[%c0_5, %c0_6] : memref<64x512xf32, #tpu.memory_space<vmem>>, vector<64x512xf32>
    tpu.vector_store %arg9[%c0_5, %c0_6], %5 {strides = array<i32>} : memref<64x512xf32, #tpu.memory_space<vmem>>, vector<64x512xf32>,
    %c0_7 = arith.constant 0 : index
    %c0_8 = arith.constant 0 : index
    %7 = vector.load %arg5[%c0_7, %c0_8] : memref<8x512xf32, #tpu.memory_space<vmem>>, vector<8x512xf32>
    %cst_9 = arith.constant 0.000000e+00 : f32
    %8 = vector.broadcast %cst_9 : f32 to vector<8x128xf32>
    %cst_10 = arith.constant 0.000000e+00 : f32
    %9 = vector.broadcast %cst_10 : f32 to vector<8x128xf32>
    %cst_11 = arith.constant 0.000000e+00 : f32
    %10 = vector.broadcast %cst_11 : f32 to vector<8x128xf32>
    %cst_12 = arith.constant 0.000000e+00 : f32
    %11 = vector.broadcast %cst_12 : f32 to vector<8x128xf32>
    %c0_13 = arith.constant 0 : index
    %c0_14 = arith.constant 0 : index
    %12 = vector.load %arg9[%c0_13, %c0_14] : memref<64x512xf32, #tpu.memory_space<vmem>>, vector<8x512xf32>
    %13 = arith.truncf %8 : vector<8x128xf32> to vector<8x128xbf16>
    %c0_15 = arith.constant 0 : index
    %c0_16 = arith.constant 0 : index
    %14 = vector.load %arg3[%c0_15, %c0_16] : memref<128x512xbf16, #tpu.memory_space<vmem>>, vector<128x512xbf16>
    %cst_17 = arith.constant dense<0.000000e+00> : vector<8x512xf32>
    %15 = tpu.matmul %13, %14, %cst_17 {dimension_numbers = #tpu.dot_dimension_numbers<[1], [0], [0], [1], [0, 0, 1, 1], [], []>} : vector<8x128xbf16>, vector<128x512xbf16>, vector<8x512xf32> -> vector<8x512xf32>
    %16 = arith.addf %12, %15 : vector<8x512xf32>
    %17 = vector.extract_strided_slice %16 {offsets = [0, 0], sizes = [8, 128], strides = [1, 1]} : vector<8x512xf32> to vector<8x128xf32>
    %18 = arith.negf %17 : vector<8x128xf32>
    %19 = math.exp %18 : vector<8x128xf32>
    %cst_18 = arith.constant 1.000000e+00 : f32
    %20 = vector.broadcast %cst_18 : f32 to vector<8x128xf32>
    %21 = arith.addf %20, %19 : vector<8x128xf32>
    %22 = arith.divf %20, %21 : vector<8x128xf32>
    %23 = vector.extract_strided_slice %16 {offsets = [0, 128], sizes = [8, 128], strides = [1, 1]} : vector<8x512xf32> to vector<8x128xf32>
    %24 = arith.negf %23 : vector<8x128xf32>
    %25 = math.exp %24 : vector<8x128xf32>
    %cst_19 = arith.constant 1.000000e+00 : f32
    %26 = vector.broadcast %cst_19 : f32 to vector<8x128xf32>
    %27 = arith.addf %26, %25 : vector<8x128xf32>
    %28 = arith.divf %26, %27 : vector<8x128xf32>
    %29 = vector.extract_strided_slice %16 {offsets = [0, 256], sizes = [8, 128], strides = [1, 1]} : vector<8x512xf32> to vector<8x128xf32>
    %30 = math.tanh %29 : vector<8x128xf32>
    %31 = vector.extract_strided_slice %16 {offsets = [0, 384], sizes = [8, 128], strides = [1, 1]} : vector<8x512xf32> to vector<8x128xf32>
    %32 = arith.negf %31 : vector<8x128xf32>
    %33 = math.exp %32 : vector<8x128xf32>
    %cst_20 = arith.constant 1.000000e+00 : f32
    %34 = vector.broadcast %cst_20 : f32 to vector<8x128xf32>
    %35 = arith.addf %34, %33 : vector<8x128xf32>
    %36 = arith.divf %34, %35 : vector<8x128xf32>
    %37 = arith.mulf %28, %9 : vector<8x128xf32>
    %38 = arith.mulf %22, %30 : vector<8x128xf32>
    %39 = arith.addf %37, %38 : vector<8x128xf32>
    %40 = math.tanh %39 : vector<8x128xf32>
    %41 = arith.mulf %36, %40 : vector<8x128xf32>
    %42 = tpu.concatenate %41, %10 in 1 : vector<8x128xf32>, vector<8x128xf32> -> vector<8x256xf32>
    %43 = arith.truncf %42 : vector<8x256xf32> to vector<8x256xbf16>
    %c0_21 = arith.constant 0 : index
    %c0_22 = arith.constant 0 : index
    %44 = vector.load %arg4[%c0_21, %c0_22] : memref<256x512xbf16, #tpu.memory_space<vmem>>, vector<256x512xbf16>
    %cst_23 = arith.constant dense<0.000000e+00> : vector<8x512xf32>
    %45 = tpu.matmul %43, %44, %cst_23 {dimension_numbers = #tpu.dot_dimension_numbers<[1], [0], [0], [1], [0, 0, 1, 1], [], []>} : vector<8x256xbf16>, vector<256x512xbf16>, vector<8x512xf32> -> vector<8x512xf32>
    %46 = arith.addf %45, %7 : vector<8x512xf32>
    %47 = vector.extract_strided_slice %46 {offsets = [0, 0], sizes = [8, 128], strides = [1, 1]} : vector<8x512xf32> to vector<8x128xf32>
    %48 = arith.negf %47 : vector<8x128xf32>
    %49 = math.exp %48 : vector<8x128xf32>
    %cst_24 = arith.constant 1.000000e+00 : f32
    %50 = vector.broadcast %cst_24 : f32 to vector<8x128xf32>
    %51 = arith.addf %50, %49 : vector<8x128xf32>
    %52 = arith.divf %50, %51 : vector<8x128xf32>
    %53 = vector.extract_strided_slice %46 {offsets = [0, 128], sizes = [8, 128], strides = [1, 1]} : vector<8x512xf32> to vector<8x128xf32>
    %54 = arith.negf %53 : vector<8x128xf32>
    %55 = math.exp %54 : vector<8x128xf32>
    %cst_25 = arith.constant 1.000000e+00 : f32
    %56 = vector.broadcast %cst_25 : f32 to vector<8x128xf32>
    %57 = arith.addf %56, %55 : vector<8x128xf32>
    %58 = arith.divf %56, %57 : vector<8x128xf32>
    %59 = vector.extract_strided_slice %46 {offsets = [0, 256], sizes = [8, 128], strides = [1, 1]} : vector<8x512xf32> to vector<8x128xf32>
    %60 = math.tanh %59 : vector<8x128xf32>
    %61 = vector.extract_strided_slice %46 {offsets = [0, 384], sizes = [8, 128], strides = [1, 1]} : vector<8x512xf32> to vector<8x128xf32>
    %62 = arith.negf %61 : vector<8x128xf32>
    %63 = math.exp %62 : vector<8x128xf32>
    %cst_26 = arith.constant 1.000000e+00 : f32
    %64 = vector.broadcast %cst_26 : f32 to vector<8x128xf32>
    %65 = arith.addf %64, %63 : vector<8x128xf32>
    %66 = arith.divf %64, %65 : vector<8x128xf32>
    %67 = arith.mulf %58, %11 : vector<8x128xf32>
    %68 = arith.mulf %52, %60 : vector<8x128xf32>
    %69 = arith.addf %67, %68 : vector<8x128xf32>
    %70 = math.tanh %69 : vector<8x128xf32>
    %71 = arith.mulf %66, %70 : vector<8x128xf32>
    %c8 = arith.constant 8 : index
    %c0_27 = arith.constant 0 : index
    %72 = vector.load %arg9[%c8, %c0_27] : memref<64x512xf32, #tpu.memory_space<vmem>>, vector<8x512xf32>
    %73 = arith.truncf %41 : vector<8x128xf32> to vector<8x128xbf16>
    %c0_28 = arith.constant 0 : index
    %c0_29 = arith.constant 0 : index
    %74 = vector.load %arg3[%c0_28, %c0_29] : memref<128x512xbf16, #tpu.memory_space<vmem>>, vector<128x512xbf16>
    %cst_30 = arith.constant dense<0.000000e+00> : vector<8x512xf32>
    %75 = tpu.matmul %73, %74, %cst_30 {dimension_numbers = #tpu.dot_dimension_numbers<[1], [0], [0], [1], [0, 0, 1, 1], [], []>} : vector<8x128xbf16>, vector<128x512xbf16>, vector<8x512xf32> -> vector<8x512xf32>
    %76 = arith.addf %72, %75 : vector<8x512xf32>
    %77 = vector.extract_strided_slice %76 {offsets = [0, 0], sizes = [8, 128], strides = [1, 1]} : vector<8x512xf32> to vector<8x128xf32>
    %78 = arith.negf %77 : vector<8x128xf32>
    %79 = math.exp %78 : vector<8x128xf32>
    %cst_31 = arith.constant 1.000000e+00 : f32
    %80 = vector.broadcast %cst_31 : f32 to vector<8x128xf32>
    %81 = arith.addf %80, %79 : vector<8x128xf32>
    %82 = arith.divf %80, %81 : vector<8x128xf32>
    %83 = vector.extract_strided_slice %76 {offsets = [0, 128], sizes = [8, 128], strides = [1, 1]} : vector<8x512xf32> to vector<8x128xf32>
    %84 = arith.negf %83 : vector<8x128xf32>
    %85 = math.exp %84 : vector<8x128xf32>
    %cst_32 = arith.constant 1.000000e+00 : f32
    %86 = vector.broadcast %cst_32 : f32 to vector<8x128xf32>
    %87 = arith.addf %86, %85 : vector<8x128xf32>
    %88 = arith.divf %86, %87 : vector<8x128xf32>
    %89 = vector.extract_strided_slice %76 {offsets = [0, 256], sizes = [8, 128], strides = [1, 1]} : vector<8x512xf32> to vector<8x128xf32>
    %90 = math.tanh %89 : vector<8x128xf32>
    %91 = vector.extract_strided_slice %76 {offsets = [0, 384], sizes = [8, 128], strides = [1, 1]} : vector<8x512xf32> to vector<8x128xf32>
    %92 = arith.negf %91 : vector<8x128xf32>
    %93 = math.exp %92 : vector<8x128xf32>
    %cst_33 = arith.constant 1.000000e+00 : f32
    %94 = vector.broadcast %cst_33 : f32 to vector<8x128xf32>
    %95 = arith.addf %94, %93 : vector<8x128xf32>
    %96 = arith.divf %94, %95 : vector<8x128xf32>
    %97 = arith.mulf %88, %39 : vector<8x128xf32>
    %98 = arith.mulf %82, %90 : vector<8x128xf32>
    %99 = arith.addf %97, %98 : vector<8x128xf32>
    %100 = math.tanh %99 : vector<8x128xf32>
    %101 = arith.mulf %96, %100 : vector<8x128xf32>
    %102 = tpu.concatenate %101, %71 in 1 : vector<8x128xf32>, vector<8x128xf32> -> vector<8x256xf32>
    %103 = arith.truncf %102 : vector<8x256xf32> to vector<8x256xbf16>
    %c0_34 = arith.constant 0 : index
    %c0_35 = arith.constant 0 : index
    %104 = vector.load %arg4[%c0_34, %c0_35] : memref<256x512xbf16, #tpu.memory_space<vmem>>, vector<256x512xbf16>
    %cst_36 = arith.constant dense<0.000000e+00> : vector<8x512xf32>
    %105 = tpu.matmul %103, %104, %cst_36 {dimension_numbers = #tpu.dot_dimension_numbers<[1], [0], [0], [1], [0, 0, 1, 1], [], []>} : vector<8x256xbf16>, vector<256x512xbf16>, vector<8x512xf32> -> vector<8x512xf32>
    %106 = arith.addf %105, %7 : vector<8x512xf32>
    %107 = vector.extract_strided_slice %106 {offsets = [0, 0], sizes = [8, 128], strides = [1, 1]} : vector<8x512xf32> to vector<8x128xf32>
    %108 = arith.negf %107 : vector<8x128xf32>
    %109 = math.exp %108 : vector<8x128xf32>
    %cst_37 = arith.constant 1.000000e+00 : f32
    %110 = vector.broadcast %cst_37 : f32 to vector<8x128xf32>
    %111 = arith.addf %110, %109 : vector<8x128xf32>
    %112 = arith.divf %110, %111 : vector<8x128xf32>
    %113 = vector.extract_strided_slice %106 {offsets = [0, 128], sizes = [8, 128], strides = [1, 1]} : vector<8x512xf32> to vector<8x128xf32>
    %114 = arith.negf %113 : vector<8x128xf32>
    %115 = math.exp %114 : vector<8x128xf32>
    %cst_38 = arith.constant 1.000000e+00 : f32
    %116 = vector.broadcast %cst_38 : f32 to vector<8x128xf32>
    %117 = arith.addf %116, %115 : vector<8x128xf32>
    %118 = arith.divf %116, %117 : vector<8x128xf32>
    %119 = vector.extract_strided_slice %106 {offsets = [0, 256], sizes = [8, 128], strides = [1, 1]} : vector<8x512xf32> to vector<8x128xf32>
    %120 = math.tanh %119 : vector<8x128xf32>
    %121 = vector.extract_strided_slice %106 {offsets = [0, 384], sizes = [8, 128], strides = [1, 1]} : vector<8x512xf32> to vector<8x128xf32>
    %122 = arith.negf %121 : vector<8x128xf32>
    %123 = math.exp %122 : vector<8x128xf32>
    %cst_39 = arith.constant 1.000000e+00 : f32
    %124 = vector.broadcast %cst_39 : f32 to vector<8x128xf32>
    %125 = arith.addf %124, %123 : vector<8x128xf32>
    %126 = arith.divf %124, %125 : vector<8x128xf32>
    %127 = arith.mulf %118, %69 : vector<8x128xf32>
    %128 = arith.mulf %112, %120 : vector<8x128xf32>
    %129 = arith.addf %127, %128 : vector<8x128xf32>
    %130 = math.tanh %129 : vector<8x128xf32>
    %131 = arith.mulf %126, %130 : vector<8x128xf32>
    %c16 = arith.constant 16 : index
    %c0_40 = arith.constant 0 : index
    %132 = vector.load %arg9[%c16, %c0_40] : memref<64x512xf32, #tpu.memory_space<vmem>>, vector<8x512xf32>
    %133 = arith.truncf %101 : vector<8x128xf32> to vector<8x128xbf16>
    %c0_41 = arith.constant 0 : index
    %c0_42 = arith.constant 0 : index
    %134 = vector.load %arg3[%c0_41, %c0_42] : memref<128x512xbf16, #tpu.memory_space<vmem>>, vector<128x512xbf16>
    %cst_43 = arith.constant dense<0.000000e+00> : vector<8x512xf32>
    %135 = tpu.matmul %133, %134, %cst_43 {dimension_numbers = #tpu.dot_dimension_numbers<[1], [0], [0], [1], [0, 0, 1, 1], [], []>} : vector<8x128xbf16>, vector<128x512xbf16>, vector<8x512xf32> -> vector<8x512xf32>
    %136 = arith.addf %132, %135 : vector<8x512xf32>
    %137 = vector.extract_strided_slice %136 {offsets = [0, 0], sizes = [8, 128], strides = [1, 1]} : vector<8x512xf32> to vector<8x128xf32>
    %138 = arith.negf %137 : vector<8x128xf32>
    %139 = math.exp %138 : vector<8x128xf32>
    %cst_44 = arith.constant 1.000000e+00 : f32
    %140 = vector.broadcast %cst_44 : f32 to vector<8x128xf32>
    %141 = arith.addf %140, %139 : vector<8x128xf32>
    %142 = arith.divf %140, %141 : vector<8x128xf32>
    %143 = vector.extract_strided_slice %136 {offsets = [0, 128], sizes = [8, 128], strides = [1, 1]} : vector<8x512xf32> to vector<8x128xf32>
    %144 = arith.negf %143 : vector<8x128xf32>
    %145 = math.exp %144 : vector<8x128xf32>
    %cst_45 = arith.constant 1.000000e+00 : f32
    %146 = vector.broadcast %cst_45 : f32 to vector<8x128xf32>
    %147 = arith.addf %146, %145 : vector<8x128xf32>
    %148 = arith.divf %146, %147 : vector<8x128xf32>
    %149 = vector.extract_strided_slice %136 {offsets = [0, 256], sizes = [8, 128], strides = [1, 1]} : vector<8x512xf32> to vector<8x128xf32>
    %150 = math.tanh %149 : vector<8x128xf32>
    %151 = vector.extract_strided_slice %136 {offsets = [0, 384], sizes = [8, 128], strides = [1, 1]} : vector<8x512xf32> to vector<8x128xf32>
    %152 = arith.negf %151 : vector<8x128xf32>
    %153 = math.exp %152 : vector<8x128xf32>
    %cst_46 = arith.constant 1.000000e+00 : f32
    %154 = vector.broadcast %cst_46 : f32 to vector<8x128xf32>
    %155 = arith.addf %154, %153 : vector<8x128xf32>
    %156 = arith.divf %154, %155 : vector<8x128xf32>
    %157 = arith.mulf %148, %99 : vector<8x128xf32>
    %158 = arith.mulf %142, %150 : vector<8x128xf32>
    %159 = arith.addf %157, %158 : vector<8x128xf32>
    %160 = math.tanh %159 : vector<8x128xf32>
    %161 = arith.mulf %156, %160 : vector<8x128xf32>
    %162 = tpu.concatenate %161, %131 in 1 : vector<8x128xf32>, vector<8x128xf32> -> vector<8x256xf32>
    %163 = arith.truncf %162 : vector<8x256xf32> to vector<8x256xbf16>
    %c0_47 = arith.constant 0 : index
    %c0_48 = arith.constant 0 : index
    %164 = vector.load %arg4[%c0_47, %c0_48] : memref<256x512xbf16, #tpu.memory_space<vmem>>, vector<256x512xbf16>
    %cst_49 = arith.constant dense<0.000000e+00> : vector<8x512xf32>
    %165 = tpu.matmul %163, %164, %cst_49 {dimension_numbers = #tpu.dot_dimension_numbers<[1], [0], [0], [1], [0, 0, 1, 1], [], []>} : vector<8x256xbf16>, vector<256x512xbf16>, vector<8x512xf32> -> vector<8x512xf32>
    %166 = arith.addf %165, %7 : vector<8x512xf32>
    %167 = vector.extract_strided_slice %166 {offsets = [0, 0], sizes = [8, 128], strides = [1, 1]} : vector<8x512xf32> to vector<8x128xf32>
    %168 = arith.negf %167 : vector<8x128xf32>
    %169 = math.exp %168 : vector<8x128xf32>
    %cst_50 = arith.constant 1.000000e+00 : f32
    %170 = vector.broadcast %cst_50 : f32 to vector<8x128xf32>
    %171 = arith.addf %170, %169 : vector<8x128xf32>
    %172 = arith.divf %170, %171 : vector<8x128xf32>
    %173 = vector.extract_strided_slice %166 {offsets = [0, 128], sizes = [8, 128], strides = [1, 1]} : vector<8x512xf32> to vector<8x128xf32>
    %174 = arith.negf %173 : vector<8x128xf32>
    %175 = math.exp %174 : vector<8x128xf32>
    %cst_51 = arith.constant 1.000000e+00 : f32
    %176 = vector.broadcast %cst_51 : f32 to vector<8x128xf32>
    %177 = arith.addf %176, %175 : vector<8x128xf32>
    %178 = arith.divf %176, %177 : vector<8x128xf32>
    %179 = vector.extract_strided_slice %166 {offsets = [0, 256], sizes = [8, 128], strides = [1, 1]} : vector<8x512xf32> to vector<8x128xf32>
    %180 = math.tanh %179 : vector<8x128xf32>
    %181 = vector.extract_strided_slice %166 {offsets = [0, 384], sizes = [8, 128], strides = [1, 1]} : vector<8x512xf32> to vector<8x128xf32>
    %182 = arith.negf %181 : vector<8x128xf32>
    %183 = math.exp %182 : vector<8x128xf32>
    %cst_52 = arith.constant 1.000000e+00 : f32
    %184 = vector.broadcast %cst_52 : f32 to vector<8x128xf32>
    %185 = arith.addf %184, %183 : vector<8x128xf32>
    %186 = arith.divf %184, %185 : vector<8x128xf32>
    %187 = arith.mulf %178, %129 : vector<8x128xf32>
    %188 = arith.mulf %172, %180 : vector<8x128xf32>
    %189 = arith.addf %187, %188 : vector<8x128xf32>
    %190 = math.tanh %189 : vector<8x128xf32>
    %191 = arith.mulf %186, %190 : vector<8x128xf32>
    %c24 = arith.constant 24 : index
    %c0_53 = arith.constant 0 : index
    %192 = vector.load %arg9[%c24, %c0_53] : memref<64x512xf32, #tpu.memory_space<vmem>>, vector<8x512xf32>
    %193 = arith.truncf %161 : vector<8x128xf32> to vector<8x128xbf16>
    %c0_54 = arith.constant 0 : index
    %c0_55 = arith.constant 0 : index
    %194 = vector.load %arg3[%c0_54, %c0_55] : memref<128x512xbf16, #tpu.memory_space<vmem>>, vector<128x512xbf16>
    %cst_56 = arith.constant dense<0.000000e+00> : vector<8x512xf32>
    %195 = tpu.matmul %193, %194, %cst_56 {dimension_numbers = #tpu.dot_dimension_numbers<[1], [0], [0], [1], [0, 0, 1, 1], [], []>} : vector<8x128xbf16>, vector<128x512xbf16>, vector<8x512xf32> -> vector<8x512xf32>
    %196 = arith.addf %192, %195 : vector<8x512xf32>
    %197 = vector.extract_strided_slice %196 {offsets = [0, 0], sizes = [8, 128], strides = [1, 1]} : vector<8x512xf32> to vector<8x128xf32>
    %198 = arith.negf %197 : vector<8x128xf32>
    %199 = math.exp %198 : vector<8x128xf32>
    %cst_57 = arith.constant 1.000000e+00 : f32
    %200 = vector.broadcast %cst_57 : f32 to vector<8x128xf32>
    %201 = arith.addf %200, %199 : vector<8x128xf32>
    %202 = arith.divf %200, %201 : vector<8x128xf32>
    %203 = vector.extract_strided_slice %196 {offsets = [0, 128], sizes = [8, 128], strides = [1, 1]} : vector<8x512xf32> to vector<8x128xf32>
    %204 = arith.negf %203 : vector<8x128xf32>
    %205 = math.exp %204 : vector<8x128xf32>
    %cst_58 = arith.constant 1.000000e+00 : f32
    %206 = vector.broadcast %cst_58 : f32 to vector<8x128xf32>
    %207 = arith.addf %206, %205 : vector<8x128xf32>
    %208 = arith.divf %206, %207 : vector<8x128xf32>
    %209 = vector.extract_strided_slice %196 {offsets = [0, 256], sizes = [8, 128], strides = [1, 1]} : vector<8x512xf32> to vector<8x128xf32>
    %210 = math.tanh %209 : vector<8x128xf32>
    %211 = vector.extract_strided_slice %196 {offsets = [0, 384], sizes = [8, 128], strides = [1, 1]} : vector<8x512xf32> to vector<8x128xf32>
    %212 = arith.negf %211 : vector<8x128xf32>
    %213 = math.exp %212 : vector<8x128xf32>
    %cst_59 = arith.constant 1.000000e+00 : f32
    %214 = vector.broadcast %cst_59 : f32 to vector<8x128xf32>
    %215 = arith.addf %214, %213 : vector<8x128xf32>
    %216 = arith.divf %214, %215 : vector<8x128xf32>
    %217 = arith.mulf %208, %159 : vector<8x128xf32>
    %218 = arith.mulf %202, %210 : vector<8x128xf32>
    %219 = arith.addf %217, %218 : vector<8x128xf32>
    %220 = math.tanh %219 : vector<8x128xf32>
    %221 = arith.mulf %216, %220 : vector<8x128xf32>
    %222 = tpu.concatenate %221, %191 in 1 : vector<8x128xf32>, vector<8x128xf32> -> vector<8x256xf32>
    %223 = arith.truncf %222 : vector<8x256xf32> to vector<8x256xbf16>
    %c0_60 = arith.constant 0 : index
    %c0_61 = arith.constant 0 : index
    %224 = vector.load %arg4[%c0_60, %c0_61] : memref<256x512xbf16, #tpu.memory_space<vmem>>, vector<256x512xbf16>
    %cst_62 = arith.constant dense<0.000000e+00> : vector<8x512xf32>
    %225 = tpu.matmul %223, %224, %cst_62 {dimension_numbers = #tpu.dot_dimension_numbers<[1], [0], [0], [1], [0, 0, 1, 1], [], []>} : vector<8x256xbf16>, vector<256x512xbf16>, vector<8x512xf32> -> vector<8x512xf32>
    %226 = arith.addf %225, %7 : vector<8x512xf32>
    %227 = vector.extract_strided_slice %226 {offsets = [0, 0], sizes = [8, 128], strides = [1, 1]} : vector<8x512xf32> to vector<8x128xf32>
    %228 = arith.negf %227 : vector<8x128xf32>
    %229 = math.exp %228 : vector<8x128xf32>
    %cst_63 = arith.constant 1.000000e+00 : f32
    %230 = vector.broadcast %cst_63 : f32 to vector<8x128xf32>
    %231 = arith.addf %230, %229 : vector<8x128xf32>
    %232 = arith.divf %230, %231 : vector<8x128xf32>
    %233 = vector.extract_strided_slice %226 {offsets = [0, 128], sizes = [8, 128], strides = [1, 1]} : vector<8x512xf32> to vector<8x128xf32>
    %234 = arith.negf %233 : vector<8x128xf32>
    %235 = math.exp %234 : vector<8x128xf32>
    %cst_64 = arith.constant 1.000000e+00 : f32
    %236 = vector.broadcast %cst_64 : f32 to vector<8x128xf32>
    %237 = arith.addf %236, %235 : vector<8x128xf32>
    %238 = arith.divf %236, %237 : vector<8x128xf32>
    %239 = vector.extract_strided_slice %226 {offsets = [0, 256], sizes = [8, 128], strides = [1, 1]} : vector<8x512xf32> to vector<8x128xf32>
    %240 = math.tanh %239 : vector<8x128xf32>
    %241 = vector.extract_strided_slice %226 {offsets = [0, 384], sizes = [8, 128], strides = [1, 1]} : vector<8x512xf32> to vector<8x128xf32>
    %242 = arith.negf %241 : vector<8x128xf32>
    %243 = math.exp %242 : vector<8x128xf32>
    %cst_65 = arith.constant 1.000000e+00 : f32
    %244 = vector.broadcast %cst_65 : f32 to vector<8x128xf32>
    %245 = arith.addf %244, %243 : vector<8x128xf32>
    %246 = arith.divf %244, %245 : vector<8x128xf32>
    %247 = arith.mulf %238, %189 : vector<8x128xf32>
    %248 = arith.mulf %232, %240 : vector<8x128xf32>
    %249 = arith.addf %247, %248 : vector<8x128xf32>
    %250 = math.tanh %249 : vector<8x128xf32>
    %251 = arith.mulf %246, %250 : vector<8x128xf32>
    %c32 = arith.constant 32 : index
    %c0_66 = arith.constant 0 : index
    %252 = vector.load %arg9[%c32, %c0_66] : memref<64x512xf32, #tpu.memory_space<vmem>>, vector<8x512xf32>
    %253 = arith.truncf %221 : vector<8x128xf32> to vector<8x128xbf16>
    %c0_67 = arith.constant 0 : index
    %c0_68 = arith.constant 0 : index
    %254 = vector.load %arg3[%c0_67, %c0_68] : memref<128x512xbf16, #tpu.memory_space<vmem>>, vector<128x512xbf16>
    %cst_69 = arith.constant dense<0.000000e+00> : vector<8x512xf32>
    %255 = tpu.matmul %253, %254, %cst_69 {dimension_numbers = #tpu.dot_dimension_numbers<[1], [0], [0], [1], [0, 0, 1, 1], [], []>} : vector<8x128xbf16>, vector<128x512xbf16>, vector<8x512xf32> -> vector<8x512xf32>
    %256 = arith.addf %252, %255 : vector<8x512xf32>
    %257 = vector.extract_strided_slice %256 {offsets = [0, 0], sizes = [8, 128], strides = [1, 1]} : vector<8x512xf32> to vector<8x128xf32>
    %258 = arith.negf %257 : vector<8x128xf32>
    %259 = math.exp %258 : vector<8x128xf32>
    %cst_70 = arith.constant 1.000000e+00 : f32
    %260 = vector.broadcast %cst_70 : f32 to vector<8x128xf32>
    %261 = arith.addf %260, %259 : vector<8x128xf32>
    %262 = arith.divf %260, %261 : vector<8x128xf32>
    %263 = vector.extract_strided_slice %256 {offsets = [0, 128], sizes = [8, 128], strides = [1, 1]} : vector<8x512xf32> to vector<8x128xf32>
    %264 = arith.negf %263 : vector<8x128xf32>
    %265 = math.exp %264 : vector<8x128xf32>
    %cst_71 = arith.constant 1.000000e+00 : f32
    %266 = vector.broadcast %cst_71 : f32 to vector<8x128xf32>
    %267 = arith.addf %266, %265 : vector<8x128xf32>
    %268 = arith.divf %266, %267 : vector<8x128xf32>
    %269 = vector.extract_strided_slice %256 {offsets = [0, 256], sizes = [8, 128], strides = [1, 1]} : vector<8x512xf32> to vector<8x128xf32>
    %270 = math.tanh %269 : vector<8x128xf32>
    %271 = vector.extract_strided_slice %256 {offsets = [0, 384], sizes = [8, 128], strides = [1, 1]} : vector<8x512xf32> to vector<8x128xf32>
    %272 = arith.negf %271 : vector<8x128xf32>
    %273 = math.exp %272 : vector<8x128xf32>
    %cst_72 = arith.constant 1.000000e+00 : f32
    %274 = vector.broadcast %cst_72 : f32 to vector<8x128xf32>
    %275 = arith.addf %274, %273 : vector<8x128xf32>
    %276 = arith.divf %274, %275 : vector<8x128xf32>
    %277 = arith.mulf %268, %219 : vector<8x128xf32>
    %278 = arith.mulf %262, %270 : vector<8x128xf32>
    %279 = arith.addf %277, %278 : vector<8x128xf32>
    %280 = math.tanh %279 : vector<8x128xf32>
    %281 = arith.mulf %276, %280 : vector<8x128xf32>
    %282 = tpu.concatenate %281, %251 in 1 : vector<8x128xf32>, vector<8x128xf32> -> vector<8x256xf32>
    %283 = arith.truncf %282 : vector<8x256xf32> to vector<8x256xbf16>
    %c0_73 = arith.constant 0 : index
    %c0_74 = arith.constant 0 : index
    %284 = vector.load %arg4[%c0_73, %c0_74] : memref<256x512xbf16, #tpu.memory_space<vmem>>, vector<256x512xbf16>
    %cst_75 = arith.constant dense<0.000000e+00> : vector<8x512xf32>
    %285 = tpu.matmul %283, %284, %cst_75 {dimension_numbers = #tpu.dot_dimension_numbers<[1], [0], [0], [1], [0, 0, 1, 1], [], []>} : vector<8x256xbf16>, vector<256x512xbf16>, vector<8x512xf32> -> vector<8x512xf32>
    %286 = arith.addf %285, %7 : vector<8x512xf32>
    %287 = vector.extract_strided_slice %286 {offsets = [0, 0], sizes = [8, 128], strides = [1, 1]} : vector<8x512xf32> to vector<8x128xf32>
    %288 = arith.negf %287 : vector<8x128xf32>
    %289 = math.exp %288 : vector<8x128xf32>
    %cst_76 = arith.constant 1.000000e+00 : f32
    %290 = vector.broadcast %cst_76 : f32 to vector<8x128xf32>
    %291 = arith.addf %290, %289 : vector<8x128xf32>
    %292 = arith.divf %290, %291 : vector<8x128xf32>
    %293 = vector.extract_strided_slice %286 {offsets = [0, 128], sizes = [8, 128], strides = [1, 1]} : vector<8x512xf32> to vector<8x128xf32>
    %294 = arith.negf %293 : vector<8x128xf32>
    %295 = math.exp %294 : vector<8x128xf32>
    %cst_77 = arith.constant 1.000000e+00 : f32
    %296 = vector.broadcast %cst_77 : f32 to vector<8x128xf32>
    %297 = arith.addf %296, %295 : vector<8x128xf32>
    %298 = arith.divf %296, %297 : vector<8x128xf32>
    %299 = vector.extract_strided_slice %286 {offsets = [0, 256], sizes = [8, 128], strides = [1, 1]} : vector<8x512xf32> to vector<8x128xf32>
    %300 = math.tanh %299 : vector<8x128xf32>
    %301 = vector.extract_strided_slice %286 {offsets = [0, 384], sizes = [8, 128], strides = [1, 1]} : vector<8x512xf32> to vector<8x128xf32>
    %302 = arith.negf %301 : vector<8x128xf32>
    %303 = math.exp %302 : vector<8x128xf32>
    %cst_78 = arith.constant 1.000000e+00 : f32
    %304 = vector.broadcast %cst_78 : f32 to vector<8x128xf32>
    %305 = arith.addf %304, %303 : vector<8x128xf32>
    %306 = arith.divf %304, %305 : vector<8x128xf32>
    %307 = arith.mulf %298, %249 : vector<8x128xf32>
    %308 = arith.mulf %292, %300 : vector<8x128xf32>
    %309 = arith.addf %307, %308 : vector<8x128xf32>
    %310 = math.tanh %309 : vector<8x128xf32>
    %311 = arith.mulf %306, %310 : vector<8x128xf32>
    %c40 = arith.constant 40 : index
    %c0_79 = arith.constant 0 : index
    %312 = vector.load %arg9[%c40, %c0_79] : memref<64x512xf32, #tpu.memory_space<vmem>>, vector<8x512xf32>
    %313 = arith.truncf %281 : vector<8x128xf32> to vector<8x128xbf16>
    %c0_80 = arith.constant 0 : index
    %c0_81 = arith.constant 0 : index
    %314 = vector.load %arg3[%c0_80, %c0_81] : memref<128x512xbf16, #tpu.memory_space<vmem>>, vector<128x512xbf16>
    %cst_82 = arith.constant dense<0.000000e+00> : vector<8x512xf32>
    %315 = tpu.matmul %313, %314, %cst_82 {dimension_numbers = #tpu.dot_dimension_numbers<[1], [0], [0], [1], [0, 0, 1, 1], [], []>} : vector<8x128xbf16>, vector<128x512xbf16>, vector<8x512xf32> -> vector<8x512xf32>
    %316 = arith.addf %312, %315 : vector<8x512xf32>
    %317 = vector.extract_strided_slice %316 {offsets = [0, 0], sizes = [8, 128], strides = [1, 1]} : vector<8x512xf32> to vector<8x128xf32>
    %318 = arith.negf %317 : vector<8x128xf32>
    %319 = math.exp %318 : vector<8x128xf32>
    %cst_83 = arith.constant 1.000000e+00 : f32
    %320 = vector.broadcast %cst_83 : f32 to vector<8x128xf32>
    %321 = arith.addf %320, %319 : vector<8x128xf32>
    %322 = arith.divf %320, %321 : vector<8x128xf32>
    %323 = vector.extract_strided_slice %316 {offsets = [0, 128], sizes = [8, 128], strides = [1, 1]} : vector<8x512xf32> to vector<8x128xf32>
    %324 = arith.negf %323 : vector<8x128xf32>
    %325 = math.exp %324 : vector<8x128xf32>
    %cst_84 = arith.constant 1.000000e+00 : f32
    %326 = vector.broadcast %cst_84 : f32 to vector<8x128xf32>
    %327 = arith.addf %326, %325 : vector<8x128xf32>
    %328 = arith.divf %326, %327 : vector<8x128xf32>
    %329 = vector.extract_strided_slice %316 {offsets = [0, 256], sizes = [8, 128], strides = [1, 1]} : vector<8x512xf32> to vector<8x128xf32>
    %330 = math.tanh %329 : vector<8x128xf32>
    %331 = vector.extract_strided_slice %316 {offsets = [0, 384], sizes = [8, 128], strides = [1, 1]} : vector<8x512xf32> to vector<8x128xf32>
    %332 = arith.negf %331 : vector<8x128xf32>
    %333 = math.exp %332 : vector<8x128xf32>
    %cst_85 = arith.constant 1.000000e+00 : f32
    %334 = vector.broadcast %cst_85 : f32 to vector<8x128xf32>
    %335 = arith.addf %334, %333 : vector<8x128xf32>
    %336 = arith.divf %334, %335 : vector<8x128xf32>
    %337 = arith.mulf %328, %279 : vector<8x128xf32>
    %338 = arith.mulf %322, %330 : vector<8x128xf32>
    %339 = arith.addf %337, %338 : vector<8x128xf32>
    %340 = math.tanh %339 : vector<8x128xf32>
    %341 = arith.mulf %336, %340 : vector<8x128xf32>
    %342 = tpu.concatenate %341, %311 in 1 : vector<8x128xf32>, vector<8x128xf32> -> vector<8x256xf32>
    %343 = arith.truncf %342 : vector<8x256xf32> to vector<8x256xbf16>
    %c0_86 = arith.constant 0 : index
    %c0_87 = arith.constant 0 : index
    %344 = vector.load %arg4[%c0_86, %c0_87] : memref<256x512xbf16, #tpu.memory_space<vmem>>, vector<256x512xbf16>
    %cst_88 = arith.constant dense<0.000000e+00> : vector<8x512xf32>
    %345 = tpu.matmul %343, %344, %cst_88 {dimension_numbers = #tpu.dot_dimension_numbers<[1], [0], [0], [1], [0, 0, 1, 1], [], []>} : vector<8x256xbf16>, vector<256x512xbf16>, vector<8x512xf32> -> vector<8x512xf32>
    %346 = arith.addf %345, %7 : vector<8x512xf32>
    %347 = vector.extract_strided_slice %346 {offsets = [0, 0], sizes = [8, 128], strides = [1, 1]} : vector<8x512xf32> to vector<8x128xf32>
    %348 = arith.negf %347 : vector<8x128xf32>
    %349 = math.exp %348 : vector<8x128xf32>
    %cst_89 = arith.constant 1.000000e+00 : f32
    %350 = vector.broadcast %cst_89 : f32 to vector<8x128xf32>
    %351 = arith.addf %350, %349 : vector<8x128xf32>
    %352 = arith.divf %350, %351 : vector<8x128xf32>
    %353 = vector.extract_strided_slice %346 {offsets = [0, 128], sizes = [8, 128], strides = [1, 1]} : vector<8x512xf32> to vector<8x128xf32>
    %354 = arith.negf %353 : vector<8x128xf32>
    %355 = math.exp %354 : vector<8x128xf32>
    %cst_90 = arith.constant 1.000000e+00 : f32
    %356 = vector.broadcast %cst_90 : f32 to vector<8x128xf32>
    %357 = arith.addf %356, %355 : vector<8x128xf32>
    %358 = arith.divf %356, %357 : vector<8x128xf32>
    %359 = vector.extract_strided_slice %346 {offsets = [0, 256], sizes = [8, 128], strides = [1, 1]} : vector<8x512xf32> to vector<8x128xf32>
    %360 = math.tanh %359 : vector<8x128xf32>
    %361 = vector.extract_strided_slice %346 {offsets = [0, 384], sizes = [8, 128], strides = [1, 1]} : vector<8x512xf32> to vector<8x128xf32>
    %362 = arith.negf %361 : vector<8x128xf32>
    %363 = math.exp %362 : vector<8x128xf32>
    %cst_91 = arith.constant 1.000000e+00 : f32
    %364 = vector.broadcast %cst_91 : f32 to vector<8x128xf32>
    %365 = arith.addf %364, %363 : vector<8x128xf32>
    %366 = arith.divf %364, %365 : vector<8x128xf32>
    %367 = arith.mulf %358, %309 : vector<8x128xf32>
    %368 = arith.mulf %352, %360 : vector<8x128xf32>
    %369 = arith.addf %367, %368 : vector<8x128xf32>
    %370 = math.tanh %369 : vector<8x128xf32>
    %371 = arith.mulf %366, %370 : vector<8x128xf32>
    %c48 = arith.constant 48 : index
    %c0_92 = arith.constant 0 : index
    %372 = vector.load %arg9[%c48, %c0_92] : memref<64x512xf32, #tpu.memory_space<vmem>>, vector<8x512xf32>
    %373 = arith.truncf %341 : vector<8x128xf32> to vector<8x128xbf16>
    %c0_93 = arith.constant 0 : index
    %c0_94 = arith.constant 0 : index
    %374 = vector.load %arg3[%c0_93, %c0_94] : memref<128x512xbf16, #tpu.memory_space<vmem>>, vector<128x512xbf16>
    %cst_95 = arith.constant dense<0.000000e+00> : vector<8x512xf32>
    %375 = tpu.matmul %373, %374, %cst_95 {dimension_numbers = #tpu.dot_dimension_numbers<[1], [0], [0], [1], [0, 0, 1, 1], [], []>} : vector<8x128xbf16>, vector<128x512xbf16>, vector<8x512xf32> -> vector<8x512xf32>
    %376 = arith.addf %372, %375 : vector<8x512xf32>
    %377 = vector.extract_strided_slice %376 {offsets = [0, 0], sizes = [8, 128], strides = [1, 1]} : vector<8x512xf32> to vector<8x128xf32>
    %378 = arith.negf %377 : vector<8x128xf32>
    %379 = math.exp %378 : vector<8x128xf32>
    %cst_96 = arith.constant 1.000000e+00 : f32
    %380 = vector.broadcast %cst_96 : f32 to vector<8x128xf32>
    %381 = arith.addf %380, %379 : vector<8x128xf32>
    %382 = arith.divf %380, %381 : vector<8x128xf32>
    %383 = vector.extract_strided_slice %376 {offsets = [0, 128], sizes = [8, 128], strides = [1, 1]} : vector<8x512xf32> to vector<8x128xf32>
    %384 = arith.negf %383 : vector<8x128xf32>
    %385 = math.exp %384 : vector<8x128xf32>
    %cst_97 = arith.constant 1.000000e+00 : f32
    %386 = vector.broadcast %cst_97 : f32 to vector<8x128xf32>
    %387 = arith.addf %386, %385 : vector<8x128xf32>
    %388 = arith.divf %386, %387 : vector<8x128xf32>
    %389 = vector.extract_strided_slice %376 {offsets = [0, 256], sizes = [8, 128], strides = [1, 1]} : vector<8x512xf32> to vector<8x128xf32>
    %390 = math.tanh %389 : vector<8x128xf32>
    %391 = vector.extract_strided_slice %376 {offsets = [0, 384], sizes = [8, 128], strides = [1, 1]} : vector<8x512xf32> to vector<8x128xf32>
    %392 = arith.negf %391 : vector<8x128xf32>
    %393 = math.exp %392 : vector<8x128xf32>
    %cst_98 = arith.constant 1.000000e+00 : f32
    %394 = vector.broadcast %cst_98 : f32 to vector<8x128xf32>
    %395 = arith.addf %394, %393 : vector<8x128xf32>
    %396 = arith.divf %394, %395 : vector<8x128xf32>
    %397 = arith.mulf %388, %339 : vector<8x128xf32>
    %398 = arith.mulf %382, %390 : vector<8x128xf32>
    %399 = arith.addf %397, %398 : vector<8x128xf32>
    %400 = math.tanh %399 : vector<8x128xf32>
    %401 = arith.mulf %396, %400 : vector<8x128xf32>
    %402 = tpu.concatenate %401, %371 in 1 : vector<8x128xf32>, vector<8x128xf32> -> vector<8x256xf32>
    %403 = arith.truncf %402 : vector<8x256xf32> to vector<8x256xbf16>
    %c0_99 = arith.constant 0 : index
    %c0_100 = arith.constant 0 : index
    %404 = vector.load %arg4[%c0_99, %c0_100] : memref<256x512xbf16, #tpu.memory_space<vmem>>, vector<256x512xbf16>
    %cst_101 = arith.constant dense<0.000000e+00> : vector<8x512xf32>
    %405 = tpu.matmul %403, %404, %cst_101 {dimension_numbers = #tpu.dot_dimension_numbers<[1], [0], [0], [1], [0, 0, 1, 1], [], []>} : vector<8x256xbf16>, vector<256x512xbf16>, vector<8x512xf32> -> vector<8x512xf32>
    %406 = arith.addf %405, %7 : vector<8x512xf32>
    %407 = vector.extract_strided_slice %406 {offsets = [0, 0], sizes = [8, 128], strides = [1, 1]} : vector<8x512xf32> to vector<8x128xf32>
    %408 = arith.negf %407 : vector<8x128xf32>
    %409 = math.exp %408 : vector<8x128xf32>
    %cst_102 = arith.constant 1.000000e+00 : f32
    %410 = vector.broadcast %cst_102 : f32 to vector<8x128xf32>
    %411 = arith.addf %410, %409 : vector<8x128xf32>
    %412 = arith.divf %410, %411 : vector<8x128xf32>
    %413 = vector.extract_strided_slice %406 {offsets = [0, 128], sizes = [8, 128], strides = [1, 1]} : vector<8x512xf32> to vector<8x128xf32>
    %414 = arith.negf %413 : vector<8x128xf32>
    %415 = math.exp %414 : vector<8x128xf32>
    %cst_103 = arith.constant 1.000000e+00 : f32
    %416 = vector.broadcast %cst_103 : f32 to vector<8x128xf32>
    %417 = arith.addf %416, %415 : vector<8x128xf32>
    %418 = arith.divf %416, %417 : vector<8x128xf32>
    %419 = vector.extract_strided_slice %406 {offsets = [0, 256], sizes = [8, 128], strides = [1, 1]} : vector<8x512xf32> to vector<8x128xf32>
    %420 = math.tanh %419 : vector<8x128xf32>
    %421 = vector.extract_strided_slice %406 {offsets = [0, 384], sizes = [8, 128], strides = [1, 1]} : vector<8x512xf32> to vector<8x128xf32>
    %422 = arith.negf %421 : vector<8x128xf32>
    %423 = math.exp %422 : vector<8x128xf32>
    %cst_104 = arith.constant 1.000000e+00 : f32
    %424 = vector.broadcast %cst_104 : f32 to vector<8x128xf32>
    %425 = arith.addf %424, %423 : vector<8x128xf32>
    %426 = arith.divf %424, %425 : vector<8x128xf32>
    %427 = arith.mulf %418, %369 : vector<8x128xf32>
    %428 = arith.mulf %412, %420 : vector<8x128xf32>
    %429 = arith.addf %427, %428 : vector<8x128xf32>
    %430 = math.tanh %429 : vector<8x128xf32>
    %431 = arith.mulf %426, %430 : vector<8x128xf32>
    %c56 = arith.constant 56 : index
    %c0_105 = arith.constant 0 : index
    %432 = vector.load %arg9[%c56, %c0_105] : memref<64x512xf32, #tpu.memory_space<vmem>>, vector<8x512xf32>
    %433 = arith.truncf %401 : vector<8x128xf32> to vector<8x128xbf16>
    %c0_106 = arith.constant 0 : index
    %c0_107 = arith.constant 0 : index
    %434 = vector.load %arg3[%c0_106, %c0_107] : memref<128x512xbf16, #tpu.memory_space<vmem>>, vector<128x512xbf16>
    %cst_108 = arith.constant dense<0.000000e+00> : vector<8x512xf32>
    %435 = tpu.matmul %433, %434, %cst_108 {dimension_numbers = #tpu.dot_dimension_numbers<[1], [0], [0], [1], [0, 0, 1, 1], [], []>} : vector<8x128xbf16>, vector<128x512xbf16>, vector<8x512xf32> -> vector<8x512xf32>
    %436 = arith.addf %432, %435 : vector<8x512xf32>
    %437 = vector.extract_strided_slice %436 {offsets = [0, 0], sizes = [8, 128], strides = [1, 1]} : vector<8x512xf32> to vector<8x128xf32>
    %438 = arith.negf %437 : vector<8x128xf32>
    %439 = math.exp %438 : vector<8x128xf32>
    %cst_109 = arith.constant 1.000000e+00 : f32
    %440 = vector.broadcast %cst_109 : f32 to vector<8x128xf32>
    %441 = arith.addf %440, %439 : vector<8x128xf32>
    %442 = arith.divf %440, %441 : vector<8x128xf32>
    %443 = vector.extract_strided_slice %436 {offsets = [0, 128], sizes = [8, 128], strides = [1, 1]} : vector<8x512xf32> to vector<8x128xf32>
    %444 = arith.negf %443 : vector<8x128xf32>
    %445 = math.exp %444 : vector<8x128xf32>
    %cst_110 = arith.constant 1.000000e+00 : f32
    %446 = vector.broadcast %cst_110 : f32 to vector<8x128xf32>
    %447 = arith.addf %446, %445 : vector<8x128xf32>
    %448 = arith.divf %446, %447 : vector<8x128xf32>
    %449 = vector.extract_strided_slice %436 {offsets = [0, 256], sizes = [8, 128], strides = [1, 1]} : vector<8x512xf32> to vector<8x128xf32>
    %450 = math.tanh %449 : vector<8x128xf32>
    %451 = vector.extract_strided_slice %436 {offsets = [0, 384], sizes = [8, 128], strides = [1, 1]} : vector<8x512xf32> to vector<8x128xf32>
    %452 = arith.negf %451 : vector<8x128xf32>
    %453 = math.exp %452 : vector<8x128xf32>
    %cst_111 = arith.constant 1.000000e+00 : f32
    %454 = vector.broadcast %cst_111 : f32 to vector<8x128xf32>
    %455 = arith.addf %454, %453 : vector<8x128xf32>
    %456 = arith.divf %454, %455 : vector<8x128xf32>
    %457 = arith.mulf %448, %399 : vector<8x128xf32>
    %458 = arith.mulf %442, %450 : vector<8x128xf32>
    %459 = arith.addf %457, %458 : vector<8x128xf32>
    %460 = math.tanh %459 : vector<8x128xf32>
    %461 = arith.mulf %456, %460 : vector<8x128xf32>
    %462 = tpu.concatenate %461, %431 in 1 : vector<8x128xf32>, vector<8x128xf32> -> vector<8x256xf32>
    %463 = arith.truncf %462 : vector<8x256xf32> to vector<8x256xbf16>
    %c0_112 = arith.constant 0 : index
    %c0_113 = arith.constant 0 : index
    %464 = vector.load %arg4[%c0_112, %c0_113] : memref<256x512xbf16, #tpu.memory_space<vmem>>, vector<256x512xbf16>
    %cst_114 = arith.constant dense<0.000000e+00> : vector<8x512xf32>
    %465 = tpu.matmul %463, %464, %cst_114 {dimension_numbers = #tpu.dot_dimension_numbers<[1], [0], [0], [1], [0, 0, 1, 1], [], []>} : vector<8x256xbf16>, vector<256x512xbf16>, vector<8x512xf32> -> vector<8x512xf32>
    %466 = arith.addf %465, %7 : vector<8x512xf32>
    %467 = vector.extract_strided_slice %466 {offsets = [0, 0], sizes = [8, 128], strides = [1, 1]} : vector<8x512xf32> to vector<8x128xf32>
    %468 = arith.negf %467 : vector<8x128xf32>
    %469 = math.exp %468 : vector<8x128xf32>
    %cst_115 = arith.constant 1.000000e+00 : f32
    %470 = vector.broadcast %cst_115 : f32 to vector<8x128xf32>
    %471 = arith.addf %470, %469 : vector<8x128xf32>
    %472 = arith.divf %470, %471 : vector<8x128xf32>
    %473 = vector.extract_strided_slice %466 {offsets = [0, 128], sizes = [8, 128], strides = [1, 1]} : vector<8x512xf32> to vector<8x128xf32>
    %474 = arith.negf %473 : vector<8x128xf32>
    %475 = math.exp %474 : vector<8x128xf32>
    %cst_116 = arith.constant 1.000000e+00 : f32
    %476 = vector.broadcast %cst_116 : f32 to vector<8x128xf32>
    %477 = arith.addf %476, %475 : vector<8x128xf32>
    %478 = arith.divf %476, %477 : vector<8x128xf32>
    %479 = vector.extract_strided_slice %466 {offsets = [0, 256], sizes = [8, 128], strides = [1, 1]} : vector<8x512xf32> to vector<8x128xf32>
    %480 = math.tanh %479 : vector<8x128xf32>
    %481 = vector.extract_strided_slice %466 {offsets = [0, 384], sizes = [8, 128], strides = [1, 1]} : vector<8x512xf32> to vector<8x128xf32>
    %482 = arith.negf %481 : vector<8x128xf32>
    %483 = math.exp %482 : vector<8x128xf32>
    %cst_117 = arith.constant 1.000000e+00 : f32
    %484 = vector.broadcast %cst_117 : f32 to vector<8x128xf32>
    %485 = arith.addf %484, %483 : vector<8x128xf32>
    %486 = arith.divf %484, %485 : vector<8x128xf32>
    %487 = arith.mulf %478, %429 : vector<8x128xf32>
    %488 = arith.mulf %472, %480 : vector<8x128xf32>
    %489 = arith.addf %487, %488 : vector<8x128xf32>
    %490 = math.tanh %489 : vector<8x128xf32>
    %491 = arith.mulf %486, %490 : vector<8x128xf32>
    %c0_118 = arith.constant 0 : index
    %c0_119 = arith.constant 0 : index
    %492 = vector.load %arg6[%c0_118, %c0_119] : memref<128x128xf32, #tpu.memory_space<vmem>>, vector<128x128xf32>
    %cst_120 = arith.constant dense<0.000000e+00> : vector<8x128xf32>
    %493 = tpu.matmul %491, %492, %cst_120 {dimension_numbers = #tpu.dot_dimension_numbers<[1], [0], [0], [1], [0, 0, 1, 1], [], []>} : vector<8x128xf32>, vector<128x128xf32>, vector<8x128xf32> -> vector<8x128xf32>
    %c0_121 = arith.constant 0 : index
    %c0_122 = arith.constant 0 : index
    %494 = vector.load %arg7[%c0_121, %c0_122] : memref<1x128xf32, #tpu.memory_space<vmem>>, vector<1x128xf32>
    %495 = vector.broadcast %494 : vector<1x128xf32> to vector<8x128xf32>
    %496 = arith.addf %493, %495 : vector<8x128xf32>
    %c0_123 = arith.constant 0 : index
    %c0_124 = arith.constant 0 : index
    %497 = vector.load %arg8[%c0_123, %c0_124] : memref<8x128xf32, #tpu.memory_space<vmem>>, vector<8x128xf32>
    tpu.vector_store %arg8[%c0_123, %c0_124], %496 {strides = array<i32>} : memref<8x128xf32, #tpu.memory_space<vmem>>, vector<8x128xf32>,
    return
  }
}

</mosaic_0001>

<bundles_post_ra>
// kernel: tpu_custom_call.1
= control target key start
LH: loop header
LB: loop body
LE: loop exit
PB: predicated region body
PF: predicated region fallthrough
CT: control target
= control target key end

     0   :  { %13 = vsyncpa [#allocation4], 0  ;;  %s5630_s0 = inlined_call_operand.vmem [shape: f32[64,5], index: 0, kind: input, shape index: {}]   ;;  %s5631_s1 = inlined_call_operand.vmem [shape: f32[5,512], index: 1, kind: input, shape index: {}]   ;;  %s5632_s2 = inlined_call_operand.vmem [shape: f32[1,512], index: 2, kind: input, shape index: {}]   ;;  %s5633_s3 = inlined_call_operand.hbm [shape: bf16[128,512], index: 3, kind: input, shape index: {}]   ;;  %s5634_s4 = inlined_call_operand.hbm [shape: bf16[256,512], index: 4, kind: input, shape index: {}]   ;;  %s5635_s5 = inlined_call_operand.vmem [shape: f32[8,512], index: 5, kind: input, shape index: {}]   ;;  %s5636_s6 = inlined_call_operand.hbm [shape: f32[128,128], index: 6, kind: input, shape index: {}]   ;;  %s5637_s7 = inlined_call_operand.vmem [shape: f32[1,128], index: 7, kind: input, shape index: {}]   ;;  %s5638_s8 = inlined_call_operand.hbm [shape: f32[8,128], index: 8, kind: output, shape index: {}]  }
   0x1   :  { %14 = vsyncpa [#allocation7], 0 }
   0x2   :  { %15 = vsyncpa [#allocation5], 0  ;;  %s3815_s27 = smov [#allocation6]   ;;  %s3816_s29 = smov [#allocation3]  }
   0x3   :  { %s39_s28 = sshll.u32 %s3815_s27, 4  ;;  %s27_s30 = sshll.u32 %s3816_s29, 4  ;;  %s40_s28 = int_to_ptr.vmem [resolvable:$true] %s39_s28  ;;  %s3872_s30 = int_to_ptr.vmem [resolvable:$true] %s27_s30 }
   0x4   :  { %s3721_s11 = scalar_lea.hbm %s5634_s4, 8192 }
   0x5   :  { %p3722_p0 = scmp.ne.s32.totalorder %s5634_s4, %s3721_s11  ;;  %p3725_p1 = scmp.lt.u32.totalorder %s3721_s11, %s5634_s4 }
   0x7   :  { %p3727_p2 = pnand %p3725_p1, %p3722_p0 }
   0x9   :  { %3730 = shalt.err (!%p3727_p2)
}
   0xa   :  { %s3731_s16 = scalar_lea.vmem %s40_s28, 8192  ;;  %p3736_p4 = scmp.lt.s32.totalorder %s40_s28, %s40_s28 }
   0xb   :  { %p3732_p3 = scmp.ne.s32.totalorder %s40_s28, %s3731_s16  ;;  %p3737_p5 = scmp.lt.s32.totalorder %s3731_s16, %s3731_s16 }
   0xd   :  { %p3738_p6 = por %p3737_p5, %p3736_p4 }
   0xf   :  { %p3739_p7 = pnand %p3738_p6, %p3732_p3 }
  0x11   :  { %3742 = shalt.err (!%p3739_p7)
}
  0x12   :  { %s3817_s17 = smov 256   ;;  %s3818_s18 = smov 16  }
  0x13   :  { %45 = dma.hbm_to_vmem [thread:$0]  %s5634_s4, 8192, %s40_s28, [#allocation7], %s3817_s17, %s3817_s17, %s3818_s18  }
  0x14   :  { %s3743_s23 = scalar_lea.hbm %s5633_s3, 4096 }
  0x15   :  { %p3744_p8 = scmp.ne.s32.totalorder %s5633_s3, %s3743_s23  ;;  %p3747_p9 = scmp.lt.u32.totalorder %s3743_s23, %s5633_s3 }
  0x17   :  { %p3749_p10 = pnand %p3747_p9, %p3744_p8 }
  0x19   :  { %3752 = shalt.err (!%p3749_p10)
}
  0x1a   :  { %s3753_s29 = scalar_lea.vmem %s3872_s30, 4096  ;;  %p3758_p12 = scmp.lt.s32.totalorder %s3872_s30, %s3872_s30 }
  0x1b   :  { %p3754_p11 = scmp.ne.s32.totalorder %s3872_s30, %s3753_s29  ;;  %p3759_p13 = scmp.lt.s32.totalorder %s3753_s29, %s3753_s29 }
  0x1d   :  { %p3760_p0 = por %p3759_p13, %p3758_p12 }
  0x1f   :  { %p3761_p1 = pnand %p3760_p0, %p3754_p11 }
  0x21   :  { %3764 = shalt.err (!%p3761_p1)
}
  0x22   :  { %33 = dma.hbm_to_vmem [thread:$0]  %s5633_s3, 4096, %s3872_s30, [#allocation4], %s3817_s17, %s3817_s17, %s3818_s18  }
  0x23   :  { %s3819_s9 = smov [#allocation8]   ;;  %s3765_s13 = scalar_lea.hbm %s5636_s6, 2048 }
  0x24   :  { %s53_s10 = sshll.u32 %s3819_s9, 4  ;;  %p3766_p2 = scmp.ne.s32.totalorder %s5636_s6, %s3765_s13  ;;  %s54_s10 = int_to_ptr.vmem [resolvable:$true] %s53_s10 }
  0x25   :  { %p3769_p3 = scmp.lt.u32.totalorder %s3765_s13, %s5636_s6 }
  0x27   :  { %p3771_p4 = pnand %p3769_p3, %p3766_p2 }
  0x29   :  { %3774 = shalt.err (!%p3771_p4)
}
  0x2a   :  { %s3775_s20 = scalar_lea.vmem %s54_s10, 2048  ;;  %p3780_p6 = scmp.lt.s32.totalorder %s54_s10, %s54_s10 }
  0x2b   :  { %p3776_p5 = scmp.ne.s32.totalorder %s54_s10, %s3775_s20  ;;  %p3781_p7 = scmp.lt.s32.totalorder %s3775_s20, %s3775_s20 }
  0x2d   :  { %p3782_p8 = por %p3781_p7, %p3780_p6 }
  0x2f   :  { %p3783_p9 = pnand %p3782_p8, %p3776_p5 }
  0x31   :  { %3786 = shalt.err (!%p3783_p9)
}
  0x32   :  { %s3820_s3 = smov 128   ;;  %s3821_s30 = smov 8  }
  0x33   :  { %59 = dma.hbm_to_vmem [thread:$0]  %s5636_s6, 2048, %s54_s10, [#allocation7], %s3820_s3, %s3820_s3, %s3821_s30  }
  0x34   :  { %3809 = dma.done.wait [#allocation4], 4096  }
  0x35   :  { %3810 = vsyncadd [#allocation4], 4294963200 }
  0x36   :  { %3811 = dma.done.wait [#allocation7], 10240  }
  0x37   :  { %3812 = vsyncadd [#allocation7], 4294957056  ;;  %v5639_v0 = vmov 0.0   ;;  %vm131_vm0 = vcmask 1044480   ;;  %vm106_vm1 = vcmask 39936   ;;  %v72_v5 = vld [vmem:[%s5630_s0] sm:$0xff] }
  0x38   :  { %208 = vmatprep.mubr.f32.mxu0 %v5639_v0  ;;  %321 = vmatprep.mubr.f32.mxu1 %v5639_v0  ;;  %v81_v1 = vld [vmem:[%s5631_s1 + $0x8] sm:$0x1f]  ;;  %v83_v2 = vld [vmem:[%s5631_s1 + $0x18] sm:$0x1f]  ;;  %v80_v3 = vld [vmem:[%s5631_s1] sm:$0x1f] }
  0x39   :  { %2868 = vmatprep.subr.msk.mxu0 %vm131_vm0, %v81_v1  ;;  %2878 = vmatprep.subr.msk.mxu1 %vm131_vm0, %v83_v2  ;;  %v82_v4 = vld [vmem:[%s5631_s1 + $0x10] sm:$0x1f]  ;;  %v3936_v7 = vld [vmem:[#allocation3 + $0xc] ss:$16 sps:$4 sm:$0xff]   ;;  %v3941_v9 = vld [vmem:[#allocation3 + $0x8] ss:$16 sps:$4 sm:$0xff]  }
  0x3a   :  { %2869 = vmatpush1.msk.msra.mxu0 %vm131_vm0, %v80_v3  ;;  %2879 = vmatpush1.msk.msra.mxu1 %vm131_vm0, %v82_v4  ;;  %v3932_v6 = vld [vmem:[#allocation3 + $0x4] ss:$16 sps:$4 sm:$0xff]   ;;  %v3938_v8 = vld [vmem:[#allocation3] ss:$16 sps:$4 sm:$0xff]   ;;  %v73_v10 = vld [vmem:[%s5630_s0 + $0x8] sm:$0xff]  ;;  %v5640_v45 = vmov 0  }
  0x3b   :  { %2870 = vmatmul.mubr.msk.f32.vlgmr.msra.gmra.mrb[0].mxu0 %vm106_vm1, %v72_v5  ;;  %2880 = vmatmul.mubr.msk.f32.vlgmr.msra.gmra.mrb[0].mxu1 %vm106_vm1, %v72_v5  ;;  %v3949_v11 = vld [vmem:[#allocation3 + $0x24] ss:$16 sps:$4 sm:$0xff]   ;;  %v3953_v12 = vld [vmem:[#allocation3 + $0x2c] ss:$16 sps:$4 sm:$0xff]   ;;  %v3955_v13 = vld [vmem:[#allocation3 + $0x20] ss:$16 sps:$4 sm:$0xff]  }
  0x3c   :  { %602 = vmatprep.subr.bf16.mxu0 %v3932_v6  ;;  %214 = vmatprep.mubr.f32.mxu0 %v5639_v0  ;;  %v3959_v14 = vld [vmem:[#allocation3 + $0x28] ss:$16 sps:$4 sm:$0xff]   ;;  %v74_v15 = vld [vmem:[%s5630_s0 + $0x10] sm:$0xff]  ;;  %v3970_v17 = vld [vmem:[#allocation3 + $0x4c] ss:$16 sps:$4 sm:$0xff]   ;;  %vm3825_vm2 = vmmov 0  }
  0x3d   :  { %643 = vmatprep.subr.bf16.mxu1 %v3936_v7  ;;  %603 = vmatpush1.bf16.msra.mxu0 %v3938_v8  ;;  %v3966_v16 = vld [vmem:[#allocation3 + $0x44] ss:$16 sps:$4 sm:$0xff]   ;;  %v3972_v18 = vld [vmem:[#allocation3 + $0x40] ss:$16 sps:$4 sm:$0xff]   ;;  %v3976_v19 = vld [vmem:[#allocation3 + $0x48] ss:$16 sps:$4 sm:$0xff]  }
  0x3e   :  { %644 = vmatpush1.bf16.msra.mxu1 %v3941_v9  ;;  %327 = vmatprep.mubr.f32.mxu1 %v5639_v0  ;;  %v75_v20 = vld [vmem:[%s5630_s0 + $0x18] sm:$0xff]  ;;  %v3985_v21 = vld [vmem:[#allocation3 + $0x64] ss:$16 sps:$4 sm:$0xff]   ;;  %v3991_v23 = vld [vmem:[#allocation3 + $0x60] ss:$16 sps:$4 sm:$0xff]   ;;  %s3826_s30 = smov [#allocation9]  }
  0x3f   :  { %2871 = vmatmul.mubr.msk.f32.gmra.mrb[2].mxu0 %vm106_vm1, %v73_v10  ;;  %2881 = vmatmul.mubr.msk.f32.gmra.mrb[2].mxu1 %vm106_vm1, %v73_v10  ;;  %v3987_v22 = vld [vmem:[#allocation3 + $0x6c] ss:$16 sps:$4 sm:$0xff]   ;;  %v3995_v24 = vld [vmem:[#allocation3 + $0x68] ss:$16 sps:$4 sm:$0xff]   ;;  %v76_v25 = vld [vmem:[%s5630_s0 + $0x20] sm:$0xff] }
  0x40   :  { %604 = vmatprep.subr.bf16.mxu0 %v3949_v11  ;;  %645 = vmatprep.subr.bf16.mxu1 %v3953_v12  ;;  %v4004_v26 = vld [vmem:[#allocation3 + $0x84] ss:$16 sps:$4 sm:$0xff]   ;;  %v4006_v27 = vld [vmem:[#allocation3 + $0x8c] ss:$16 sps:$4 sm:$0xff]   ;;  %v4010_v28 = vld [vmem:[#allocation3 + $0x80] ss:$16 sps:$4 sm:$0xff]  }
  0x41   :  { %605 = vmatpush1.bf16.msra.mxu0 %v3955_v13  ;;  %220 = vmatprep.mubr.f32.mxu0 %v5639_v0  ;;  %v4014_v29 = vld [vmem:[#allocation3 + $0x88] ss:$16 sps:$4 sm:$0xff]   ;;  %v4021_v31 = vld [vmem:[#allocation3 + $0xa4] ss:$16 sps:$4 sm:$0xff]   ;;  %v4025_v32 = vld [vmem:[#allocation3 + $0xac] ss:$16 sps:$4 sm:$0xff]  }
  0x42   :  { %646 = vmatpush1.bf16.msra.mxu1 %v3959_v14  ;;  %333 = vmatprep.mubr.f32.mxu1 %v5639_v0  ;;  %v77_v30 = vld [vmem:[%s5630_s0 + $0x28] sm:$0xff]  ;;  %v4029_v33 = vld [vmem:[#allocation3 + $0xa0] ss:$16 sps:$4 sm:$0xff]   ;;  %v4042_v36 = vld [vmem:[#allocation3 + $0xc4] ss:$16 sps:$4 sm:$0xff]  }
  0x43   :  { %2872 = vmatmul.mubr.msk.f32.gmra.mrb[4].mxu0 %vm106_vm1, %v74_v15  ;;  %2882 = vmatmul.mubr.msk.f32.gmra.mrb[4].mxu1 %vm106_vm1, %v74_v15  ;;  %v4033_v34 = vld [vmem:[#allocation3 + $0xa8] ss:$16 sps:$4 sm:$0xff]   ;;  %v78_v35 = vld [vmem:[%s5630_s0 + $0x30] sm:$0xff]  ;;  %v4044_v37 = vld [vmem:[#allocation3 + $0xcc] ss:$16 sps:$4 sm:$0xff]  }
  0x44   :  { %606 = vmatprep.subr.bf16.mxu0 %v3966_v16  ;;  %647 = vmatprep.subr.bf16.mxu1 %v3970_v17  ;;  %v4048_v38 = vld [vmem:[#allocation3 + $0xc0] ss:$16 sps:$4 sm:$0xff]   ;;  %v4050_v39 = vld [vmem:[#allocation3 + $0xc8] ss:$16 sps:$4 sm:$0xff]   ;;  %v4057_v41 = vld [vmem:[#allocation3 + $0xe4] ss:$16 sps:$4 sm:$0xff]  }
  0x45   :  { %607 = vmatpush1.bf16.msra.mxu0 %v3972_v18  ;;  %226 = vmatprep.mubr.f32.mxu0 %v5639_v0  ;;  %v79_v40 = vld [vmem:[%s5630_s0 + $0x38] sm:$0xff]  ;;  %v4063_v43 = vld [vmem:[#allocation3 + $0xe0] ss:$16 sps:$4 sm:$0xff]   ;;  %v4083_v46 = vld [vmem:[#allocation6 + $0x4] ss:$16 sps:$4 sm:$0xff]   ;;  %s2858_s0 = sshll.u32 %s3826_s30, 4  ;;  %s2859_s0 = int_to_ptr.vmem [resolvable:$true] %s2858_s0 }
  0x46   :  { %648 = vmatpush1.bf16.msra.mxu1 %v3976_v19  ;;  %339 = vmatprep.mubr.f32.mxu1 %v5639_v0  ;;  %v4059_v42 = vld [vmem:[#allocation3 + $0xec] ss:$16 sps:$4 sm:$0xff]   ;;  %v4067_v44 = vld [vmem:[#allocation3 + $0xe8] ss:$16 sps:$4 sm:$0xff]   ;;  %v4087_v48 = vld [vmem:[#allocation6] ss:$16 sps:$4 sm:$0xff]   ;;  %p3792_p11 = scmp.lt.s32.totalorder %s2859_s0, %s2859_s0 }
  0x47   :  { %2873 = vmatmul.mubr.msk.f32.gmra.mrb[6].mxu0 %vm106_vm1, %v75_v20  ;;  %2883 = vmatmul.mubr.msk.f32.gmra.mrb[6].mxu1 %vm106_vm1, %v75_v20  ;;  %v4085_v47 = vld [vmem:[#allocation6 + $0xc] ss:$16 sps:$4 sm:$0xff]   ;;  %v4089_v49 = vld [vmem:[#allocation6 + $0x8] ss:$16 sps:$4 sm:$0xff]   ;;  %v4095_v50 = vld [vmem:[#allocation6 + $0x24] ss:$16 sps:$4 sm:$0xff]  }
  0x48   :  { %608 = vmatprep.subr.bf16.mxu0 %v3985_v21  ;;  %649 = vmatprep.subr.bf16.mxu1 %v3987_v22  ;;  %v4097_v51 = vld [vmem:[#allocation6 + $0x2c] ss:$16 sps:$4 sm:$0xff]   ;;  %v4099_v52 = vld [vmem:[#allocation6 + $0x20] ss:$16 sps:$4 sm:$0xff]   ;;  %v4101_v53 = vld [vmem:[#allocation6 + $0x28] ss:$16 sps:$4 sm:$0xff]  }
  0x49   :  { %609 = vmatpush1.bf16.msra.mxu0 %v3991_v23  ;;  %232 = vmatprep.mubr.f32.mxu0 %v5639_v0  ;;  %v4107_v54 = vld [vmem:[#allocation6 + $0x44] ss:$16 sps:$4 sm:$0xff]   ;;  %v4109_v55 = vld [vmem:[#allocation6 + $0x4c] ss:$16 sps:$4 sm:$0xff]   ;;  %v4111_v56 = vld [vmem:[#allocation6 + $0x40] ss:$16 sps:$4 sm:$0xff]  }
  0x4a   :  { %650 = vmatpush1.bf16.msra.mxu1 %v3995_v24  ;;  %345 = vmatprep.mubr.f32.mxu1 %v5639_v0  ;;  %5979 = vst [vmem:[#allocation13_spill] sm:$0xff] %v4109_v55  ;;  %5980 = vst [vmem:[#allocation14_spill] sm:$0xff] %v4111_v56  ;;  %v4113_v57 = vld [vmem:[#allocation6 + $0x48] ss:$16 sps:$4 sm:$0xff]   ;;  %v4119_v58 = vld [vmem:[#allocation6 + $0x64] ss:$16 sps:$4 sm:$0xff]  }
  0x4b   :  { %2874 = vmatmul.mubr.msk.f32.gmra.mrb[8].mxu0 %vm106_vm1, %v76_v25  ;;  %2884 = vmatmul.mubr.msk.f32.gmra.mrb[8].mxu1 %vm106_vm1, %v76_v25  ;;  %5981 = vst [vmem:[#allocation15_spill] sm:$0xff] %v4113_v57  ;;  %5982 = vst [vmem:[#allocation16_spill] sm:$0xff] %v4119_v58  ;;  %v4121_v59 = vld [vmem:[#allocation6 + $0x6c] ss:$16 sps:$4 sm:$0xff]   ;;  %v4123_v60 = vld [vmem:[#allocation6 + $0x60] ss:$16 sps:$4 sm:$0xff]  }
  0x4c   :  { %610 = vmatprep.subr.bf16.mxu0 %v4004_v26  ;;  %651 = vmatprep.subr.bf16.mxu1 %v4006_v27  ;;  %5983 = vst [vmem:[#allocation17_spill] sm:$0xff] %v4121_v59  ;;  %5984 = vst [vmem:[#allocation18_spill] sm:$0xff] %v4123_v60  ;;  %v4125_v61 = vld [vmem:[#allocation6 + $0x68] ss:$16 sps:$4 sm:$0xff]   ;;  %v4131_v62 = vld [vmem:[#allocation6 + $0x84] ss:$16 sps:$4 sm:$0xff]  }
  0x4d   :  { %611 = vmatpush1.bf16.msra.mxu0 %v4010_v28  ;;  %238 = vmatprep.mubr.f32.mxu0 %v5639_v0  ;;  %5985 = vst [vmem:[#allocation19_spill] sm:$0xff] %v4125_v61  ;;  %5986 = vst [vmem:[#allocation20_spill] sm:$0xff] %v4131_v62  ;;  %v4133_v63 = vld [vmem:[#allocation6 + $0x8c] ss:$16 sps:$4 sm:$0xff]   ;;  %v4135_v1 = vld [vmem:[#allocation6 + $0x80] ss:$16 sps:$4 sm:$0xff]  }
  0x4e   :  { %652 = vmatpush1.bf16.msra.mxu1 %v4014_v29  ;;  %351 = vmatprep.mubr.f32.mxu1 %v5639_v0  ;;  %5987 = vst [vmem:[#allocation21_spill] sm:$0xff] %v4133_v63  ;;  %5988 = vst [vmem:[#allocation22_spill] sm:$0xff] %v4135_v1  ;;  %v4137_v2 = vld [vmem:[#allocation6 + $0x88] ss:$16 sps:$4 sm:$0xff]   ;;  %v4143_v3 = vld [vmem:[#allocation6 + $0xa4] ss:$16 sps:$4 sm:$0xff]  }
  0x4f   :  { %2875 = vmatmul.mubr.msk.f32.gmra.mrb[10].mxu0 %vm106_vm1, %v77_v30  ;;  %2885 = vmatmul.mubr.msk.f32.gmra.mrb[10].mxu1 %vm106_vm1, %v77_v30  ;;  %5989 = vst [vmem:[#allocation23_spill] sm:$0xff] %v4137_v2  ;;  %5990 = vst [vmem:[#allocation24_spill] sm:$0xff] %v4143_v3  ;;  %v4145_v4 = vld [vmem:[#allocation6 + $0xac] ss:$16 sps:$4 sm:$0xff]   ;;  %v4147_v5 = vld [vmem:[#allocation6 + $0xa0] ss:$16 sps:$4 sm:$0xff]  }
  0x50   :  { %612 = vmatprep.subr.bf16.mxu0 %v4021_v31  ;;  %653 = vmatprep.subr.bf16.mxu1 %v4025_v32  ;;  %5991 = vst [vmem:[#allocation25_spill] sm:$0xff] %v4145_v4  ;;  %5992 = vst [vmem:[#allocation26_spill] sm:$0xff] %v4147_v5  ;;  %v4149_v10 = vld [vmem:[#allocation6 + $0xa8] ss:$16 sps:$4 sm:$0xff]   ;;  %v4155_v15 = vld [vmem:[#allocation6 + $0xc4] ss:$16 sps:$4 sm:$0xff]  }
  0x51   :  { %613 = vmatpush1.bf16.msra.mxu0 %v4029_v33  ;;  %244 = vmatprep.mubr.f32.mxu0 %v5639_v0  ;;  %5993 = vst [vmem:[#allocation27_spill] sm:$0xff] %v4149_v10  ;;  %5994 = vst [vmem:[#allocation28_spill] sm:$0xff] %v4155_v15  ;;  %v4157_v20 = vld [vmem:[#allocation6 + $0xcc] ss:$16 sps:$4 sm:$0xff]   ;;  %v4159_v25 = vld [vmem:[#allocation6 + $0xc0] ss:$16 sps:$4 sm:$0xff]  }
  0x52   :  { %654 = vmatpush1.bf16.msra.mxu1 %v4033_v34  ;;  %357 = vmatprep.mubr.f32.mxu1 %v5639_v0  ;;  %5995 = vst [vmem:[#allocation29_spill] sm:$0xff] %v4157_v20  ;;  %5996 = vst [vmem:[#allocation30_spill] sm:$0xff] %v4159_v25  ;;  %v4161_v30 = vld [vmem:[#allocation6 + $0xc8] ss:$16 sps:$4 sm:$0xff]   ;;  %s3787_s17 = scalar_lea.vmem %s2859_s0, 128 }
  0x53   :  { %2876 = vmatmul.mubr.msk.f32.gmra.mrb[12].mxu0 %vm106_vm1, %v78_v35  ;;  %2886 = vmatmul.mubr.msk.f32.gmra.mrb[12].mxu1 %vm106_vm1, %v78_v35  ;;  %5997 = vst [vmem:[#allocation31_spill] sm:$0xff] %v4161_v30  ;;  %v4167_v35 = vld [vmem:[#allocation6 + $0xe4] ss:$16 sps:$4 sm:$0xff]   ;;  %p3788_p10 = scmp.ne.s32.totalorder %s2859_s0, %s3787_s17  ;;  %p3793_p12 = scmp.lt.s32.totalorder %s3787_s17, %s3787_s17 }
  0x54   :  { %614 = vmatprep.subr.bf16.mxu0 %v4042_v36  ;;  %655 = vmatprep.subr.bf16.mxu1 %v4044_v37  ;;  %5998 = vst [vmem:[#allocation32_spill] sm:$0xff] %v4167_v35 }
  0x55   :  { %615 = vmatpush1.bf16.msra.mxu0 %v4048_v38  ;;  %250 = vmatprep.mubr.f32.mxu0 %v5639_v0  ;;  %p3794_p13 = por %p3793_p12, %p3792_p11 }
  0x56   :  { %656 = vmatpush1.bf16.msra.mxu1 %v4050_v39  ;;  %363 = vmatprep.mubr.f32.mxu1 %v5639_v0  ;;  %v4171_v0 = vld [vmem:[#allocation6 + $0xe0] ss:$16 sps:$4 sm:$0xff]  }
  0x57   :  { %2877 = vmatmul.mubr.msk.f32.gmra.mrb[14].mxu0 %vm106_vm1, %v79_v40  ;;  %2887 = vmatmul.mubr.msk.f32.gmra.mrb[14].mxu1 %vm106_vm1, %v79_v40  ;;  %v4169_v40 = vld [vmem:[#allocation6 + $0xec] ss:$16 sps:$4 sm:$0xff]   ;;  %6000 = vst [vmem:[#allocation34_spill] sm:$0xff] %v4171_v0  ;;  %p3795_p0 = pnand %p3794_p13, %p3788_p10 }
  0x58   :  { %616 = vmatprep.subr.bf16.mxu0 %v4057_v41  ;;  %657 = vmatprep.subr.bf16.mxu1 %v4059_v42  ;;  %5999 = vst [vmem:[#allocation33_spill] sm:$0xff] %v4169_v40 }
  0x59   :  { %617 = vmatpush1.bf16.msra.mxu0 %v4063_v43  ;;  %634 = vmatprep.mubr.bf16.mxu0 %v5640_v45 }
  0x5a   :  { %658 = vmatpush1.bf16.msra.mxu1 %v4067_v44  ;;  %675 = vmatprep.mubr.bf16.mxu1 %v5640_v45 }
  0x5b   :  { %1098 = vmatprep.subr.bf16.mxu0 %v4083_v46  ;;  %1139 = vmatprep.subr.bf16.mxu1 %v4085_v47 }
  0x5c   :  { %635 = vmatmul.mubr.bf16.vlgmr.msra.gmra.mrb[16].mxu0 %v5640_v45 }
  0x5d   :  { %676 = vmatmul.mubr.bf16.vlgmr.msra.gmra.mrb[16].mxu1 %v5640_v45  ;;  %1099 = vmatpush1.bf16.msra.mxu0 %v4087_v48  ;;  %v4173_v45 = vld [vmem:[#allocation6 + $0xe8] ss:$16 sps:$4 sm:$0xff]  }
  0x5e   :  { %1140 = vmatpush1.bf16.msra.mxu1 %v4089_v49  ;;  %1100 = vmatprep.subr.bf16.mxu0 %v4095_v50  ;;  %6001 = vst [vmem:[#allocation35_spill] sm:$0xff] %v4173_v45 }
  0x5f   :  { %1141 = vmatprep.subr.bf16.mxu1 %v4097_v51 }
  0x61   :  { %1101 = vmatpush1.bf16.msra.mxu0 %v4099_v52 }
  0x62   :  { %1142 = vmatpush1.bf16.msra.mxu1 %v4101_v53  ;;  %1102 = vmatprep.subr.bf16.mxu0 %v4107_v54 }
  0x63   :  { %1143 = vmatprep.subr.bf16.mxu1 %v4109_v55 }
  0x65   :  { %1103 = vmatpush1.bf16.msra.mxu0 %v4111_v56 }
  0x66   :  { %1144 = vmatpush1.bf16.msra.mxu1 %v4113_v57  ;;  %1104 = vmatprep.subr.bf16.mxu0 %v4119_v58 }
  0x67   :  { %1145 = vmatprep.subr.bf16.mxu1 %v4121_v59 }
  0x69   :  { %1105 = vmatpush1.bf16.msra.mxu0 %v4123_v60 }
  0x6a   :  { %1146 = vmatpush1.bf16.msra.mxu1 %v4125_v61  ;;  %1106 = vmatprep.subr.bf16.mxu0 %v4131_v62 }
  0x6b   :  { %1147 = vmatprep.subr.bf16.mxu1 %v4133_v63 }
  0x6d   :  { %1107 = vmatpush1.bf16.msra.mxu0 %v4135_v1 }
  0x6e   :  { %1148 = vmatpush1.bf16.msra.mxu1 %v4137_v2  ;;  %1108 = vmatprep.subr.bf16.mxu0 %v4143_v3 }
  0x6f   :  { %1149 = vmatprep.subr.bf16.mxu1 %v4145_v4  ;;  %v5708_v4 = vmov 0.0|0.0  }
  0x70   :  { %1130 = vmatprep.mubr.bf16.mxu0 %v5708_v4  ;;  %1171 = vmatprep.mubr.bf16.mxu1 %v5708_v4  ;;  %v86_v4 = vlaneseq }
  0x71   :  { %1109 = vmatpush1.bf16.msra.mxu0 %v4147_v5  ;;  %v4249_v5 = vld [vmem:[#allocation6 + $0x1cc] ss:$16 sps:$4 sm:$0xff]  }
  0x72   :  { %1150 = vmatpush1.bf16.msra.mxu1 %v4149_v10  ;;  %1110 = vmatprep.subr.bf16.mxu0 %v4155_v15  ;;  %v4185_v15 = vld [vmem:[#allocation6 + $0x108] ss:$16 sps:$4 sm:$0xff]   ;;  %v4247_v10 = vld [vmem:[#allocation6 + $0x1c4] ss:$16 sps:$4 sm:$0xff]   ;;  %6027 = vst [vmem:[#allocation61_spill] sm:$0xff] %v4249_v5 }
  0x73   :  { %1151 = vmatprep.subr.bf16.mxu1 %v4157_v20  ;;  %v4179_v20 = vld [vmem:[#allocation6 + $0x104] ss:$16 sps:$4 sm:$0xff]   ;;  %6005 = vst [vmem:[#allocation39_spill] sm:$0xff] %v4185_v15  ;;  %6026 = vst [vmem:[#allocation60_spill] sm:$0xff] %v4247_v10 }
  0x74   :  { %6002 = vst [vmem:[#allocation36_spill] sm:$0xff] %v4179_v20 }
  0x75   :  { %1111 = vmatpush1.bf16.msra.mxu0 %v4159_v25  ;;  %v4181_v25 = vld [vmem:[#allocation6 + $0x10c] ss:$16 sps:$4 sm:$0xff]  }
  0x76   :  { %1152 = vmatpush1.bf16.msra.mxu1 %v4161_v30  ;;  %1112 = vmatprep.subr.bf16.mxu0 %v4167_v35  ;;  %6003 = vst [vmem:[#allocation37_spill] sm:$0xff] %v4181_v25  ;;  %v4183_v30 = vld [vmem:[#allocation6 + $0x100] ss:$16 sps:$4 sm:$0xff]   ;;  %v4197_v35 = vld [vmem:[#allocation6 + $0x128] ss:$16 sps:$4 sm:$0xff]  }
  0x77   :  { %1153 = vmatprep.subr.bf16.mxu1 %v4169_v40  ;;  %6004 = vst [vmem:[#allocation38_spill] sm:$0xff] %v4183_v30  ;;  %v4191_v40 = vld [vmem:[#allocation6 + $0x124] ss:$16 sps:$4 sm:$0xff]   ;;  %6009 = vst [vmem:[#allocation43_spill] sm:$0xff] %v4197_v35 }
  0x78   :  { %6006 = vst [vmem:[#allocation40_spill] sm:$0xff] %v4191_v40 }
  0x79   :  { %1113 = vmatpush1.bf16.msra.mxu0 %v4171_v0  ;;  %v4193_v0 = vld [vmem:[#allocation6 + $0x12c] ss:$16 sps:$4 sm:$0xff]  }
  0x7a   :  { %1154 = vmatpush1.bf16.msra.mxu1 %v4173_v45  ;;  %1114 = vmatprep.subr.bf16.mxu0 %v4179_v20  ;;  %6007 = vst [vmem:[#allocation41_spill] sm:$0xff] %v4193_v0  ;;  %v4195_v45 = vld [vmem:[#allocation6 + $0x120] ss:$16 sps:$4 sm:$0xff]   ;;  %v4209_v20 = vld [vmem:[#allocation6 + $0x148] ss:$16 sps:$4 sm:$0xff]  }
  0x7b   :  { %1155 = vmatprep.subr.bf16.mxu1 %v4181_v25  ;;  %6008 = vst [vmem:[#allocation42_spill] sm:$0xff] %v4195_v45  ;;  %v4203_v25 = vld [vmem:[#allocation6 + $0x144] ss:$16 sps:$4 sm:$0xff]   ;;  %6013 = vst [vmem:[#allocation47_spill] sm:$0xff] %v4209_v20 }
  0x7c   :  { %6010 = vst [vmem:[#allocation44_spill] sm:$0xff] %v4203_v25 }
  0x7d   :  { %1115 = vmatpush1.bf16.msra.mxu0 %v4183_v30  ;;  %v4205_v30 = vld [vmem:[#allocation6 + $0x14c] ss:$16 sps:$4 sm:$0xff]  }
  0x7e   :  { %1156 = vmatpush1.bf16.msra.mxu1 %v4185_v15  ;;  %1116 = vmatprep.subr.bf16.mxu0 %v4191_v40  ;;  %6011 = vst [vmem:[#allocation45_spill] sm:$0xff] %v4205_v30  ;;  %v4207_v15 = vld [vmem:[#allocation6 + $0x140] ss:$16 sps:$4 sm:$0xff]   ;;  %v4221_v40 = vld [vmem:[#allocation6 + $0x168] ss:$16 sps:$4 sm:$0xff]  }
  0x7f   :  { %1157 = vmatprep.subr.bf16.mxu1 %v4193_v0  ;;  %6012 = vst [vmem:[#allocation46_spill] sm:$0xff] %v4207_v15  ;;  %v4215_v0 = vld [vmem:[#allocation6 + $0x164] ss:$16 sps:$4 sm:$0xff]   ;;  %6017 = vst [vmem:[#allocation51_spill] sm:$0xff] %v4221_v40 }
  0x80   :  { %6014 = vst [vmem:[#allocation48_spill] sm:$0xff] %v4215_v0 }
  0x81   :  { %1117 = vmatpush1.bf16.msra.mxu0 %v4195_v45  ;;  %v4217_v45 = vld [vmem:[#allocation6 + $0x16c] ss:$16 sps:$4 sm:$0xff]  }
  0x82   :  { %1158 = vmatpush1.bf16.msra.mxu1 %v4197_v35  ;;  %1118 = vmatprep.subr.bf16.mxu0 %v4203_v25  ;;  %6015 = vst [vmem:[#allocation49_spill] sm:$0xff] %v4217_v45  ;;  %v4219_v35 = vld [vmem:[#allocation6 + $0x160] ss:$16 sps:$4 sm:$0xff]   ;;  %v4233_v25 = vld [vmem:[#allocation6 + $0x188] ss:$16 sps:$4 sm:$0xff]  }
  0x83   :  { %1159 = vmatprep.subr.bf16.mxu1 %v4205_v30  ;;  %6016 = vst [vmem:[#allocation50_spill] sm:$0xff] %v4219_v35  ;;  %v4227_v30 = vld [vmem:[#allocation6 + $0x184] ss:$16 sps:$4 sm:$0xff]   ;;  %6021 = vst [vmem:[#allocation55_spill] sm:$0xff] %v4233_v25 }
  0x84   :  { %6018 = vst [vmem:[#allocation52_spill] sm:$0xff] %v4227_v30 }
  0x85   :  { %1119 = vmatpush1.bf16.msra.mxu0 %v4207_v15  ;;  %v4229_v15 = vld [vmem:[#allocation6 + $0x18c] ss:$16 sps:$4 sm:$0xff]  }
  0x86   :  { %1160 = vmatpush1.bf16.msra.mxu1 %v4209_v20  ;;  %1120 = vmatprep.subr.bf16.mxu0 %v4215_v0  ;;  %6019 = vst [vmem:[#allocation53_spill] sm:$0xff] %v4229_v15  ;;  %v4231_v20 = vld [vmem:[#allocation6 + $0x180] ss:$16 sps:$4 sm:$0xff]   ;;  %v4245_v0 = vld [vmem:[#allocation6 + $0x1a8] ss:$16 sps:$4 sm:$0xff]  }
  0x87   :  { %1161 = vmatprep.subr.bf16.mxu1 %v4217_v45  ;;  %6020 = vst [vmem:[#allocation54_spill] sm:$0xff] %v4231_v20  ;;  %v4239_v45 = vld [vmem:[#allocation6 + $0x1a4] ss:$16 sps:$4 sm:$0xff]   ;;  %6025 = vst [vmem:[#allocation59_spill] sm:$0xff] %v4245_v0 }
  0x88   :  { %6022 = vst [vmem:[#allocation56_spill] sm:$0xff] %v4239_v45 }
  0x89   :  { %1121 = vmatpush1.bf16.msra.mxu0 %v4219_v35  ;;  %v4241_v35 = vld [vmem:[#allocation6 + $0x1ac] ss:$16 sps:$4 sm:$0xff]  }
  0x8a   :  { %1162 = vmatpush1.bf16.msra.mxu1 %v4221_v40  ;;  %1122 = vmatprep.subr.bf16.mxu0 %v4227_v30  ;;  %6023 = vst [vmem:[#allocation57_spill] sm:$0xff] %v4241_v35  ;;  %v4243_v40 = vld [vmem:[#allocation6 + $0x1a0] ss:$16 sps:$4 sm:$0xff]   ;;  %v4263_v30 = vld [vmem:[#allocation6 + $0x1ec] ss:$16 sps:$4 sm:$0xff]  }
  0x8b   :  { %1163 = vmatprep.subr.bf16.mxu1 %v4229_v15  ;;  %6024 = vst [vmem:[#allocation58_spill] sm:$0xff] %v4243_v40  ;;  %v4261_v15 = vld [vmem:[#allocation6 + $0x1e4] ss:$16 sps:$4 sm:$0xff]   ;;  %6031 = vst [vmem:[#allocation65_spill] sm:$0xff] %v4263_v30 }
  0x8c   :  { %6030 = vst [vmem:[#allocation64_spill] sm:$0xff] %v4261_v15 }
  0x8d   :  { %1123 = vmatpush1.bf16.msra.mxu0 %v4231_v20  ;;  %v4257_v20 = vld [vmem:[#allocation6 + $0x1c8] ss:$16 sps:$4 sm:$0xff]  }
  0x8e   :  { %1164 = vmatpush1.bf16.msra.mxu1 %v4233_v25  ;;  %1124 = vmatprep.subr.bf16.mxu0 %v4239_v45  ;;  %v4255_v25 = vld [vmem:[#allocation6 + $0x1c0] ss:$16 sps:$4 sm:$0xff]   ;;  %6029 = vst [vmem:[#allocation63_spill] sm:$0xff] %v4257_v20 }
  0x8f   :  { %1165 = vmatprep.subr.bf16.mxu1 %v4241_v35  ;;  %6028 = vst [vmem:[#allocation62_spill] sm:$0xff] %v4255_v25 }
  0x91   :  { %1125 = vmatpush1.bf16.msra.mxu0 %v4243_v40  ;;  %v4271_v40 = vld [vmem:[#allocation6 + $0x1e8] ss:$16 sps:$4 sm:$0xff]  }
  0x92   :  { %1166 = vmatpush1.bf16.msra.mxu1 %v4245_v0  ;;  %1126 = vmatprep.subr.bf16.mxu0 %v4247_v10  ;;  %v4269_v0 = vld [vmem:[#allocation6 + $0x1e0] ss:$16 sps:$4 sm:$0xff]   ;;  %6033 = vst [vmem:[#allocation67_spill] sm:$0xff] %v4271_v40 }
  0x93   :  { %1167 = vmatprep.subr.bf16.mxu1 %v4249_v5  ;;  %6032 = vst [vmem:[#allocation66_spill] sm:$0xff] %v4269_v0  ;;  %v84_v10 = vld [vmem:[%s5632_s2] sm:$0xf] }
  0x95   :  { %1127 = vmatpush1.bf16.msra.mxu0 %v4255_v25  ;;  %v87_v25 = vshrl.u32 %v86_v4, 7 }
  0x96   :  { %1168 = vmatpush1.bf16.msra.mxu1 %v4257_v20  ;;  %1128 = vmatprep.subr.bf16.mxu0 %v4261_v15 }
  0x97   :  { %1169 = vmatprep.subr.bf16.mxu1 %v4263_v30  ;;  %v88_v5 = vsub.s32 0, %v87_v25  ;;  %v96_v20 = vsub.s32 2, %v87_v25  ;;  %v92_v15 = vsub.s32 1, %v87_v25 }
  0x99   :  { %1129 = vmatpush1.bf16.msra.mxu0 %v4269_v0  ;;  %v100_v0 = vsub.s32 3, %v87_v25  ;;  %v93_v3 = vrot.slane %v84_v10, %v92_v15 }
  0x9a   :  { %1170 = vmatpush1.bf16.msra.mxu1 %v4271_v40  ;;  %1208 = vmatprep.subr.bf16.mxu0 %v3932_v6  ;;  %v89_v6 = vrot.slane %v84_v10, %v88_v5 }
  0x9b   :  { %1249 = vmatprep.subr.bf16.mxu1 %v3936_v7  ;;  %v97_v7 = vrot.slane %v84_v10, %v96_v20  ;;  %v101_v2 = vrot.slane %v84_v10, %v100_v0 }
 0x10e   :  { %v4282_v35 = vpop.f32.mrb[0].mxu0  ;;  %v4284_v30 = vpop.f32.mrb[0].mxu1 }
 0x10f   :  { %v4286_v45 = vpop.f32.mrb[1].mxu0  ;;  %v4288_v40 = vpop.f32.mrb[1].mxu1 }
 0x112   :  { %v216_v4 = vpop.f32.mrb[2].mxu0  ;;  %v329_v1 = vpop.f32.mrb[2].mxu1 }
 0x113   :  { %v4290_v63 = vadd.f32 %v216_v4, %v89_v6  ;;  %v218_v62 = vpop.f32.mrb[3].mxu0  ;;  %v4292_v61 = vadd.f32 %v329_v1, %v97_v7  ;;  %v331_v60 = vpop.f32.mrb[3].mxu1 }
 0x114   :  { %v4294_v59 = vadd.f32 %v218_v62, %v93_v3  ;;  %v4296_v58 = vadd.f32 %v331_v60, %v101_v2 }
 0x115   :  { %6034 = vst [vmem:[#allocation68_spill] sm:$0xff] %v4290_v63  ;;  %6035 = vst [vmem:[#allocation69_spill] sm:$0xff] %v4292_v61 }
 0x116   :  { %6036 = vst [vmem:[#allocation70_spill] sm:$0xff] %v4294_v59  ;;  %6037 = vst [vmem:[#allocation71_spill] sm:$0xff] %v4296_v58  ;;  %v222_v25 = vpop.f32.mrb[4].mxu0  ;;  %v335_v57 = vpop.f32.mrb[4].mxu1 }
 0x117   :  { %v4298_v56 = vadd.f32 %v222_v25, %v89_v6  ;;  %v224_v5 = vpop.f32.mrb[5].mxu0  ;;  %v4300_v20 = vadd.f32 %v335_v57, %v97_v7  ;;  %v337_v15 = vpop.f32.mrb[5].mxu1 }
 0x118   :  { %v4302_v0 = vadd.f32 %v224_v5, %v93_v3  ;;  %v4304_v10 = vadd.f32 %v337_v15, %v101_v2 }
 0x119   :  { %6038 = vst [vmem:[#allocation72_spill] sm:$0xff] %v4298_v56  ;;  %6039 = vst [vmem:[#allocation73_spill] sm:$0xff] %v4300_v20 }
 0x11a   :  { %6040 = vst [vmem:[#allocation74_spill] sm:$0xff] %v4302_v0  ;;  %6041 = vst [vmem:[#allocation75_spill] sm:$0xff] %v4304_v10  ;;  %v228_v4 = vpop.f32.mrb[6].mxu0  ;;  %v341_v1 = vpop.f32.mrb[6].mxu1 }
 0x11b   :  { %v4306_v61 = vadd.f32 %v228_v4, %v89_v6  ;;  %v230_v62 = vpop.f32.mrb[7].mxu0  ;;  %v4308_v59 = vadd.f32 %v341_v1, %v97_v7  ;;  %v343_v60 = vpop.f32.mrb[7].mxu1 }
 0x11c   :  { %v4310_v58 = vadd.f32 %v230_v62, %v93_v3  ;;  %v4312_v25 = vadd.f32 %v343_v60, %v101_v2 }
 0x11d   :  { %6042 = vst [vmem:[#allocation76_spill] sm:$0xff] %v4306_v61  ;;  %6043 = vst [vmem:[#allocation77_spill] sm:$0xff] %v4308_v59 }
 0x11e   :  { %6044 = vst [vmem:[#allocation78_spill] sm:$0xff] %v4310_v58  ;;  %6045 = vst [vmem:[#allocation79_spill] sm:$0xff] %v4312_v25  ;;  %v234_v56 = vpop.f32.mrb[8].mxu0  ;;  %v347_v57 = vpop.f32.mrb[8].mxu1 }
 0x11f   :  { %v4314_v20 = vadd.f32 %v234_v56, %v89_v6  ;;  %v236_v5 = vpop.f32.mrb[9].mxu0  ;;  %v4316_v0 = vadd.f32 %v347_v57, %v97_v7  ;;  %v349_v15 = vpop.f32.mrb[9].mxu1 }
 0x120   :  { %v4318_v10 = vadd.f32 %v236_v5, %v93_v3  ;;  %v4320_v4 = vadd.f32 %v349_v15, %v101_v2 }
 0x121   :  { %6046 = vst [vmem:[#allocation80_spill] sm:$0xff] %v4314_v20  ;;  %6047 = vst [vmem:[#allocation81_spill] sm:$0xff] %v4316_v0 }
 0x122   :  { %6048 = vst [vmem:[#allocation82_spill] sm:$0xff] %v4318_v10  ;;  %6049 = vst [vmem:[#allocation83_spill] sm:$0xff] %v4320_v4  ;;  %v240_v61 = vpop.f32.mrb[10].mxu0  ;;  %v353_v1 = vpop.f32.mrb[10].mxu1 }
 0x123   :  { %v4322_v59 = vadd.f32 %v240_v61, %v89_v6  ;;  %v242_v62 = vpop.f32.mrb[11].mxu0  ;;  %v4324_v58 = vadd.f32 %v353_v1, %v97_v7  ;;  %v355_v60 = vpop.f32.mrb[11].mxu1 }
 0x124   :  { %v4326_v25 = vadd.f32 %v242_v62, %v93_v3  ;;  %v4328_v56 = vadd.f32 %v355_v60, %v101_v2 }
 0x125   :  { %6050 = vst [vmem:[#allocation84_spill] sm:$0xff] %v4322_v59  ;;  %6051 = vst [vmem:[#allocation85_spill] sm:$0xff] %v4324_v58 }
 0x126   :  { %6052 = vst [vmem:[#allocation86_spill] sm:$0xff] %v4326_v25  ;;  %6053 = vst [vmem:[#allocation87_spill] sm:$0xff] %v4328_v56  ;;  %v246_v20 = vpop.f32.mrb[12].mxu0  ;;  %v359_v57 = vpop.f32.mrb[12].mxu1 }
 0x127   :  { %v4330_v0 = vadd.f32 %v246_v20, %v89_v6  ;;  %v248_v5 = vpop.f32.mrb[13].mxu0  ;;  %v4332_v10 = vadd.f32 %v359_v57, %v97_v7  ;;  %v361_v15 = vpop.f32.mrb[13].mxu1  ;;  %v211_v57 = vadd.f32 %v4282_v35, %v89_v6 }
 0x128   :  { %v4334_v4 = vadd.f32 %v248_v5, %v93_v3  ;;  %v4336_v61 = vadd.f32 %v361_v15, %v101_v2  ;;  %v324_v5 = vadd.f32 %v4284_v30, %v97_v7 }
 0x129   :  { %6054 = vst [vmem:[#allocation88_spill] sm:$0xff] %v4330_v0  ;;  %6055 = vst [vmem:[#allocation89_spill] sm:$0xff] %v4332_v10  ;;  %v213_v10 = vadd.f32 %v4286_v45, %v93_v3 }
 0x12a   :  { %6056 = vst [vmem:[#allocation90_spill] sm:$0xff] %v4334_v4  ;;  %6057 = vst [vmem:[#allocation91_spill] sm:$0xff] %v4336_v61  ;;  %v252_v59 = vpop.f32.mrb[14].mxu0  ;;  %v365_v1 = vpop.f32.mrb[14].mxu1  ;;  %v326_v61 = vadd.f32 %v4288_v40, %v101_v2 }
 0x12b   :  { %v4338_v58 = vadd.f32 %v252_v59, %v89_v6  ;;  %v254_v62 = vpop.f32.mrb[15].mxu0  ;;  %v4340_v25 = vadd.f32 %v365_v1, %v97_v7  ;;  %v367_v60 = vpop.f32.mrb[15].mxu1 }
 0x12c   :  { %v4342_v56 = vadd.f32 %v254_v62, %v93_v3  ;;  %v4344_v20 = vadd.f32 %v367_v60, %v101_v2 }
 0x12d   :  { %6058 = vst [vmem:[#allocation92_spill] sm:$0xff] %v4338_v58  ;;  %6059 = vst [vmem:[#allocation93_spill] sm:$0xff] %v4340_v25 }
 0x12e   :  { %6060 = vst [vmem:[#allocation94_spill] sm:$0xff] %v4342_v56  ;;  %6061 = vst [vmem:[#allocation95_spill] sm:$0xff] %v4344_v20 }
 0x12f   :  { %v636_v15 = vpop.f32.mrb[16].mxu0 }
 0x130   :  { %v684_v4 = vadd.f32 %v636_v15, %v211_v57  ;;  %v677_v59 = vpop.f32.mrb[16].mxu1  ;;  %v638_v58 = vpop.f32.mrb[17].mxu0  ;;  %v6094_v15 = vld [vmem:[#allocation44_spill] sm:$0xff] }
 0x131   :  { %v686_v0 = vadd.f32 %v677_v59, %v324_v5  ;;  %v685_v1 = vadd.f32 %v638_v58, %v213_v10  ;;  %v679_v25 = vpop.f32.mrb[17].mxu1  ;;  %v640_v63 = vpop.f32.mrb[18].mxu0  ;;  %v6093_v5 = vld [vmem:[#allocation43_spill] sm:$0xff]  ;;  %v6095_v59 = vld [vmem:[#allocation45_spill] sm:$0xff] }
 0x132   :  { %v2920_v62 = vmul.f32 -1.442695, %v684_v4  ;;  %v687_v56 = vadd.f32 %v679_v25, %v326_v61  ;;  %v641_v60 = vpop.f32.mrb[19].mxu0  ;;  %v681_v20 = vpop.f32.mrb[18].mxu1 }
 0x133   :  { %v2921_v55 = vmul.f32 -1.442695, %v685_v1  ;;  %v682_v35 = vpop.f32.mrb[19].mxu1  ;;  %v6096_v1 = vld [vmem:[#allocation46_spill] sm:$0xff]  ;;  %v6098_v60 = vld [vmem:[#allocation48_spill] sm:$0xff] }
 0x134   :  { %3265 = vpow2.f32 %v2920_v62  ;;  %v2922_v45 = vmul.f32 -1.442695, %v687_v56  ;;  %v6097_v62 = vld [vmem:[#allocation47_spill] sm:$0xff]  ;;  %v6099_v35 = vld [vmem:[#allocation49_spill] sm:$0xff] }
 0x135   :  { %3267 = vpow2.f32 %v2921_v55 }
 0x136   :  { %3269 = vpow2.f32 %v2922_v45  ;;  %v6100_v45 = vld [vmem:[#allocation50_spill] sm:$0xff] }
 0x137   :  { %3271 = vtanh.f32 %v686_v0  ;;  %v6062_v0 = vmov 0  }
 0x13e   :  { %v3266_v3 = vpop.eup %3265 }
 0x13f   :  { %v3268_v30 = vpop.eup %3267  ;;  %v691_v6 = vadd.f32 1.0, %v3266_v3  ;;  %v6101_v3 = vld [vmem:[#allocation51_spill] sm:$0xff] }
 0x140   :  { %v697_v2 = vadd.f32 1.0, %v3268_v30  ;;  %v3270_v58 = vpop.eup %3269  ;;  %v6102_v30 = vld [vmem:[#allocation52_spill] sm:$0xff] }
 0x141   :  { %3273 = vrcp.f32 %v691_v6  ;;  %v3272_v40 = vpop.eup %3271  ;;  %v704_v25 = vadd.f32 1.0, %v3270_v58  ;;  %v6103_v6 = vld [vmem:[#allocation53_spill] sm:$0xff]  ;;  %v6105_v58 = vld [vmem:[#allocation55_spill] sm:$0xff] }
 0x142   :  { %3275 = vrcp.f32 %v697_v2  ;;  %v6104_v2 = vld [vmem:[#allocation54_spill] sm:$0xff] }
 0x143   :  { %3277 = vrcp.f32 %v704_v25  ;;  %v6110_v25 = vld [vmem:[#allocation60_spill] sm:$0xff] }
 0x14b   :  { %v3274_v63 = vpop.eup %3273 }
 0x14c   :  { %v3276_v7 = vpop.eup %3275  ;;  %v708_v10 = vmul.f32 %v3274_v63, %v3272_v40  ;;  %v6106_v40 = vld [vmem:[#allocation56_spill] sm:$0xff]  ;;  %v6107_v63 = vld [vmem:[#allocation57_spill] sm:$0xff] }
 0x14d   :  { %v707_v4 = vmul.f32 0.0, %v3276_v7  ;;  %v3278_v55 = vpop.eup %3277  ;;  %v6108_v7 = vld [vmem:[#allocation58_spill] sm:$0xff] }
 0x14f   :  { %v4350_v61 = vadd.f32 %v708_v10, %v707_v4  ;;  %v6109_v10 = vld [vmem:[#allocation59_spill] sm:$0xff]  ;;  %v6111_v4 = vld [vmem:[#allocation61_spill] sm:$0xff] }
 0x151   :  { %3279 = vtanh.f32 %v4350_v61 }
 0x15b   :  { %v3280_v56 = vpop.eup %3279 }
 0x15c   :  { %v711_v20 = vmul.f32 %v3280_v56, %v3278_v55  ;;  %v6112_v55 = vld [vmem:[#allocation62_spill] sm:$0xff]  ;;  %v6113_v56 = vld [vmem:[#allocation63_spill] sm:$0xff] }
 0x15e   :  { %v712_v57 = vpack.c.bf16 %v711_v20, %v711_v20  ;;  %v6114_v20 = vld [vmem:[#allocation64_spill] sm:$0xff] }
 0x160   :  { %1131 = vmatmul.mubr.bf16.vlgmr.msra.gmra.mrb[20].mxu0 %v712_v57  ;;  %1172 = vmatmul.mubr.bf16.vlgmr.msra.gmra.mrb[20].mxu1 %v712_v57 }
 0x161   :  { %1209 = vmatpush1.bf16.msra.mxu0 %v3938_v8  ;;  %1250 = vmatpush1.bf16.msra.mxu1 %v3941_v9  ;;  %v6063_v8 = vld [vmem:[#allocation13_spill] sm:$0xff]  ;;  %v6064_v9 = vld [vmem:[#allocation14_spill] sm:$0xff] }
 0x162   :  { %1210 = vmatprep.subr.bf16.mxu0 %v3949_v11  ;;  %1251 = vmatprep.subr.bf16.mxu1 %v3953_v12  ;;  %v6065_v11 = vld [vmem:[#allocation15_spill] sm:$0xff]  ;;  %v6066_v12 = vld [vmem:[#allocation16_spill] sm:$0xff] }
 0x163   :  { %1240 = vmatprep.mubr.bf16.mxu0 %v6062_v0  ;;  %1281 = vmatprep.mubr.bf16.mxu1 %v6062_v0 }
 0x165   :  { %1211 = vmatpush1.bf16.msra.mxu0 %v3955_v13  ;;  %1252 = vmatpush1.bf16.msra.mxu1 %v3959_v14  ;;  %v6067_v13 = vld [vmem:[#allocation17_spill] sm:$0xff]  ;;  %v6068_v14 = vld [vmem:[#allocation18_spill] sm:$0xff] }
 0x166   :  { %1212 = vmatprep.subr.bf16.mxu0 %v3966_v16  ;;  %1253 = vmatprep.subr.bf16.mxu1 %v3970_v17  ;;  %v6069_v16 = vld [vmem:[#allocation19_spill] sm:$0xff]  ;;  %v6070_v17 = vld [vmem:[#allocation20_spill] sm:$0xff] }
 0x169   :  { %1213 = vmatpush1.bf16.msra.mxu0 %v3972_v18  ;;  %1254 = vmatpush1.bf16.msra.mxu1 %v3976_v19  ;;  %v6071_v18 = vld [vmem:[#allocation21_spill] sm:$0xff]  ;;  %v6072_v19 = vld [vmem:[#allocation22_spill] sm:$0xff] }
 0x16a   :  { %1214 = vmatprep.subr.bf16.mxu0 %v3985_v21  ;;  %1255 = vmatprep.subr.bf16.mxu1 %v3987_v22  ;;  %v6073_v21 = vld [vmem:[#allocation23_spill] sm:$0xff]  ;;  %v6074_v22 = vld [vmem:[#allocation24_spill] sm:$0xff] }
 0x16d   :  { %1215 = vmatpush1.bf16.msra.mxu0 %v3991_v23  ;;  %1256 = vmatpush1.bf16.msra.mxu1 %v3995_v24  ;;  %v6075_v23 = vld [vmem:[#allocation25_spill] sm:$0xff]  ;;  %v6076_v24 = vld [vmem:[#allocation26_spill] sm:$0xff] }
 0x16e   :  { %1216 = vmatprep.subr.bf16.mxu0 %v4004_v26  ;;  %1257 = vmatprep.subr.bf16.mxu1 %v4006_v27  ;;  %v6077_v26 = vld [vmem:[#allocation27_spill] sm:$0xff]  ;;  %v6078_v27 = vld [vmem:[#allocation28_spill] sm:$0xff] }
 0x171   :  { %1217 = vmatpush1.bf16.msra.mxu0 %v4010_v28  ;;  %1258 = vmatpush1.bf16.msra.mxu1 %v4014_v29  ;;  %v6079_v28 = vld [vmem:[#allocation29_spill] sm:$0xff]  ;;  %v6080_v29 = vld [vmem:[#allocation30_spill] sm:$0xff] }
 0x172   :  { %1218 = vmatprep.subr.bf16.mxu0 %v4021_v31  ;;  %1259 = vmatprep.subr.bf16.mxu1 %v4025_v32  ;;  %v6081_v31 = vld [vmem:[#allocation31_spill] sm:$0xff]  ;;  %v6082_v32 = vld [vmem:[#allocation32_spill] sm:$0xff] }
 0x175   :  { %1219 = vmatpush1.bf16.msra.mxu0 %v4029_v33  ;;  %1260 = vmatpush1.bf16.msra.mxu1 %v4033_v34  ;;  %v6083_v33 = vld [vmem:[#allocation33_spill] sm:$0xff]  ;;  %v6084_v34 = vld [vmem:[#allocation34_spill] sm:$0xff] }
 0x176   :  { %1220 = vmatprep.subr.bf16.mxu0 %v4042_v36  ;;  %1261 = vmatprep.subr.bf16.mxu1 %v4044_v37  ;;  %v6085_v36 = vld [vmem:[#allocation35_spill] sm:$0xff]  ;;  %v6086_v37 = vld [vmem:[#allocation36_spill] sm:$0xff] }
 0x179   :  { %1221 = vmatpush1.bf16.msra.mxu0 %v4048_v38  ;;  %1262 = vmatpush1.bf16.msra.mxu1 %v4050_v39  ;;  %v6087_v38 = vld [vmem:[#allocation37_spill] sm:$0xff]  ;;  %v6088_v39 = vld [vmem:[#allocation38_spill] sm:$0xff] }
 0x17a   :  { %1222 = vmatprep.subr.bf16.mxu0 %v4057_v41  ;;  %1263 = vmatprep.subr.bf16.mxu1 %v4059_v42  ;;  %v6089_v41 = vld [vmem:[#allocation39_spill] sm:$0xff]  ;;  %v6090_v42 = vld [vmem:[#allocation40_spill] sm:$0xff] }
 0x17d   :  { %1223 = vmatpush1.bf16.msra.mxu0 %v4063_v43  ;;  %1264 = vmatpush1.bf16.msra.mxu1 %v4067_v44  ;;  %v6091_v43 = vld [vmem:[#allocation41_spill] sm:$0xff]  ;;  %v6092_v44 = vld [vmem:[#allocation42_spill] sm:$0xff] }
 0x17e   :  { %1320 = vmatprep.subr.bf16.mxu0 %v4083_v46  ;;  %1361 = vmatprep.subr.bf16.mxu1 %v4085_v47 }
 0x180   :  { %1241 = vmatmul.mubr.bf16.vlgmr.msra.gmra.mrb[24].mxu0 %v712_v57  ;;  %1282 = vmatmul.mubr.bf16.vlgmr.msra.gmra.mrb[24].mxu1 %v712_v57  ;;  %v6115_v57 = vld [vmem:[#allocation65_spill] sm:$0xff] }
 0x181   :  { %1321 = vmatpush1.bf16.msra.mxu0 %v4087_v48  ;;  %1362 = vmatpush1.bf16.msra.mxu1 %v4089_v49 }
 0x182   :  { %1322 = vmatprep.subr.bf16.mxu0 %v4095_v50  ;;  %1363 = vmatprep.subr.bf16.mxu1 %v4097_v51 }
 0x185   :  { %1323 = vmatpush1.bf16.msra.mxu0 %v4099_v52  ;;  %1364 = vmatpush1.bf16.msra.mxu1 %v4101_v53 }
 0x186   :  { %1324 = vmatprep.subr.bf16.mxu0 %v4107_v54  ;;  %1365 = vmatprep.subr.bf16.mxu1 %v6063_v8 }
 0x189   :  { %1325 = vmatpush1.bf16.msra.mxu0 %v6064_v9  ;;  %1366 = vmatpush1.bf16.msra.mxu1 %v6065_v11 }
 0x18a   :  { %1326 = vmatprep.subr.bf16.mxu0 %v6066_v12  ;;  %1367 = vmatprep.subr.bf16.mxu1 %v6067_v13 }
 0x18d   :  { %1327 = vmatpush1.bf16.msra.mxu0 %v6068_v14  ;;  %1368 = vmatpush1.bf16.msra.mxu1 %v6069_v16 }
 0x18e   :  { %1328 = vmatprep.subr.bf16.mxu0 %v6070_v17  ;;  %1369 = vmatprep.subr.bf16.mxu1 %v6071_v18 }
 0x191   :  { %1329 = vmatpush1.bf16.msra.mxu0 %v6072_v19  ;;  %1370 = vmatpush1.bf16.msra.mxu1 %v6073_v21 }
 0x192   :  { %1330 = vmatprep.subr.bf16.mxu0 %v6074_v22  ;;  %1371 = vmatprep.subr.bf16.mxu1 %v6075_v23 }
 0x195   :  { %1331 = vmatpush1.bf16.msra.mxu0 %v6076_v24  ;;  %1372 = vmatpush1.bf16.msra.mxu1 %v6077_v26 }
 0x196   :  { %1332 = vmatprep.subr.bf16.mxu0 %v6078_v27  ;;  %1373 = vmatprep.subr.bf16.mxu1 %v6079_v28 }
 0x199   :  { %1333 = vmatpush1.bf16.msra.mxu0 %v6080_v29  ;;  %1374 = vmatpush1.bf16.msra.mxu1 %v6081_v31 }
 0x19a   :  { %1334 = vmatprep.subr.bf16.mxu0 %v6082_v32  ;;  %1375 = vmatprep.subr.bf16.mxu1 %v6083_v33 }
 0x19d   :  { %1335 = vmatpush1.bf16.msra.mxu0 %v6084_v34  ;;  %1376 = vmatpush1.bf16.msra.mxu1 %v6085_v36 }
 0x19e   :  { %1336 = vmatprep.subr.bf16.mxu0 %v6086_v37  ;;  %1377 = vmatprep.subr.bf16.mxu1 %v6087_v38 }
 0x1a1   :  { %1337 = vmatpush1.bf16.msra.mxu0 %v6088_v39  ;;  %1378 = vmatpush1.bf16.msra.mxu1 %v6089_v41 }
 0x1a2   :  { %1338 = vmatprep.subr.bf16.mxu0 %v6090_v42  ;;  %1379 = vmatprep.subr.bf16.mxu1 %v6091_v43 }
 0x1a5   :  { %1339 = vmatpush1.bf16.msra.mxu0 %v6092_v44  ;;  %1380 = vmatpush1.bf16.msra.mxu1 %v6093_v5 }
 0x1a6   :  { %1340 = vmatprep.subr.bf16.mxu0 %v6094_v15  ;;  %1381 = vmatprep.subr.bf16.mxu1 %v6095_v59 }
 0x1a9   :  { %1341 = vmatpush1.bf16.msra.mxu0 %v6096_v1  ;;  %1382 = vmatpush1.bf16.msra.mxu1 %v6097_v62  ;;  %v6128_v62 = vld [vmem:[#allocation71_spill] sm:$0xff] }
 0x1aa   :  { %1342 = vmatprep.subr.bf16.mxu0 %v6098_v60  ;;  %1383 = vmatprep.subr.bf16.mxu1 %v6099_v35 }
 0x1ad   :  { %1343 = vmatpush1.bf16.msra.mxu0 %v6100_v45  ;;  %1384 = vmatpush1.bf16.msra.mxu1 %v6101_v3  ;;  %v4470_v3 = vld [vmem:[%s5635_s5 + $0x18] sm:$0xff] }
 0x1ae   :  { %1344 = vmatprep.subr.bf16.mxu0 %v6102_v30  ;;  %1385 = vmatprep.subr.bf16.mxu1 %v6103_v6  ;;  %6122 = vst [vmem:[#allocation17_spill] sm:$0xff] %v4470_v3 }
 0x1b1   :  { %1345 = vmatpush1.bf16.msra.mxu0 %v6104_v2  ;;  %1386 = vmatpush1.bf16.msra.mxu1 %v6105_v58  ;;  %v6116_v58 = vld [vmem:[#allocation66_spill] sm:$0xff] }
 0x1b2   :  { %1346 = vmatprep.subr.bf16.mxu0 %v6106_v40  ;;  %1387 = vmatprep.subr.bf16.mxu1 %v6107_v63  ;;  %v6117_v40 = vld [vmem:[#allocation67_spill] sm:$0xff]  ;;  %v4449_v63 = vld [vmem:[#allocation3 + $0x4] ss:$16 sps:$4 sm:$0xff]  }
 0x1b3   :  { %6118 = vst [vmem:[#allocation13_spill] sm:$0xff] %v4449_v63 }
 0x1b5   :  { %1347 = vmatpush1.bf16.msra.mxu0 %v6108_v7  ;;  %1388 = vmatpush1.bf16.msra.mxu1 %v6109_v10  ;;  %v4452_v10 = vld [vmem:[#allocation3 + $0xc] ss:$16 sps:$4 sm:$0xff]  }
 0x1b6   :  { %1348 = vmatprep.subr.bf16.mxu0 %v6110_v25  ;;  %1389 = vmatprep.subr.bf16.mxu1 %v6111_v4  ;;  %6119 = vst [vmem:[#allocation14_spill] sm:$0xff] %v4452_v10 }
 0x1b9   :  { %1349 = vmatpush1.bf16.msra.mxu0 %v6112_v55  ;;  %1390 = vmatpush1.bf16.msra.mxu1 %v6113_v56  ;;  %v4458_v56 = vld [vmem:[%s5635_s5] sm:$0xff] }
 0x1ba   :  { %1350 = vmatprep.subr.bf16.mxu0 %v6114_v20  ;;  %1391 = vmatprep.subr.bf16.mxu1 %v6115_v57  ;;  %6120 = vst [vmem:[#allocation15_spill] sm:$0xff] %v4458_v56  ;;  %v4463_v57 = vld [vmem:[%s5635_s5 + $0x8] sm:$0xff] }
 0x1bb   :  { %6121 = vst [vmem:[#allocation16_spill] sm:$0xff] %v4463_v57 }
 0x1bd   :  { %1351 = vmatpush1.bf16.msra.mxu0 %v6116_v58  ;;  %1392 = vmatpush1.bf16.msra.mxu1 %v6117_v40 }
 0x1be   :  { %1430 = vmatprep.subr.bf16.mxu0 %v4449_v63  ;;  %1471 = vmatprep.subr.bf16.mxu1 %v4452_v10 }
 0x233   :  { %v1132_v58 = vpop.f32.mrb[20].mxu0  ;;  %v1173_v40 = vpop.f32.mrb[20].mxu1 }
 0x234   :  { %v1133_v20 = vadd.f32 %v1132_v58, %v4458_v56  ;;  %v1134_v55 = vpop.f32.mrb[21].mxu0  ;;  %v1175_v63 = vpop.f32.mrb[21].mxu1  ;;  %v4476_v58 = vld [vmem:[%s5635_s5 + $0x10] sm:$0xff] }
 0x235   :  { %v1135_v4 = vadd.f32 %v1134_v55, %v4463_v57  ;;  %v1136_v25 = vpop.f32.mrb[22].mxu0  ;;  %v1177_v10 = vpop.f32.mrb[22].mxu1  ;;  %v1176_v45 = vadd.f32 %v1175_v63, %v4470_v3  ;;  %6123 = vst [vmem:[#allocation18_spill] sm:$0xff] %v4476_v58 }
 0x236   :  { %v2987_v7 = vmul.f32 -1.442695, %v1133_v20  ;;  %v1137_v2 = vpop.f32.mrb[23].mxu0  ;;  %v1178_v6 = vpop.f32.mrb[23].mxu1  ;;  %v1174_v10 = vadd.f32 %v1173_v40, %v4476_v58  ;;  %v6125_v40 = vld [vmem:[#allocation68_spill] sm:$0xff] }
 0x237   :  { %v2988_v30 = vmul.f32 -1.442695, %v1135_v4  ;;  %v2989_v25 = vmul.f32 -1.442695, %v1176_v45 }
 0x238   :  { %3281 = vpow2.f32 %v2987_v7 }
 0x239   :  { %3283 = vpow2.f32 %v2988_v30 }
 0x23a   :  { %3285 = vpow2.f32 %v2989_v25 }
 0x23b   :  { %3287 = vtanh.f32 %v1174_v10 }
 0x242   :  { %v3282_v2 = vpop.eup %3281 }
 0x243   :  { %v3284_v6 = vpop.eup %3283  ;;  %v1183_v4 = vadd.f32 1.0, %v3282_v2  ;;  %v6126_v2 = vld [vmem:[#allocation69_spill] sm:$0xff] }
 0x244   :  { %v1189_v7 = vadd.f32 1.0, %v3284_v6  ;;  %v3286_v55 = vpop.eup %3285 }
 0x245   :  { %3289 = vrcp.f32 %v1183_v4  ;;  %v3288_v30 = vpop.eup %3287  ;;  %v1196_v57 = vadd.f32 1.0, %v3286_v55  ;;  %v6127_v4 = vld [vmem:[#allocation70_spill] sm:$0xff] }
 0x246   :  { %3291 = vrcp.f32 %v1189_v7 }
 0x247   :  { %3293 = vrcp.f32 %v1196_v57 }
 0x24f   :  { %v3290_v20 = vpop.eup %3289 }
 0x250   :  { %v3292_v63 = vpop.eup %3291  ;;  %v1200_v3 = vmul.f32 %v3290_v20, %v3288_v30 }
 0x251   :  { %v1199_v56 = vmul.f32 0.0, %v3292_v63  ;;  %v3294_v57 = vpop.eup %3293 }
 0x253   :  { %v4479_v35 = vadd.f32 %v1200_v3, %v1199_v56  ;;  %v1242_v45 = vpop.f32.mrb[24].mxu0  ;;  %v1283_v60 = vpop.f32.mrb[24].mxu1 }
 0x254   :  { %v1290_v58 = vadd.f32 %v1242_v45, %v6125_v40  ;;  %v1292_v25 = vadd.f32 %v1283_v60, %v6126_v2  ;;  %v1244_v10 = vpop.f32.mrb[25].mxu0  ;;  %v1285_v6 = vpop.f32.mrb[25].mxu1 }
 0x255   :  { %6124 = vst [vmem:[#allocation19_spill] sm:$0xff] %v4479_v35  ;;  %3295 = vtanh.f32 %v4479_v35  ;;  %v1291_v7 = vadd.f32 %v1244_v10, %v6127_v4  ;;  %v1293_v1 = vadd.f32 %v1285_v6, %v6128_v62  ;;  %v1246_v30 = vpop.f32.mrb[26].mxu0  ;;  %v1287_v55 = vpop.f32.mrb[26].mxu1 }
 0x256   :  { %v2990_v20 = vmul.f32 -1.442695, %v1290_v58  ;;  %v1247_v3 = vpop.f32.mrb[27].mxu0  ;;  %v1288_v56 = vpop.f32.mrb[27].mxu1 }
 0x257   :  { %v2991_v63 = vmul.f32 -1.442695, %v1291_v7  ;;  %v2992_v40 = vmul.f32 -1.442695, %v1293_v1  ;;  %v4503_v56 = vld [vmem:[#allocation3 + $0x2c] ss:$16 sps:$4 sm:$0xff]  }
 0x258   :  { %3297 = vpow2.f32 %v2990_v20 }
 0x259   :  { %3299 = vpow2.f32 %v2991_v63  ;;  %v4508_v63 = vld [vmem:[#allocation3 + $0x20] ss:$16 sps:$4 sm:$0xff]  }
 0x25a   :  { %3301 = vpow2.f32 %v2992_v40  ;;  %v4517_v40 = vld [vmem:[#allocation3 + $0x4c] ss:$16 sps:$4 sm:$0xff]  }
 0x25b   :  { %3303 = vtanh.f32 %v1292_v25 }
 0x25f   :  { %v3296_v45 = vpop.eup %3295 }
 0x260   :  { %v1203_v60 = vmul.f32 %v3296_v45, %v3294_v57  ;;  %v4511_v57 = vld [vmem:[#allocation3 + $0x28] ss:$16 sps:$4 sm:$0xff]   ;;  %v4514_v45 = vld [vmem:[#allocation3 + $0x44] ss:$16 sps:$4 sm:$0xff]  }
 0x262   :  { %v3298_v2 = vpop.eup %3297  ;;  %v1319_v59 = vpack.c.bf16 %v1203_v60, %v1203_v60  ;;  %v4520_v60 = vld [vmem:[#allocation3 + $0x40] ss:$16 sps:$4 sm:$0xff]  }
 0x263   :  { %v3300_v15 = vpop.eup %3299  ;;  %v1297_v35 = vadd.f32 1.0, %v3298_v2  ;;  %v4523_v2 = vld [vmem:[#allocation3 + $0x48] ss:$16 sps:$4 sm:$0xff]  }
 0x264   :  { %v1303_v10 = vadd.f32 1.0, %v3300_v15  ;;  %1352 = vmatprep.mubr.bf16.mxu0 %v1319_v59  ;;  %1393 = vmatprep.mubr.bf16.mxu1 %v1319_v59  ;;  %v3302_v62 = vpop.eup %3301  ;;  %v4494_v59 = vld [vmem:[#allocation3] ss:$16 sps:$4 sm:$0xff]  }
 0x265   :  { %3305 = vrcp.f32 %v1297_v35  ;;  %v3304_v58 = vpop.eup %3303  ;;  %v1310_v30 = vadd.f32 1.0, %v3302_v62  ;;  %v4497_v35 = vld [vmem:[#allocation3 + $0x8] ss:$16 sps:$4 sm:$0xff]   ;;  %v4529_v62 = vld [vmem:[#allocation3 + $0x6c] ss:$16 sps:$4 sm:$0xff]  }
 0x266   :  { %3307 = vrcp.f32 %v1303_v10  ;;  %v4526_v10 = vld [vmem:[#allocation3 + $0x64] ss:$16 sps:$4 sm:$0xff]  }
 0x267   :  { %3309 = vrcp.f32 %v1310_v30  ;;  %v4544_v30 = vld [vmem:[#allocation3 + $0x80] ss:$16 sps:$4 sm:$0xff]  }
 0x268   :  { %6130 = vst [vmem:[#allocation21_spill] sm:$0xff] %v4544_v30 }
 0x26f   :  { %v3306_v6 = vpop.eup %3305 }
 0x270   :  { %v3308_v4 = vpop.eup %3307  ;;  %v1314_v7 = vmul.f32 %v3306_v6, %v3304_v58  ;;  %v4532_v58 = vld [vmem:[#allocation3 + $0x60] ss:$16 sps:$4 sm:$0xff]   ;;  %v4535_v6 = vld [vmem:[#allocation3 + $0x68] ss:$16 sps:$4 sm:$0xff]  }
 0x271   :  { %v1313_v1 = vmul.f32 %v3308_v4, %v4350_v61  ;;  %v3310_v20 = vpop.eup %3309  ;;  %v4500_v61 = vld [vmem:[#allocation3 + $0x24] ss:$16 sps:$4 sm:$0xff]  }
 0x272   :  { %v4538_v4 = vld [vmem:[#allocation3 + $0x84] ss:$16 sps:$4 sm:$0xff]  }
 0x273   :  { %v4487_v55 = vadd.f32 %v1314_v7, %v1313_v1  ;;  %v4541_v7 = vld [vmem:[#allocation3 + $0x8c] ss:$16 sps:$4 sm:$0xff]   ;;  %v4547_v1 = vld [vmem:[#allocation3 + $0x88] ss:$16 sps:$4 sm:$0xff]  }
 0x274   :  { %6129 = vst [vmem:[#allocation20_spill] sm:$0xff] %v4541_v7  ;;  %6131 = vst [vmem:[#allocation22_spill] sm:$0xff] %v4547_v1 }
 0x275   :  { %3311 = vtanh.f32 %v4487_v55 }
 0x27f   :  { %v3312_v25 = vpop.eup %3311 }
 0x280   :  { %v1317_v15 = vmul.f32 %v3312_v25, %v3310_v20  ;;  %v4550_v20 = vld [vmem:[#allocation3 + $0xa4] ss:$16 sps:$4 sm:$0xff]   ;;  %v4553_v25 = vld [vmem:[#allocation3 + $0xac] ss:$16 sps:$4 sm:$0xff]  }
 0x281   :  { %6132 = vst [vmem:[#allocation23_spill] sm:$0xff] %v4550_v20  ;;  %6133 = vst [vmem:[#allocation24_spill] sm:$0xff] %v4553_v25 }
 0x282   :  { %v4490_v3 = vpack.c.bf16 %v1317_v15, %v1317_v15  ;;  %v4556_v15 = vld [vmem:[#allocation3 + $0xa0] ss:$16 sps:$4 sm:$0xff]  }
 0x283   :  { %6134 = vst [vmem:[#allocation25_spill] sm:$0xff] %v4556_v15 }
 0x284   :  { %1353 = vmatmul.mubr.bf16.vlgmr.msra.gmra.mrb[28].mxu0 %v4490_v3  ;;  %1394 = vmatmul.mubr.bf16.vlgmr.msra.gmra.mrb[28].mxu1 %v4490_v3 }
 0x285   :  { %1431 = vmatpush1.bf16.msra.mxu0 %v4494_v59  ;;  %1472 = vmatpush1.bf16.msra.mxu1 %v4497_v35 }
 0x286   :  { %1432 = vmatprep.subr.bf16.mxu0 %v4500_v61  ;;  %1473 = vmatprep.subr.bf16.mxu1 %v4503_v56 }
 0x287   :  { %1462 = vmatprep.mubr.bf16.mxu0 %v6062_v0  ;;  %1503 = vmatprep.mubr.bf16.mxu1 %v6062_v0 }
 0x289   :  { %1433 = vmatpush1.bf16.msra.mxu0 %v4508_v63  ;;  %1474 = vmatpush1.bf16.msra.mxu1 %v4511_v57 }
 0x28a   :  { %1434 = vmatprep.subr.bf16.mxu0 %v4514_v45  ;;  %1475 = vmatprep.subr.bf16.mxu1 %v4517_v40 }
 0x28d   :  { %1435 = vmatpush1.bf16.msra.mxu0 %v4520_v60  ;;  %1476 = vmatpush1.bf16.msra.mxu1 %v4523_v2 }
 0x28e   :  { %1436 = vmatprep.subr.bf16.mxu0 %v4526_v10  ;;  %1477 = vmatprep.subr.bf16.mxu1 %v4529_v62 }
 0x291   :  { %1437 = vmatpush1.bf16.msra.mxu0 %v4532_v58  ;;  %1478 = vmatpush1.bf16.msra.mxu1 %v4535_v6 }
 0x292   :  { %1438 = vmatprep.subr.bf16.mxu0 %v4538_v4  ;;  %1479 = vmatprep.subr.bf16.mxu1 %v4541_v7  ;;  %v4559_v7 = vld [vmem:[#allocation3 + $0xa8] ss:$16 sps:$4 sm:$0xff]  }
 0x293   :  { %6135 = vst [vmem:[#allocation26_spill] sm:$0xff] %v4559_v7 }
 0x295   :  { %1439 = vmatpush1.bf16.msra.mxu0 %v4544_v30  ;;  %1480 = vmatpush1.bf16.msra.mxu1 %v4547_v1  ;;  %v4562_v30 = vld [vmem:[#allocation3 + $0xc4] ss:$16 sps:$4 sm:$0xff]   ;;  %v4565_v1 = vld [vmem:[#allocation3 + $0xcc] ss:$16 sps:$4 sm:$0xff]  }
 0x296   :  { %1440 = vmatprep.subr.bf16.mxu0 %v4550_v20  ;;  %1481 = vmatprep.subr.bf16.mxu1 %v4553_v25  ;;  %6136 = vst [vmem:[#allocation27_spill] sm:$0xff] %v4562_v30  ;;  %6137 = vst [vmem:[#allocation28_spill] sm:$0xff] %v4565_v1  ;;  %v4568_v20 = vld [vmem:[#allocation3 + $0xc0] ss:$16 sps:$4 sm:$0xff]   ;;  %v4571_v25 = vld [vmem:[#allocation3 + $0xc8] ss:$16 sps:$4 sm:$0xff]  }
 0x299   :  { %1441 = vmatpush1.bf16.msra.mxu0 %v4556_v15  ;;  %1482 = vmatpush1.bf16.msra.mxu1 %v4559_v7  ;;  %v4574_v15 = vld [vmem:[#allocation3 + $0xe4] ss:$16 sps:$4 sm:$0xff]   ;;  %v4577_v7 = vld [vmem:[#allocation3 + $0xec] ss:$16 sps:$4 sm:$0xff]  }
 0x29a   :  { %1442 = vmatprep.subr.bf16.mxu0 %v4562_v30  ;;  %1483 = vmatprep.subr.bf16.mxu1 %v4565_v1  ;;  %v4580_v30 = vld [vmem:[#allocation3 + $0xe0] ss:$16 sps:$4 sm:$0xff]   ;;  %v4583_v1 = vld [vmem:[#allocation3 + $0xe8] ss:$16 sps:$4 sm:$0xff]  }
 0x29d   :  { %1443 = vmatpush1.bf16.msra.mxu0 %v4568_v20  ;;  %1484 = vmatpush1.bf16.msra.mxu1 %v4571_v25 }
 0x29e   :  { %1444 = vmatprep.subr.bf16.mxu0 %v4574_v15  ;;  %1485 = vmatprep.subr.bf16.mxu1 %v4577_v7 }
 0x2a1   :  { %1445 = vmatpush1.bf16.msra.mxu0 %v4580_v30  ;;  %1486 = vmatpush1.bf16.msra.mxu1 %v4583_v1 }
 0x2a2   :  { %1542 = vmatprep.subr.bf16.mxu0 %v4083_v46  ;;  %1583 = vmatprep.subr.bf16.mxu1 %v4085_v47  ;;  %v6138_v46 = vld [vmem:[#allocation44_spill] sm:$0xff]  ;;  %v6139_v47 = vld [vmem:[#allocation45_spill] sm:$0xff] }
 0x2a4   :  { %1463 = vmatmul.mubr.bf16.vlgmr.msra.gmra.mrb[32].mxu0 %v4490_v3  ;;  %1504 = vmatmul.mubr.bf16.vlgmr.msra.gmra.mrb[32].mxu1 %v4490_v3  ;;  %v6166_v3 = vld [vmem:[#allocation17_spill] sm:$0xff] }
 0x2a5   :  { %1543 = vmatpush1.bf16.msra.mxu0 %v4087_v48  ;;  %1584 = vmatpush1.bf16.msra.mxu1 %v4089_v49  ;;  %v6140_v48 = vld [vmem:[#allocation46_spill] sm:$0xff]  ;;  %v6141_v49 = vld [vmem:[#allocation47_spill] sm:$0xff] }
 0x2a6   :  { %1544 = vmatprep.subr.bf16.mxu0 %v4095_v50  ;;  %1585 = vmatprep.subr.bf16.mxu1 %v4097_v51  ;;  %v6142_v50 = vld [vmem:[#allocation48_spill] sm:$0xff]  ;;  %v6143_v51 = vld [vmem:[#allocation49_spill] sm:$0xff] }
 0x2a9   :  { %1545 = vmatpush1.bf16.msra.mxu0 %v4099_v52  ;;  %1586 = vmatpush1.bf16.msra.mxu1 %v4101_v53  ;;  %v6144_v52 = vld [vmem:[#allocation50_spill] sm:$0xff]  ;;  %v6145_v53 = vld [vmem:[#allocation51_spill] sm:$0xff] }
 0x2aa   :  { %1546 = vmatprep.subr.bf16.mxu0 %v4107_v54  ;;  %1587 = vmatprep.subr.bf16.mxu1 %v6063_v8  ;;  %v6146_v54 = vld [vmem:[#allocation52_spill] sm:$0xff]  ;;  %v6147_v8 = vld [vmem:[#allocation53_spill] sm:$0xff] }
 0x2ad   :  { %1547 = vmatpush1.bf16.msra.mxu0 %v6064_v9  ;;  %1588 = vmatpush1.bf16.msra.mxu1 %v6065_v11  ;;  %v6148_v9 = vld [vmem:[#allocation54_spill] sm:$0xff]  ;;  %v6149_v11 = vld [vmem:[#allocation55_spill] sm:$0xff] }
 0x2ae   :  { %1548 = vmatprep.subr.bf16.mxu0 %v6066_v12  ;;  %1589 = vmatprep.subr.bf16.mxu1 %v6067_v13  ;;  %v6150_v12 = vld [vmem:[#allocation56_spill] sm:$0xff]  ;;  %v6151_v13 = vld [vmem:[#allocation57_spill] sm:$0xff] }
 0x2b1   :  { %1549 = vmatpush1.bf16.msra.mxu0 %v6068_v14  ;;  %1590 = vmatpush1.bf16.msra.mxu1 %v6069_v16  ;;  %v6152_v14 = vld [vmem:[#allocation58_spill] sm:$0xff]  ;;  %v6153_v16 = vld [vmem:[#allocation59_spill] sm:$0xff] }
 0x2b2   :  { %1550 = vmatprep.subr.bf16.mxu0 %v6070_v17  ;;  %1591 = vmatprep.subr.bf16.mxu1 %v6071_v18  ;;  %v6154_v17 = vld [vmem:[#allocation60_spill] sm:$0xff]  ;;  %v6155_v18 = vld [vmem:[#allocation61_spill] sm:$0xff] }
 0x2b5   :  { %1551 = vmatpush1.bf16.msra.mxu0 %v6072_v19  ;;  %1592 = vmatpush1.bf16.msra.mxu1 %v6073_v21  ;;  %v6156_v19 = vld [vmem:[#allocation62_spill] sm:$0xff]  ;;  %v6157_v21 = vld [vmem:[#allocation63_spill] sm:$0xff] }
 0x2b6   :  { %1552 = vmatprep.subr.bf16.mxu0 %v6074_v22  ;;  %1593 = vmatprep.subr.bf16.mxu1 %v6075_v23  ;;  %v6158_v22 = vld [vmem:[#allocation64_spill] sm:$0xff]  ;;  %v6159_v23 = vld [vmem:[#allocation65_spill] sm:$0xff] }
 0x2b9   :  { %1553 = vmatpush1.bf16.msra.mxu0 %v6076_v24  ;;  %1594 = vmatpush1.bf16.msra.mxu1 %v6077_v26  ;;  %v6160_v24 = vld [vmem:[#allocation66_spill] sm:$0xff]  ;;  %v6161_v26 = vld [vmem:[#allocation67_spill] sm:$0xff] }
 0x2ba   :  { %1554 = vmatprep.subr.bf16.mxu0 %v6078_v27  ;;  %1595 = vmatprep.subr.bf16.mxu1 %v6079_v28  ;;  %v6162_v27 = vld [vmem:[#allocation13_spill] sm:$0xff]  ;;  %v6163_v28 = vld [vmem:[#allocation14_spill] sm:$0xff] }
 0x2bd   :  { %1555 = vmatpush1.bf16.msra.mxu0 %v6080_v29  ;;  %1596 = vmatpush1.bf16.msra.mxu1 %v6081_v31 }
 0x2be   :  { %1556 = vmatprep.subr.bf16.mxu0 %v6082_v32  ;;  %1597 = vmatprep.subr.bf16.mxu1 %v6083_v33  ;;  %v6164_v32 = vld [vmem:[#allocation15_spill] sm:$0xff] }
 0x2c1   :  { %1557 = vmatpush1.bf16.msra.mxu0 %v6084_v34  ;;  %1598 = vmatpush1.bf16.msra.mxu1 %v6085_v36 }
 0x2c2   :  { %1558 = vmatprep.subr.bf16.mxu0 %v6086_v37  ;;  %1599 = vmatprep.subr.bf16.mxu1 %v6087_v38  ;;  %v6165_v37 = vld [vmem:[#allocation16_spill] sm:$0xff] }
 0x2c5   :  { %1559 = vmatpush1.bf16.msra.mxu0 %v6088_v39  ;;  %1600 = vmatpush1.bf16.msra.mxu1 %v6089_v41 }
 0x2c6   :  { %1560 = vmatprep.subr.bf16.mxu0 %v6090_v42  ;;  %1601 = vmatprep.subr.bf16.mxu1 %v6091_v43 }
 0x2c9   :  { %1561 = vmatpush1.bf16.msra.mxu0 %v6092_v44  ;;  %1602 = vmatpush1.bf16.msra.mxu1 %v6093_v5 }
 0x2ca   :  { %1562 = vmatprep.subr.bf16.mxu0 %v6138_v46  ;;  %1603 = vmatprep.subr.bf16.mxu1 %v6139_v47 }
 0x2cd   :  { %1563 = vmatpush1.bf16.msra.mxu0 %v6140_v48  ;;  %1604 = vmatpush1.bf16.msra.mxu1 %v6141_v49  ;;  %v6167_v48 = vld [vmem:[#allocation18_spill] sm:$0xff] }
 0x2ce   :  { %1564 = vmatprep.subr.bf16.mxu0 %v6142_v50  ;;  %1605 = vmatprep.subr.bf16.mxu1 %v6143_v51 }
 0x2d1   :  { %1565 = vmatpush1.bf16.msra.mxu0 %v6144_v52  ;;  %1606 = vmatpush1.bf16.msra.mxu1 %v6145_v53 }
 0x2d2   :  { %1566 = vmatprep.subr.bf16.mxu0 %v6146_v54  ;;  %1607 = vmatprep.subr.bf16.mxu1 %v6147_v8 }
 0x2d5   :  { %1567 = vmatpush1.bf16.msra.mxu0 %v6148_v9  ;;  %1608 = vmatpush1.bf16.msra.mxu1 %v6149_v11 }
 0x2d6   :  { %1568 = vmatprep.subr.bf16.mxu0 %v6150_v12  ;;  %1609 = vmatprep.subr.bf16.mxu1 %v6151_v13 }
 0x2d9   :  { %1569 = vmatpush1.bf16.msra.mxu0 %v6152_v14  ;;  %1610 = vmatpush1.bf16.msra.mxu1 %v6153_v16  ;;  %v6168_v14 = vld [vmem:[#allocation19_spill] sm:$0xff] }
 0x2da   :  { %1570 = vmatprep.subr.bf16.mxu0 %v6154_v17  ;;  %1611 = vmatprep.subr.bf16.mxu1 %v6155_v18 }
 0x2dd   :  { %1571 = vmatpush1.bf16.msra.mxu0 %v6156_v19  ;;  %1612 = vmatpush1.bf16.msra.mxu1 %v6157_v21  ;;  %v6169_v21 = vld [vmem:[#allocation72_spill] sm:$0xff] }
 0x2de   :  { %1572 = vmatprep.subr.bf16.mxu0 %v6158_v22  ;;  %1613 = vmatprep.subr.bf16.mxu1 %v6159_v23  ;;  %v6170_v23 = vld [vmem:[#allocation73_spill] sm:$0xff] }
 0x2e1   :  { %1573 = vmatpush1.bf16.msra.mxu0 %v6160_v24  ;;  %1614 = vmatpush1.bf16.msra.mxu1 %v6161_v26 }
 0x2e2   :  { %1652 = vmatprep.subr.bf16.mxu0 %v6162_v27  ;;  %1693 = vmatprep.subr.bf16.mxu1 %v6163_v28 }
 0x357   :  { %v1354_v29 = vpop.f32.mrb[28].mxu0  ;;  %v1395_v31 = vpop.f32.mrb[28].mxu1 }
 0x358   :  { %v1355_v33 = vadd.f32 %v1354_v29, %v6164_v32  ;;  %v1356_v34 = vpop.f32.mrb[29].mxu0  ;;  %v1397_v36 = vpop.f32.mrb[29].mxu1  ;;  %v1396_v49 = vadd.f32 %v1395_v31, %v6167_v48  ;;  %v6171_v31 = vld [vmem:[#allocation74_spill] sm:$0xff] }
 0x359   :  { %v1357_v38 = vadd.f32 %v1356_v34, %v6165_v37  ;;  %v1358_v39 = vpop.f32.mrb[30].mxu0  ;;  %v1399_v41 = vpop.f32.mrb[30].mxu1  ;;  %v1398_v46 = vadd.f32 %v1397_v36, %v6166_v3  ;;  %v6172_v34 = vld [vmem:[#allocation75_spill] sm:$0xff] }
 0x35a   :  { %v2993_v42 = vmul.f32 -1.442695, %v1355_v33  ;;  %v1359_v43 = vpop.f32.mrb[31].mxu0  ;;  %v1400_v44 = vpop.f32.mrb[31].mxu1 }
 0x35b   :  { %v2994_v5 = vmul.f32 -1.442695, %v1357_v38  ;;  %v2995_v47 = vmul.f32 -1.442695, %v1398_v46 }
 0x35c   :  { %3313 = vpow2.f32 %v2993_v42 }
 0x35d   :  { %3315 = vpow2.f32 %v2994_v5 }
 0x35e   :  { %3317 = vpow2.f32 %v2995_v47 }
 0x35f   :  { %3319 = vtanh.f32 %v1396_v49 }
 0x366   :  { %v3314_v50 = vpop.eup %3313 }
 0x367   :  { %v3316_v51 = vpop.eup %3315  ;;  %v1405_v52 = vadd.f32 1.0, %v3314_v50 }
 0x368   :  { %v1411_v53 = vadd.f32 1.0, %v3316_v51  ;;  %v3318_v54 = vpop.eup %3317 }
 0x369   :  { %3321 = vrcp.f32 %v1405_v52  ;;  %v3320_v8 = vpop.eup %3319  ;;  %v1418_v13 = vadd.f32 1.0, %v3318_v54 }
 0x36a   :  { %3323 = vrcp.f32 %v1411_v53 }
 0x36b   :  { %3325 = vrcp.f32 %v1418_v13 }
 0x373   :  { %v3322_v9 = vpop.eup %3321 }
 0x374   :  { %v3324_v11 = vpop.eup %3323  ;;  %v1422_v12 = vmul.f32 %v3322_v9, %v3320_v8 }
 0x375   :  { %v1421_v16 = vmul.f32 %v3324_v11, %v6168_v14  ;;  %v3326_v5 = vpop.eup %3325 }
 0x377   :  { %v1464_v17 = vpop.f32.mrb[32].mxu0  ;;  %v1505_v18 = vpop.f32.mrb[32].mxu1  ;;  %v4659_v19 = vadd.f32 %v1422_v12, %v1421_v16 }
 0x378   :  { %v1512_v22 = vadd.f32 %v1464_v17, %v6169_v21  ;;  %v1514_v24 = vadd.f32 %v1505_v18, %v6170_v23  ;;  %v1466_v26 = vpop.f32.mrb[33].mxu0  ;;  %v1507_v29 = vpop.f32.mrb[33].mxu1 }
 0x379   :  { %v1513_v33 = vadd.f32 %v1466_v26, %v6171_v31  ;;  %v1515_v36 = vadd.f32 %v1507_v29, %v6172_v34  ;;  %v1468_v38 = vpop.f32.mrb[34].mxu0  ;;  %v1509_v39 = vpop.f32.mrb[34].mxu1  ;;  %3327 = vtanh.f32 %v4659_v19  ;;  %v6175_v26 = vld [vmem:[#allocation22_spill] sm:$0xff]  ;;  %v6176_v29 = vld [vmem:[#allocation23_spill] sm:$0xff]  ;;  %v6177_v31 = vld [vmem:[#allocation24_spill] sm:$0xff] }
 0x37a   :  { %v2996_v41 = vmul.f32 -1.442695, %v1512_v22  ;;  %v1469_v42 = vpop.f32.mrb[35].mxu0  ;;  %v1510_v43 = vpop.f32.mrb[35].mxu1  ;;  %v6179_v34 = vld [vmem:[#allocation26_spill] sm:$0xff]  ;;  %v6181_v38 = vld [vmem:[#allocation28_spill] sm:$0xff] }
 0x37b   :  { %v2997_v44 = vmul.f32 -1.442695, %v1513_v33  ;;  %v2998_v47 = vmul.f32 -1.442695, %v1515_v36  ;;  %v6178_v33 = vld [vmem:[#allocation25_spill] sm:$0xff]  ;;  %v6180_v36 = vld [vmem:[#allocation27_spill] sm:$0xff] }
 0x37c   :  { %3329 = vpow2.f32 %v2996_v41  ;;  %v4702_v39 = vld [vmem:[#allocation6 + $0x4] ss:$16 sps:$4 sm:$0xff]   ;;  %v4705_v41 = vld [vmem:[#allocation6 + $0xc] ss:$16 sps:$4 sm:$0xff]   ;;  %v4708_v42 = vld [vmem:[#allocation6] ss:$16 sps:$4 sm:$0xff]  }
 0x37d   :  { %3331 = vpow2.f32 %v2997_v44  ;;  %v4711_v43 = vld [vmem:[#allocation6 + $0x8] ss:$16 sps:$4 sm:$0xff]   ;;  %v4714_v44 = vld [vmem:[#allocation6 + $0x24] ss:$16 sps:$4 sm:$0xff]  }
 0x37e   :  { %3333 = vpow2.f32 %v2998_v47  ;;  %v4723_v47 = vld [vmem:[#allocation6 + $0x28] ss:$16 sps:$4 sm:$0xff]  }
 0x37f   :  { %3335 = vtanh.f32 %v1514_v24  ;;  %v6174_v24 = vld [vmem:[#allocation21_spill] sm:$0xff] }
 0x383   :  { %v3328_v46 = vpop.eup %3327 }
 0x384   :  { %v1425_v49 = vmul.f32 %v3328_v46, %v3326_v5  ;;  %v4717_v5 = vld [vmem:[#allocation6 + $0x2c] ss:$16 sps:$4 sm:$0xff]   ;;  %v4720_v46 = vld [vmem:[#allocation6 + $0x20] ss:$16 sps:$4 sm:$0xff]  }
 0x386   :  { %v3330_v50 = vpop.eup %3329  ;;  %v1541_v51 = vpack.c.bf16 %v1425_v49, %v1425_v49  ;;  %v4726_v49 = vld [vmem:[#allocation6 + $0x44] ss:$16 sps:$4 sm:$0xff]  }
 0x387   :  { %v3332_v52 = vpop.eup %3331  ;;  %v1519_v53 = vadd.f32 1.0, %v3330_v50  ;;  %v4729_v50 = vld [vmem:[#allocation6 + $0x4c] ss:$16 sps:$4 sm:$0xff]  }
 0x388   :  { %v1525_v54 = vadd.f32 1.0, %v3332_v52  ;;  %1574 = vmatprep.mubr.bf16.mxu0 %v1541_v51  ;;  %1615 = vmatprep.mubr.bf16.mxu1 %v1541_v51  ;;  %v3334_v8 = vpop.eup %3333  ;;  %v4732_v51 = vld [vmem:[#allocation6 + $0x40] ss:$16 sps:$4 sm:$0xff]   ;;  %v4735_v52 = vld [vmem:[#allocation6 + $0x48] ss:$16 sps:$4 sm:$0xff]  }
 0x389   :  { %3337 = vrcp.f32 %v1519_v53  ;;  %v3336_v9 = vpop.eup %3335  ;;  %v1532_v14 = vadd.f32 1.0, %v3334_v8  ;;  %6182 = vst [vmem:[#allocation29_spill] sm:$0xff] %v4732_v51  ;;  %6183 = vst [vmem:[#allocation30_spill] sm:$0xff] %v4735_v52  ;;  %v4738_v53 = vld [vmem:[#allocation6 + $0x64] ss:$16 sps:$4 sm:$0xff]  }
 0x38a   :  { %3339 = vrcp.f32 %v1525_v54  ;;  %6184 = vst [vmem:[#allocation31_spill] sm:$0xff] %v4738_v53  ;;  %v4741_v54 = vld [vmem:[#allocation6 + $0x6c] ss:$16 sps:$4 sm:$0xff]   ;;  %v4744_v8 = vld [vmem:[#allocation6 + $0x60] ss:$16 sps:$4 sm:$0xff]  }
 0x38b   :  { %3341 = vrcp.f32 %v1532_v14  ;;  %6185 = vst [vmem:[#allocation32_spill] sm:$0xff] %v4741_v54  ;;  %6186 = vst [vmem:[#allocation33_spill] sm:$0xff] %v4744_v8  ;;  %v4759_v14 = vld [vmem:[#allocation6 + $0x88] ss:$16 sps:$4 sm:$0xff]  }
 0x38c   :  { %6191 = vst [vmem:[#allocation38_spill] sm:$0xff] %v4759_v14 }
 0x393   :  { %v3338_v11 = vpop.eup %3337 }
 0x394   :  { %v3340_v12 = vpop.eup %3339  ;;  %v1536_v13 = vmul.f32 %v3338_v11, %v3336_v9  ;;  %v4747_v9 = vld [vmem:[#allocation6 + $0x68] ss:$16 sps:$4 sm:$0xff]   ;;  %v4750_v11 = vld [vmem:[#allocation6 + $0x84] ss:$16 sps:$4 sm:$0xff]  }
 0x395   :  { %v1535_v16 = vmul.f32 %v3340_v12, %v4487_v55  ;;  %v3342_v18 = vpop.eup %3341  ;;  %v6173_v55 = vld [vmem:[#allocation20_spill] sm:$0xff]  ;;  %6187 = vst [vmem:[#allocation34_spill] sm:$0xff] %v4747_v9  ;;  %6188 = vst [vmem:[#allocation35_spill] sm:$0xff] %v4750_v11  ;;  %v4753_v12 = vld [vmem:[#allocation6 + $0x8c] ss:$16 sps:$4 sm:$0xff]  }
 0x396   :  { %6189 = vst [vmem:[#allocation36_spill] sm:$0xff] %v4753_v12 }
 0x397   :  { %v4667_v17 = vadd.f32 %v1536_v13, %v1535_v16  ;;  %v4756_v13 = vld [vmem:[#allocation6 + $0x80] ss:$16 sps:$4 sm:$0xff]   ;;  %v4762_v16 = vld [vmem:[#allocation6 + $0xa4] ss:$16 sps:$4 sm:$0xff]  }
 0x398   :  { %6190 = vst [vmem:[#allocation37_spill] sm:$0xff] %v4756_v13  ;;  %6192 = vst [vmem:[#allocation39_spill] sm:$0xff] %v4762_v16 }
 0x399   :  { %3343 = vtanh.f32 %v4667_v17 }
 0x3a3   :  { %v3344_v21 = vpop.eup %3343 }
 0x3a4   :  { %v1539_v22 = vmul.f32 %v3344_v21, %v3342_v18  ;;  %v4765_v18 = vld [vmem:[#allocation6 + $0xac] ss:$16 sps:$4 sm:$0xff]   ;;  %v4768_v21 = vld [vmem:[#allocation6 + $0xa0] ss:$16 sps:$4 sm:$0xff]  }
 0x3a5   :  { %6193 = vst [vmem:[#allocation40_spill] sm:$0xff] %v4765_v18  ;;  %6194 = vst [vmem:[#allocation41_spill] sm:$0xff] %v4768_v21 }
 0x3a6   :  { %v1540_v23 = vpack.c.bf16 %v1539_v22, %v1539_v22  ;;  %v4771_v22 = vld [vmem:[#allocation6 + $0xa8] ss:$16 sps:$4 sm:$0xff]  }
 0x3a7   :  { %6195 = vst [vmem:[#allocation42_spill] sm:$0xff] %v4771_v22 }
 0x3a8   :  { %1575 = vmatmul.mubr.bf16.vlgmr.msra.gmra.mrb[36].mxu0 %v1540_v23  ;;  %1616 = vmatmul.mubr.bf16.vlgmr.msra.gmra.mrb[36].mxu1 %v1540_v23 }
 0x3a9   :  { %1653 = vmatpush1.bf16.msra.mxu0 %v4494_v59  ;;  %1694 = vmatpush1.bf16.msra.mxu1 %v4497_v35 }
 0x3aa   :  { %1654 = vmatprep.subr.bf16.mxu0 %v4500_v61  ;;  %1695 = vmatprep.subr.bf16.mxu1 %v4503_v56 }
 0x3ab   :  { %1684 = vmatprep.mubr.bf16.mxu0 %v6062_v0  ;;  %1725 = vmatprep.mubr.bf16.mxu1 %v6062_v0 }
 0x3ad   :  { %1655 = vmatpush1.bf16.msra.mxu0 %v4508_v63  ;;  %1696 = vmatpush1.bf16.msra.mxu1 %v4511_v57 }
 0x3ae   :  { %1656 = vmatprep.subr.bf16.mxu0 %v4514_v45  ;;  %1697 = vmatprep.subr.bf16.mxu1 %v4517_v40 }
 0x3b1   :  { %1657 = vmatpush1.bf16.msra.mxu0 %v4520_v60  ;;  %1698 = vmatpush1.bf16.msra.mxu1 %v4523_v2 }
 0x3b2   :  { %1658 = vmatprep.subr.bf16.mxu0 %v4526_v10  ;;  %1699 = vmatprep.subr.bf16.mxu1 %v4529_v62 }
 0x3b5   :  { %1659 = vmatpush1.bf16.msra.mxu0 %v4532_v58  ;;  %1700 = vmatpush1.bf16.msra.mxu1 %v4535_v6 }
 0x3b6   :  { %1660 = vmatprep.subr.bf16.mxu0 %v4538_v4  ;;  %1701 = vmatprep.subr.bf16.mxu1 %v6173_v55 }
 0x3b9   :  { %1661 = vmatpush1.bf16.msra.mxu0 %v6174_v24  ;;  %1702 = vmatpush1.bf16.msra.mxu1 %v6175_v26 }
 0x3ba   :  { %1662 = vmatprep.subr.bf16.mxu0 %v6176_v29  ;;  %1703 = vmatprep.subr.bf16.mxu1 %v6177_v31 }
 0x3bd   :  { %1663 = vmatpush1.bf16.msra.mxu0 %v6178_v33  ;;  %1704 = vmatpush1.bf16.msra.mxu1 %v6179_v34 }
 0x3be   :  { %1664 = vmatprep.subr.bf16.mxu0 %v6180_v36  ;;  %1705 = vmatprep.subr.bf16.mxu1 %v6181_v38 }
 0x3c1   :  { %1665 = vmatpush1.bf16.msra.mxu0 %v4568_v20  ;;  %1706 = vmatpush1.bf16.msra.mxu1 %v4571_v25 }
 0x3c2   :  { %1666 = vmatprep.subr.bf16.mxu0 %v4574_v15  ;;  %1707 = vmatprep.subr.bf16.mxu1 %v4577_v7 }
 0x3c5   :  { %1667 = vmatpush1.bf16.msra.mxu0 %v4580_v30  ;;  %1708 = vmatpush1.bf16.msra.mxu1 %v4583_v1 }
 0x3c6   :  { %1764 = vmatprep.subr.bf16.mxu0 %v4702_v39  ;;  %1805 = vmatprep.subr.bf16.mxu1 %v4705_v41 }
 0x3c8   :  { %1685 = vmatmul.mubr.bf16.vlgmr.msra.gmra.mrb[40].mxu0 %v1540_v23  ;;  %1726 = vmatmul.mubr.bf16.vlgmr.msra.gmra.mrb[40].mxu1 %v1540_v23  ;;  %v4774_v23 = vld [vmem:[#allocation6 + $0xc4] ss:$16 sps:$4 sm:$0xff]  }
 0x3c9   :  { %1765 = vmatpush1.bf16.msra.mxu0 %v4708_v42  ;;  %1806 = vmatpush1.bf16.msra.mxu1 %v4711_v43  ;;  %6196 = vst [vmem:[#allocation43_spill] sm:$0xff] %v4774_v23 }
 0x3ca   :  { %1766 = vmatprep.subr.bf16.mxu0 %v4714_v44  ;;  %1807 = vmatprep.subr.bf16.mxu1 %v4717_v5 }
 0x3cd   :  { %1767 = vmatpush1.bf16.msra.mxu0 %v4720_v46  ;;  %1808 = vmatpush1.bf16.msra.mxu1 %v4723_v47 }
 0x3ce   :  { %1768 = vmatprep.subr.bf16.mxu0 %v4726_v49  ;;  %1809 = vmatprep.subr.bf16.mxu1 %v4729_v50 }
 0x3d1   :  { %1769 = vmatpush1.bf16.msra.mxu0 %v4732_v51  ;;  %1810 = vmatpush1.bf16.msra.mxu1 %v4735_v52 }
 0x3d2   :  { %1770 = vmatprep.subr.bf16.mxu0 %v4738_v53  ;;  %1811 = vmatprep.subr.bf16.mxu1 %v4741_v54 }
 0x3d5   :  { %1771 = vmatpush1.bf16.msra.mxu0 %v4744_v8  ;;  %1812 = vmatpush1.bf16.msra.mxu1 %v4747_v9 }
 0x3d6   :  { %1772 = vmatprep.subr.bf16.mxu0 %v4750_v11  ;;  %1813 = vmatprep.subr.bf16.mxu1 %v4753_v12 }
 0x3d9   :  { %1773 = vmatpush1.bf16.msra.mxu0 %v4756_v13  ;;  %1814 = vmatpush1.bf16.msra.mxu1 %v4759_v14  ;;  %v4777_v14 = vld [vmem:[#allocation6 + $0xcc] ss:$16 sps:$4 sm:$0xff]  }
 0x3da   :  { %1774 = vmatprep.subr.bf16.mxu0 %v4762_v16  ;;  %1815 = vmatprep.subr.bf16.mxu1 %v4765_v18  ;;  %6197 = vst [vmem:[#allocation68_spill] sm:$0xff] %v4777_v14  ;;  %v4780_v16 = vld [vmem:[#allocation6 + $0xc0] ss:$16 sps:$4 sm:$0xff]   ;;  %v4783_v18 = vld [vmem:[#allocation6 + $0xc8] ss:$16 sps:$4 sm:$0xff]  }
 0x3db   :  { %6198 = vst [vmem:[#allocation69_spill] sm:$0xff] %v4780_v16  ;;  %6199 = vst [vmem:[#allocation70_spill] sm:$0xff] %v4783_v18 }
 0x3dd   :  { %1775 = vmatpush1.bf16.msra.mxu0 %v4768_v21  ;;  %1816 = vmatpush1.bf16.msra.mxu1 %v4771_v22  ;;  %v4786_v21 = vld [vmem:[#allocation6 + $0xe4] ss:$16 sps:$4 sm:$0xff]   ;;  %v4789_v22 = vld [vmem:[#allocation6 + $0xec] ss:$16 sps:$4 sm:$0xff]  }
 0x3de   :  { %1776 = vmatprep.subr.bf16.mxu0 %v4774_v23  ;;  %1817 = vmatprep.subr.bf16.mxu1 %v4777_v14  ;;  %6200 = vst [vmem:[#allocation71_spill] sm:$0xff] %v4786_v21  ;;  %6201 = vst [vmem:[#allocation44_spill] sm:$0xff] %v4789_v22  ;;  %v4792_v23 = vld [vmem:[#allocation6 + $0xe0] ss:$16 sps:$4 sm:$0xff]   ;;  %v4795_v14 = vld [vmem:[#allocation6 + $0xe8] ss:$16 sps:$4 sm:$0xff]  }
 0x3df   :  { %6202 = vst [vmem:[#allocation45_spill] sm:$0xff] %v4792_v23  ;;  %6203 = vst [vmem:[#allocation46_spill] sm:$0xff] %v4795_v14 }
 0x3e1   :  { %1777 = vmatpush1.bf16.msra.mxu0 %v4780_v16  ;;  %1818 = vmatpush1.bf16.msra.mxu1 %v4783_v18  ;;  %v4798_v16 = vld [vmem:[#allocation6 + $0x104] ss:$16 sps:$4 sm:$0xff]   ;;  %v4801_v18 = vld [vmem:[#allocation6 + $0x10c] ss:$16 sps:$4 sm:$0xff]  }
 0x3e2   :  { %1778 = vmatprep.subr.bf16.mxu0 %v4786_v21  ;;  %1819 = vmatprep.subr.bf16.mxu1 %v4789_v22  ;;  %6204 = vst [vmem:[#allocation47_spill] sm:$0xff] %v4798_v16  ;;  %6205 = vst [vmem:[#allocation48_spill] sm:$0xff] %v4801_v18  ;;  %v4804_v21 = vld [vmem:[#allocation6 + $0x100] ss:$16 sps:$4 sm:$0xff]   ;;  %v4807_v22 = vld [vmem:[#allocation6 + $0x108] ss:$16 sps:$4 sm:$0xff]  }
 0x3e3   :  { %6206 = vst [vmem:[#allocation49_spill] sm:$0xff] %v4804_v21  ;;  %6207 = vst [vmem:[#allocation50_spill] sm:$0xff] %v4807_v22 }
 0x3e5   :  { %1779 = vmatpush1.bf16.msra.mxu0 %v4792_v23  ;;  %1820 = vmatpush1.bf16.msra.mxu1 %v4795_v14  ;;  %v4810_v23 = vld [vmem:[#allocation6 + $0x124] ss:$16 sps:$4 sm:$0xff]   ;;  %v4813_v14 = vld [vmem:[#allocation6 + $0x12c] ss:$16 sps:$4 sm:$0xff]  }
 0x3e6   :  { %1780 = vmatprep.subr.bf16.mxu0 %v4798_v16  ;;  %1821 = vmatprep.subr.bf16.mxu1 %v4801_v18  ;;  %6208 = vst [vmem:[#allocation51_spill] sm:$0xff] %v4810_v23  ;;  %6209 = vst [vmem:[#allocation52_spill] sm:$0xff] %v4813_v14  ;;  %v4816_v16 = vld [vmem:[#allocation6 + $0x120] ss:$16 sps:$4 sm:$0xff]   ;;  %v4819_v18 = vld [vmem:[#allocation6 + $0x128] ss:$16 sps:$4 sm:$0xff]  }
 0x3e7   :  { %6210 = vst [vmem:[#allocation53_spill] sm:$0xff] %v4816_v16  ;;  %6211 = vst [vmem:[#allocation54_spill] sm:$0xff] %v4819_v18 }
 0x3e9   :  { %1781 = vmatpush1.bf16.msra.mxu0 %v4804_v21  ;;  %1822 = vmatpush1.bf16.msra.mxu1 %v4807_v22  ;;  %v4822_v21 = vld [vmem:[#allocation6 + $0x144] ss:$16 sps:$4 sm:$0xff]   ;;  %v4825_v22 = vld [vmem:[#allocation6 + $0x14c] ss:$16 sps:$4 sm:$0xff]  }
 0x3ea   :  { %1782 = vmatprep.subr.bf16.mxu0 %v4810_v23  ;;  %1823 = vmatprep.subr.bf16.mxu1 %v4813_v14  ;;  %6212 = vst [vmem:[#allocation55_spill] sm:$0xff] %v4822_v21  ;;  %6213 = vst [vmem:[#allocation56_spill] sm:$0xff] %v4825_v22  ;;  %v4828_v23 = vld [vmem:[#allocation6 + $0x140] ss:$16 sps:$4 sm:$0xff]   ;;  %v4831_v14 = vld [vmem:[#allocation6 + $0x148] ss:$16 sps:$4 sm:$0xff]  }
 0x3eb   :  { %6214 = vst [vmem:[#allocation57_spill] sm:$0xff] %v4828_v23  ;;  %6215 = vst [vmem:[#allocation58_spill] sm:$0xff] %v4831_v14 }
 0x3ed   :  { %1783 = vmatpush1.bf16.msra.mxu0 %v4816_v16  ;;  %1824 = vmatpush1.bf16.msra.mxu1 %v4819_v18  ;;  %v4834_v16 = vld [vmem:[#allocation6 + $0x164] ss:$16 sps:$4 sm:$0xff]   ;;  %v4837_v18 = vld [vmem:[#allocation6 + $0x16c] ss:$16 sps:$4 sm:$0xff]  }
 0x3ee   :  { %1784 = vmatprep.subr.bf16.mxu0 %v4822_v21  ;;  %1825 = vmatprep.subr.bf16.mxu1 %v4825_v22  ;;  %6216 = vst [vmem:[#allocation59_spill] sm:$0xff] %v4834_v16  ;;  %6217 = vst [vmem:[#allocation60_spill] sm:$0xff] %v4837_v18  ;;  %v4840_v21 = vld [vmem:[#allocation6 + $0x160] ss:$16 sps:$4 sm:$0xff]   ;;  %v4843_v22 = vld [vmem:[#allocation6 + $0x168] ss:$16 sps:$4 sm:$0xff]  }
 0x3ef   :  { %6218 = vst [vmem:[#allocation61_spill] sm:$0xff] %v4840_v21  ;;  %6219 = vst [vmem:[#allocation62_spill] sm:$0xff] %v4843_v22 }
 0x3f1   :  { %1785 = vmatpush1.bf16.msra.mxu0 %v4828_v23  ;;  %1826 = vmatpush1.bf16.msra.mxu1 %v4831_v14  ;;  %v4846_v23 = vld [vmem:[#allocation6 + $0x184] ss:$16 sps:$4 sm:$0xff]   ;;  %v4849_v14 = vld [vmem:[#allocation6 + $0x18c] ss:$16 sps:$4 sm:$0xff]  }
 0x3f2   :  { %1786 = vmatprep.subr.bf16.mxu0 %v4834_v16  ;;  %1827 = vmatprep.subr.bf16.mxu1 %v4837_v18  ;;  %6220 = vst [vmem:[#allocation63_spill] sm:$0xff] %v4846_v23  ;;  %6221 = vst [vmem:[#allocation64_spill] sm:$0xff] %v4849_v14  ;;  %v4852_v16 = vld [vmem:[#allocation6 + $0x180] ss:$16 sps:$4 sm:$0xff]   ;;  %v4855_v18 = vld [vmem:[#allocation6 + $0x188] ss:$16 sps:$4 sm:$0xff]  }
 0x3f3   :  { %6222 = vst [vmem:[#allocation65_spill] sm:$0xff] %v4852_v16  ;;  %6223 = vst [vmem:[#allocation66_spill] sm:$0xff] %v4855_v18 }
 0x3f5   :  { %1787 = vmatpush1.bf16.msra.mxu0 %v4840_v21  ;;  %1828 = vmatpush1.bf16.msra.mxu1 %v4843_v22  ;;  %v4858_v21 = vld [vmem:[#allocation6 + $0x1a4] ss:$16 sps:$4 sm:$0xff]   ;;  %v4861_v22 = vld [vmem:[#allocation6 + $0x1ac] ss:$16 sps:$4 sm:$0xff]  }
 0x3f6   :  { %1788 = vmatprep.subr.bf16.mxu0 %v4846_v23  ;;  %1829 = vmatprep.subr.bf16.mxu1 %v4849_v14  ;;  %6224 = vst [vmem:[#allocation67_spill] sm:$0xff] %v4858_v21  ;;  %6225 = vst [vmem:[#allocation13_spill] sm:$0xff] %v4861_v22  ;;  %v4864_v23 = vld [vmem:[#allocation6 + $0x1a0] ss:$16 sps:$4 sm:$0xff]   ;;  %v4867_v14 = vld [vmem:[#allocation6 + $0x1a8] ss:$16 sps:$4 sm:$0xff]  }
 0x3f7   :  { %6226 = vst [vmem:[#allocation14_spill] sm:$0xff] %v4864_v23  ;;  %6227 = vst [vmem:[#allocation15_spill] sm:$0xff] %v4867_v14 }
 0x3f9   :  { %1789 = vmatpush1.bf16.msra.mxu0 %v4852_v16  ;;  %1830 = vmatpush1.bf16.msra.mxu1 %v4855_v18  ;;  %v4870_v16 = vld [vmem:[#allocation6 + $0x1c4] ss:$16 sps:$4 sm:$0xff]   ;;  %v4873_v18 = vld [vmem:[#allocation6 + $0x1cc] ss:$16 sps:$4 sm:$0xff]  }
 0x3fa   :  { %1790 = vmatprep.subr.bf16.mxu0 %v4858_v21  ;;  %1831 = vmatprep.subr.bf16.mxu1 %v4861_v22  ;;  %6228 = vst [vmem:[#allocation16_spill] sm:$0xff] %v4870_v16  ;;  %6229 = vst [vmem:[#allocation17_spill] sm:$0xff] %v4873_v18  ;;  %v4876_v21 = vld [vmem:[#allocation6 + $0x1c0] ss:$16 sps:$4 sm:$0xff]   ;;  %v4879_v22 = vld [vmem:[#allocation6 + $0x1c8] ss:$16 sps:$4 sm:$0xff]  }
 0x3fb   :  { %6230 = vst [vmem:[#allocation18_spill] sm:$0xff] %v4876_v21  ;;  %6231 = vst [vmem:[#allocation19_spill] sm:$0xff] %v4879_v22 }
 0x3fd   :  { %1791 = vmatpush1.bf16.msra.mxu0 %v4864_v23  ;;  %1832 = vmatpush1.bf16.msra.mxu1 %v4867_v14  ;;  %v4882_v23 = vld [vmem:[#allocation6 + $0x1e4] ss:$16 sps:$4 sm:$0xff]   ;;  %v4885_v14 = vld [vmem:[#allocation6 + $0x1ec] ss:$16 sps:$4 sm:$0xff]  }
 0x3fe   :  { %1792 = vmatprep.subr.bf16.mxu0 %v4870_v16  ;;  %1833 = vmatprep.subr.bf16.mxu1 %v4873_v18  ;;  %6232 = vst [vmem:[#allocation72_spill] sm:$0xff] %v4882_v23  ;;  %6233 = vst [vmem:[#allocation73_spill] sm:$0xff] %v4885_v14  ;;  %v4888_v16 = vld [vmem:[#allocation6 + $0x1e0] ss:$16 sps:$4 sm:$0xff]   ;;  %v4891_v18 = vld [vmem:[#allocation6 + $0x1e8] ss:$16 sps:$4 sm:$0xff]  }
 0x3ff   :  { %6234 = vst [vmem:[#allocation74_spill] sm:$0xff] %v4888_v16  ;;  %6235 = vst [vmem:[#allocation75_spill] sm:$0xff] %v4891_v18 }
 0x401   :  { %1793 = vmatpush1.bf16.msra.mxu0 %v4876_v21  ;;  %1834 = vmatpush1.bf16.msra.mxu1 %v4879_v22 }
 0x402   :  { %1794 = vmatprep.subr.bf16.mxu0 %v4882_v23  ;;  %1835 = vmatprep.subr.bf16.mxu1 %v4885_v14 }
 0x405   :  { %1795 = vmatpush1.bf16.msra.mxu0 %v4888_v16  ;;  %1836 = vmatpush1.bf16.msra.mxu1 %v4891_v18 }
 0x406   :  { %1874 = vmatprep.subr.bf16.mxu0 %v6162_v27  ;;  %1915 = vmatprep.subr.bf16.mxu1 %v6163_v28 }
 0x47b   :  { %v1576_v22 = vpop.f32.mrb[36].mxu0  ;;  %v1617_v21 = vpop.f32.mrb[36].mxu1 }
 0x47c   :  { %v1577_v23 = vadd.f32 %v1576_v22, %v6164_v32  ;;  %v1578_v13 = vpop.f32.mrb[37].mxu0  ;;  %v1619_v12 = vpop.f32.mrb[37].mxu1  ;;  %v1618_v28 = vadd.f32 %v1617_v21, %v6167_v48  ;;  %v6236_v48 = vld [vmem:[#allocation76_spill] sm:$0xff] }
 0x47d   :  { %v1579_v14 = vadd.f32 %v1578_v13, %v6165_v37  ;;  %v1580_v11 = vpop.f32.mrb[38].mxu0  ;;  %v1621_v9 = vpop.f32.mrb[38].mxu1  ;;  %v1620_v27 = vadd.f32 %v1619_v12, %v6166_v3 }
 0x47e   :  { %v2999_v8 = vmul.f32 -1.442695, %v1577_v23  ;;  %v1581_v16 = vpop.f32.mrb[39].mxu0  ;;  %v1622_v54 = vpop.f32.mrb[39].mxu1  ;;  %v6238_v23 = vld [vmem:[#allocation78_spill] sm:$0xff] }
 0x47f   :  { %v3000_v53 = vmul.f32 -1.442695, %v1579_v14  ;;  %v3001_v18 = vmul.f32 -1.442695, %v1620_v27  ;;  %v6237_v16 = vld [vmem:[#allocation77_spill] sm:$0xff] }
 0x480   :  { %3345 = vpow2.f32 %v2999_v8 }
 0x481   :  { %3347 = vpow2.f32 %v3000_v53 }
 0x482   :  { %3349 = vpow2.f32 %v3001_v18 }
 0x483   :  { %3351 = vtanh.f32 %v1618_v28  ;;  %v6239_v28 = vld [vmem:[#allocation79_spill] sm:$0xff] }
 0x48a   :  { %v3346_v52 = vpop.eup %3345 }
 0x48b   :  { %v3348_v51 = vpop.eup %3347  ;;  %v1627_v32 = vadd.f32 1.0, %v3346_v52 }
 0x48c   :  { %v1633_v22 = vadd.f32 1.0, %v3348_v51  ;;  %v3350_v37 = vpop.eup %3349 }
 0x48d   :  { %3353 = vrcp.f32 %v1627_v32  ;;  %v3352_v9 = vpop.eup %3351  ;;  %v1640_v8 = vadd.f32 1.0, %v3350_v37 }
 0x48e   :  { %3355 = vrcp.f32 %v1633_v22 }
 0x48f   :  { %3357 = vrcp.f32 %v1640_v8 }
 0x497   :  { %v3354_v11 = vpop.eup %3353 }
 0x498   :  { %v3356_v54 = vpop.eup %3355  ;;  %v1644_v13 = vmul.f32 %v3354_v11, %v3352_v9 }
 0x499   :  { %v1643_v53 = vmul.f32 %v3356_v54, %v4659_v19 }
 0x49b   :  { %v1686_v3 = vpop.f32.mrb[40].mxu0  ;;  %v1727_v12 = vpop.f32.mrb[40].mxu1  ;;  %v4901_v14 = vadd.f32 %v1644_v13, %v1643_v53 }
 0x49c   :  { %v1734_v52 = vadd.f32 %v1686_v3, %v6236_v48  ;;  %v1736_v18 = vadd.f32 %v1727_v12, %v6237_v16  ;;  %v1688_v51 = vpop.f32.mrb[41].mxu0  ;;  %v1729_v21 = vpop.f32.mrb[41].mxu1 }
 0x49d   :  { %v1735_v27 = vadd.f32 %v1688_v51, %v6238_v23  ;;  %v1737_v32 = vadd.f32 %v1729_v21, %v6239_v28  ;;  %v1690_v22 = vpop.f32.mrb[42].mxu0  ;;  %v1731_v9 = vpop.f32.mrb[42].mxu1  ;;  %3359 = vtanh.f32 %v4901_v14 }
 0x49e   :  { %v3002_v19 = vmul.f32 -1.442695, %v1734_v52  ;;  %v1691_v37 = vpop.f32.mrb[43].mxu0  ;;  %v1732_v11 = vpop.f32.mrb[43].mxu1 }
 0x49f   :  { %v3003_v54 = vmul.f32 -1.442695, %v1735_v27  ;;  %v3358_v13 = vpop.eup %3357  ;;  %v3004_v53 = vmul.f32 -1.442695, %v1737_v32 }
 0x4a0   :  { %3361 = vpow2.f32 %v3002_v19 }
 0x4a1   :  { %3363 = vpow2.f32 %v3003_v54 }
 0x4a2   :  { %3365 = vpow2.f32 %v3004_v53  ;;  %v6273_v53 = vld [vmem:[#allocation58_spill] sm:$0xff] }
 0x4a3   :  { %3367 = vtanh.f32 %v1736_v18 }
 0x4a7   :  { %v3360_v8 = vpop.eup %3359 }
 0x4a8   :  { %v1647_v3 = vmul.f32 %v3360_v8, %v3358_v13  ;;  %v6271_v13 = vld [vmem:[#allocation56_spill] sm:$0xff]  ;;  %v6272_v8 = vld [vmem:[#allocation57_spill] sm:$0xff] }
 0x4aa   :  { %v3362_v12 = vpop.eup %3361  ;;  %v1763_v48 = vpack.c.bf16 %v1647_v3, %v1647_v3  ;;  %v6274_v3 = vld [vmem:[#allocation59_spill] sm:$0xff] }
 0x4ab   :  { %v3364_v16 = vpop.eup %3363  ;;  %v1741_v51 = vadd.f32 1.0, %v3362_v12  ;;  %v6275_v12 = vld [vmem:[#allocation60_spill] sm:$0xff] }
 0x4ac   :  { %v1747_v21 = vadd.f32 1.0, %v3364_v16  ;;  %1796 = vmatprep.mubr.bf16.mxu0 %v1763_v48  ;;  %1837 = vmatprep.mubr.bf16.mxu1 %v1763_v48  ;;  %v3366_v52 = vpop.eup %3365  ;;  %v6276_v48 = vld [vmem:[#allocation61_spill] sm:$0xff]  ;;  %v6277_v16 = vld [vmem:[#allocation62_spill] sm:$0xff] }
 0x4ad   :  { %3369 = vrcp.f32 %v1741_v51  ;;  %v3368_v23 = vpop.eup %3367  ;;  %v1754_v9 = vadd.f32 1.0, %v3366_v52  ;;  %v6278_v51 = vld [vmem:[#allocation63_spill] sm:$0xff]  ;;  %v6280_v52 = vld [vmem:[#allocation65_spill] sm:$0xff] }
 0x4ae   :  { %3371 = vrcp.f32 %v1747_v21  ;;  %v6279_v21 = vld [vmem:[#allocation64_spill] sm:$0xff] }
 0x4af   :  { %3373 = vrcp.f32 %v1754_v9  ;;  %v6285_v9 = vld [vmem:[#allocation15_spill] sm:$0xff] }
 0x4b7   :  { %v3370_v27 = vpop.eup %3369 }
 0x4b8   :  { %v3372_v28 = vpop.eup %3371  ;;  %v1758_v22 = vmul.f32 %v3370_v27, %v3368_v23  ;;  %v6281_v23 = vld [vmem:[#allocation66_spill] sm:$0xff]  ;;  %v6282_v27 = vld [vmem:[#allocation67_spill] sm:$0xff] }
 0x4b9   :  { %v1757_v32 = vmul.f32 %v3372_v28, %v4667_v17  ;;  %v3374_v37 = vpop.eup %3373  ;;  %v6261_v17 = vld [vmem:[#allocation46_spill] sm:$0xff]  ;;  %v6283_v28 = vld [vmem:[#allocation13_spill] sm:$0xff] }
 0x4bb   :  { %v4909_v19 = vadd.f32 %v1758_v22, %v1757_v32  ;;  %v6284_v22 = vld [vmem:[#allocation14_spill] sm:$0xff]  ;;  %v6286_v32 = vld [vmem:[#allocation16_spill] sm:$0xff] }
 0x4bd   :  { %3375 = vtanh.f32 %v4909_v19 }
 0x4c7   :  { %v3376_v18 = vpop.eup %3375 }
 0x4c8   :  { %v1761_v11 = vmul.f32 %v3376_v18, %v3374_v37  ;;  %v6287_v37 = vld [vmem:[#allocation17_spill] sm:$0xff]  ;;  %v6288_v18 = vld [vmem:[#allocation18_spill] sm:$0xff] }
 0x4ca   :  { %v1762_v54 = vpack.c.bf16 %v1761_v11, %v1761_v11  ;;  %v6289_v11 = vld [vmem:[#allocation19_spill] sm:$0xff] }
 0x4cc   :  { %1797 = vmatmul.mubr.bf16.vlgmr.msra.gmra.mrb[44].mxu0 %v1762_v54  ;;  %1838 = vmatmul.mubr.bf16.vlgmr.msra.gmra.mrb[44].mxu1 %v1762_v54 }
 0x4cd   :  { %1875 = vmatpush1.bf16.msra.mxu0 %v4494_v59  ;;  %1916 = vmatpush1.bf16.msra.mxu1 %v4497_v35  ;;  %v6240_v59 = vld [vmem:[#allocation29_spill] sm:$0xff]  ;;  %v6241_v35 = vld [vmem:[#allocation30_spill] sm:$0xff] }
 0x4ce   :  { %1876 = vmatprep.subr.bf16.mxu0 %v4500_v61  ;;  %1917 = vmatprep.subr.bf16.mxu1 %v4503_v56  ;;  %v6242_v61 = vld [vmem:[#allocation31_spill] sm:$0xff]  ;;  %v6243_v56 = vld [vmem:[#allocation32_spill] sm:$0xff] }
 0x4cf   :  { %1906 = vmatprep.mubr.bf16.mxu0 %v6062_v0  ;;  %1947 = vmatprep.mubr.bf16.mxu1 %v6062_v0 }
 0x4d1   :  { %1877 = vmatpush1.bf16.msra.mxu0 %v4508_v63  ;;  %1918 = vmatpush1.bf16.msra.mxu1 %v4511_v57  ;;  %v6244_v63 = vld [vmem:[#allocation33_spill] sm:$0xff]  ;;  %v6245_v57 = vld [vmem:[#allocation34_spill] sm:$0xff] }
 0x4d2   :  { %1878 = vmatprep.subr.bf16.mxu0 %v4514_v45  ;;  %1919 = vmatprep.subr.bf16.mxu1 %v4517_v40  ;;  %v6246_v45 = vld [vmem:[#allocation35_spill] sm:$0xff]  ;;  %v6247_v40 = vld [vmem:[#allocation36_spill] sm:$0xff] }
 0x4d5   :  { %1879 = vmatpush1.bf16.msra.mxu0 %v4520_v60  ;;  %1920 = vmatpush1.bf16.msra.mxu1 %v4523_v2  ;;  %v6248_v60 = vld [vmem:[#allocation37_spill] sm:$0xff]  ;;  %v6249_v2 = vld [vmem:[#allocation38_spill] sm:$0xff] }
 0x4d6   :  { %1880 = vmatprep.subr.bf16.mxu0 %v4526_v10  ;;  %1921 = vmatprep.subr.bf16.mxu1 %v4529_v62  ;;  %v6250_v10 = vld [vmem:[#allocation39_spill] sm:$0xff]  ;;  %v6251_v62 = vld [vmem:[#allocation40_spill] sm:$0xff] }
 0x4d9   :  { %1881 = vmatpush1.bf16.msra.mxu0 %v4532_v58  ;;  %1922 = vmatpush1.bf16.msra.mxu1 %v4535_v6  ;;  %v6252_v58 = vld [vmem:[#allocation41_spill] sm:$0xff]  ;;  %v6253_v6 = vld [vmem:[#allocation42_spill] sm:$0xff] }
 0x4da   :  { %1882 = vmatprep.subr.bf16.mxu0 %v4538_v4  ;;  %1923 = vmatprep.subr.bf16.mxu1 %v6173_v55  ;;  %v6254_v4 = vld [vmem:[#allocation43_spill] sm:$0xff] }
 0x4db   :  { %v6262_v55 = vld [vmem:[#allocation47_spill] sm:$0xff] }
 0x4dd   :  { %1883 = vmatpush1.bf16.msra.mxu0 %v6174_v24  ;;  %1924 = vmatpush1.bf16.msra.mxu1 %v6175_v26  ;;  %v6263_v24 = vld [vmem:[#allocation48_spill] sm:$0xff]  ;;  %v6264_v26 = vld [vmem:[#allocation49_spill] sm:$0xff] }
 0x4de   :  { %1884 = vmatprep.subr.bf16.mxu0 %v6176_v29  ;;  %1925 = vmatprep.subr.bf16.mxu1 %v6177_v31  ;;  %v6265_v29 = vld [vmem:[#allocation50_spill] sm:$0xff]  ;;  %v6266_v31 = vld [vmem:[#allocation51_spill] sm:$0xff] }
 0x4e1   :  { %1885 = vmatpush1.bf16.msra.mxu0 %v6178_v33  ;;  %1926 = vmatpush1.bf16.msra.mxu1 %v6179_v34  ;;  %v6267_v33 = vld [vmem:[#allocation52_spill] sm:$0xff]  ;;  %v6268_v34 = vld [vmem:[#allocation53_spill] sm:$0xff] }
 0x4e2   :  { %1886 = vmatprep.subr.bf16.mxu0 %v6180_v36  ;;  %1927 = vmatprep.subr.bf16.mxu1 %v6181_v38  ;;  %v6269_v36 = vld [vmem:[#allocation54_spill] sm:$0xff]  ;;  %v6270_v38 = vld [vmem:[#allocation55_spill] sm:$0xff] }
 0x4e5   :  { %1887 = vmatpush1.bf16.msra.mxu0 %v4568_v20  ;;  %1928 = vmatpush1.bf16.msra.mxu1 %v4571_v25  ;;  %v6258_v20 = vld [vmem:[#allocation71_spill] sm:$0xff]  ;;  %v6259_v25 = vld [vmem:[#allocation44_spill] sm:$0xff] }
 0x4e6   :  { %1888 = vmatprep.subr.bf16.mxu0 %v4574_v15  ;;  %1929 = vmatprep.subr.bf16.mxu1 %v4577_v7  ;;  %v6255_v7 = vld [vmem:[#allocation68_spill] sm:$0xff]  ;;  %v6260_v15 = vld [vmem:[#allocation45_spill] sm:$0xff] }
 0x4e9   :  { %1889 = vmatpush1.bf16.msra.mxu0 %v4580_v30  ;;  %1930 = vmatpush1.bf16.msra.mxu1 %v4583_v1  ;;  %v6256_v30 = vld [vmem:[#allocation69_spill] sm:$0xff]  ;;  %v6257_v1 = vld [vmem:[#allocation70_spill] sm:$0xff] }
 0x4ea   :  { %1986 = vmatprep.subr.bf16.mxu0 %v4702_v39  ;;  %2027 = vmatprep.subr.bf16.mxu1 %v4705_v41 }
 0x4ec   :  { %1907 = vmatmul.mubr.bf16.vlgmr.msra.gmra.mrb[48].mxu0 %v1762_v54  ;;  %1948 = vmatmul.mubr.bf16.vlgmr.msra.gmra.mrb[48].mxu1 %v1762_v54  ;;  %v6290_v54 = vld [vmem:[#allocation72_spill] sm:$0xff] }
 0x4ed   :  { %1987 = vmatpush1.bf16.msra.mxu0 %v4708_v42  ;;  %2028 = vmatpush1.bf16.msra.mxu1 %v4711_v43 }
 0x4ee   :  { %1988 = vmatprep.subr.bf16.mxu0 %v4714_v44  ;;  %2029 = vmatprep.subr.bf16.mxu1 %v4717_v5 }
 0x4f1   :  { %1989 = vmatpush1.bf16.msra.mxu0 %v4720_v46  ;;  %2030 = vmatpush1.bf16.msra.mxu1 %v4723_v47 }
 0x4f2   :  { %1990 = vmatprep.subr.bf16.mxu0 %v4726_v49  ;;  %2031 = vmatprep.subr.bf16.mxu1 %v4729_v50 }
 0x4f5   :  { %1991 = vmatpush1.bf16.msra.mxu0 %v6240_v59  ;;  %2032 = vmatpush1.bf16.msra.mxu1 %v6241_v35 }
 0x4f6   :  { %1992 = vmatprep.subr.bf16.mxu0 %v6242_v61  ;;  %2033 = vmatprep.subr.bf16.mxu1 %v6243_v56 }
 0x4f9   :  { %1993 = vmatpush1.bf16.msra.mxu0 %v6244_v63  ;;  %2034 = vmatpush1.bf16.msra.mxu1 %v6245_v57 }
 0x4fa   :  { %1994 = vmatprep.subr.bf16.mxu0 %v6246_v45  ;;  %2035 = vmatprep.subr.bf16.mxu1 %v6247_v40 }
 0x4fd   :  { %1995 = vmatpush1.bf16.msra.mxu0 %v6248_v60  ;;  %2036 = vmatpush1.bf16.msra.mxu1 %v6249_v2 }
 0x4fe   :  { %1996 = vmatprep.subr.bf16.mxu0 %v6250_v10  ;;  %2037 = vmatprep.subr.bf16.mxu1 %v6251_v62 }
 0x501   :  { %1997 = vmatpush1.bf16.msra.mxu0 %v6252_v58  ;;  %2038 = vmatpush1.bf16.msra.mxu1 %v6253_v6 }
 0x502   :  { %1998 = vmatprep.subr.bf16.mxu0 %v6254_v4  ;;  %2039 = vmatprep.subr.bf16.mxu1 %v6255_v7 }
 0x505   :  { %1999 = vmatpush1.bf16.msra.mxu0 %v6256_v30  ;;  %2040 = vmatpush1.bf16.msra.mxu1 %v6257_v1 }
 0x506   :  { %2000 = vmatprep.subr.bf16.mxu0 %v6258_v20  ;;  %2041 = vmatprep.subr.bf16.mxu1 %v6259_v25 }
 0x509   :  { %2001 = vmatpush1.bf16.msra.mxu0 %v6260_v15  ;;  %2042 = vmatpush1.bf16.msra.mxu1 %v6261_v17 }
 0x50a   :  { %2002 = vmatprep.subr.bf16.mxu0 %v6262_v55  ;;  %2043 = vmatprep.subr.bf16.mxu1 %v6263_v24 }
 0x50d   :  { %2003 = vmatpush1.bf16.msra.mxu0 %v6264_v26  ;;  %2044 = vmatpush1.bf16.msra.mxu1 %v6265_v29 }
 0x50e   :  { %2004 = vmatprep.subr.bf16.mxu0 %v6266_v31  ;;  %2045 = vmatprep.subr.bf16.mxu1 %v6267_v33 }
 0x511   :  { %2005 = vmatpush1.bf16.msra.mxu0 %v6268_v34  ;;  %2046 = vmatpush1.bf16.msra.mxu1 %v6269_v36 }
 0x512   :  { %2006 = vmatprep.subr.bf16.mxu0 %v6270_v38  ;;  %2047 = vmatprep.subr.bf16.mxu1 %v6271_v13 }
 0x515   :  { %2007 = vmatpush1.bf16.msra.mxu0 %v6272_v8  ;;  %2048 = vmatpush1.bf16.msra.mxu1 %v6273_v53  ;;  %v6303_v8 = vld [vmem:[#allocation83_spill] sm:$0xff] }
 0x516   :  { %2008 = vmatprep.subr.bf16.mxu0 %v6274_v3  ;;  %2049 = vmatprep.subr.bf16.mxu1 %v6275_v12 }
 0x519   :  { %2009 = vmatpush1.bf16.msra.mxu0 %v6276_v48  ;;  %2050 = vmatpush1.bf16.msra.mxu1 %v6277_v16 }
 0x51a   :  { %2010 = vmatprep.subr.bf16.mxu0 %v6278_v51  ;;  %2051 = vmatprep.subr.bf16.mxu1 %v6279_v21 }
 0x51d   :  { %2011 = vmatpush1.bf16.msra.mxu0 %v6280_v52  ;;  %2052 = vmatpush1.bf16.msra.mxu1 %v6281_v23  ;;  %v6291_v52 = vld [vmem:[#allocation73_spill] sm:$0xff]  ;;  %v6292_v23 = vld [vmem:[#allocation74_spill] sm:$0xff] }
 0x51e   :  { %2012 = vmatprep.subr.bf16.mxu0 %v6282_v27  ;;  %2053 = vmatprep.subr.bf16.mxu1 %v6283_v28  ;;  %v6293_v27 = vld [vmem:[#allocation75_spill] sm:$0xff]  ;;  %v5008_v28 = vld [vmem:[#allocation3 + $0x4] ss:$16 sps:$4 sm:$0xff]  }
 0x51f   :  { %6294 = vst [vmem:[#allocation20_spill] sm:$0xff] %v5008_v28 }
 0x521   :  { %2013 = vmatpush1.bf16.msra.mxu0 %v6284_v22  ;;  %2054 = vmatpush1.bf16.msra.mxu1 %v6285_v9  ;;  %v5011_v9 = vld [vmem:[#allocation3 + $0xc] ss:$16 sps:$4 sm:$0xff]  }
 0x522   :  { %2014 = vmatprep.subr.bf16.mxu0 %v6286_v32  ;;  %2055 = vmatprep.subr.bf16.mxu1 %v6287_v37  ;;  %6295 = vst [vmem:[#allocation21_spill] sm:$0xff] %v5011_v9 }
 0x525   :  { %2015 = vmatpush1.bf16.msra.mxu0 %v6288_v18  ;;  %2056 = vmatpush1.bf16.msra.mxu1 %v6289_v11 }
 0x526   :  { %2016 = vmatprep.subr.bf16.mxu0 %v6290_v54  ;;  %2057 = vmatprep.subr.bf16.mxu1 %v6291_v52  ;;  %v5017_v54 = vld [vmem:[%s5635_s5] sm:$0xff] }
 0x527   :  { %6296 = vst [vmem:[#allocation22_spill] sm:$0xff] %v5017_v54 }
 0x529   :  { %2017 = vmatpush1.bf16.msra.mxu0 %v6292_v23  ;;  %2058 = vmatpush1.bf16.msra.mxu1 %v6293_v27  ;;  %v5023_v27 = vld [vmem:[%s5635_s5 + $0x8] sm:$0xff] }
 0x52a   :  { %2096 = vmatprep.subr.bf16.mxu0 %v5008_v28  ;;  %2137 = vmatprep.subr.bf16.mxu1 %v5011_v9  ;;  %6297 = vst [vmem:[#allocation23_spill] sm:$0xff] %v5023_v27 }
 0x59f   :  { %v1798_v37 = vpop.f32.mrb[44].mxu0  ;;  %v1839_v18 = vpop.f32.mrb[44].mxu1 }
 0x5a0   :  { %v1799_v52 = vadd.f32 %v5017_v54, %v1798_v37  ;;  %v1800_v23 = vpop.f32.mrb[45].mxu0  ;;  %v1841_v11 = vpop.f32.mrb[45].mxu1  ;;  %v5029_v37 = vld [vmem:[%s5635_s5 + $0x18] sm:$0xff] }
 0x5a1   :  { %v1801_v28 = vadd.f32 %v5023_v27, %v1800_v23  ;;  %v1802_v32 = vpop.f32.mrb[46].mxu0  ;;  %v1843_v9 = vpop.f32.mrb[46].mxu1  ;;  %6298 = vst [vmem:[#allocation24_spill] sm:$0xff] %v5029_v37  ;;  %v1842_v54 = vadd.f32 %v5029_v37, %v1841_v11  ;;  %v5035_v23 = vld [vmem:[%s5635_s5 + $0x10] sm:$0xff] }
 0x5a2   :  { %v3005_v22 = vmul.f32 -1.442695, %v1799_v52  ;;  %v1803_v21 = vpop.f32.mrb[47].mxu0  ;;  %v1844_v51 = vpop.f32.mrb[47].mxu1  ;;  %6299 = vst [vmem:[#allocation25_spill] sm:$0xff] %v5035_v23  ;;  %v1840_v52 = vadd.f32 %v5035_v23, %v1839_v18  ;;  %v6300_v18 = vld [vmem:[#allocation80_spill] sm:$0xff] }
 0x5a3   :  { %v3006_v16 = vmul.f32 -1.442695, %v1801_v28  ;;  %v3007_v48 = vmul.f32 -1.442695, %v1842_v54 }
 0x5a4   :  { %3377 = vpow2.f32 %v3005_v22 }
 0x5a5   :  { %3379 = vpow2.f32 %v3006_v16 }
 0x5a6   :  { %3381 = vpow2.f32 %v3007_v48  ;;  %v6301_v48 = vld [vmem:[#allocation81_spill] sm:$0xff] }
 0x5a7   :  { %3383 = vtanh.f32 %v1840_v52 }
 0x5ae   :  { %v3378_v21 = vpop.eup %3377 }
 0x5af   :  { %v3380_v51 = vpop.eup %3379  ;;  %v1849_v28 = vadd.f32 1.0, %v3378_v21 }
 0x5b0   :  { %v1855_v16 = vadd.f32 1.0, %v3380_v51  ;;  %v3382_v22 = vpop.eup %3381 }
 0x5b1   :  { %3385 = vrcp.f32 %v1849_v28  ;;  %v3384_v9 = vpop.eup %3383  ;;  %v1862_v37 = vadd.f32 1.0, %v3382_v22 }
 0x5b2   :  { %3387 = vrcp.f32 %v1855_v16  ;;  %v6302_v16 = vld [vmem:[#allocation82_spill] sm:$0xff] }
 0x5b3   :  { %3389 = vrcp.f32 %v1862_v37 }
 0x5bb   :  { %v3386_v32 = vpop.eup %3385 }
 0x5bc   :  { %v3388_v11 = vpop.eup %3387  ;;  %v1866_v54 = vmul.f32 %v3386_v32, %v3384_v9 }
 0x5bd   :  { %v1865_v27 = vmul.f32 %v3388_v11, %v4901_v14  ;;  %v3390_v37 = vpop.eup %3389 }
 0x5bf   :  { %v1908_v12 = vpop.f32.mrb[48].mxu0  ;;  %v1949_v3 = vpop.f32.mrb[48].mxu1  ;;  %v5039_v53 = vadd.f32 %v1866_v54, %v1865_v27 }
 0x5c0   :  { %v1956_v21 = vadd.f32 %v1908_v12, %v6300_v18  ;;  %v1958_v52 = vadd.f32 %v1949_v3, %v6301_v48  ;;  %v1910_v51 = vpop.f32.mrb[49].mxu0  ;;  %v1951_v28 = vpop.f32.mrb[49].mxu1 }
 0x5c1   :  { %v1957_v23 = vadd.f32 %v1910_v51, %v6302_v16  ;;  %v1959_v13 = vadd.f32 %v1951_v28, %v6303_v8  ;;  %v1912_v38 = vpop.f32.mrb[50].mxu0  ;;  %v1953_v9 = vpop.f32.mrb[50].mxu1  ;;  %3391 = vtanh.f32 %v5039_v53 }
 0x5c2   :  { %v3008_v14 = vmul.f32 -1.442695, %v1956_v21  ;;  %v1913_v22 = vpop.f32.mrb[51].mxu0  ;;  %v1954_v32 = vpop.f32.mrb[51].mxu1 }
 0x5c3   :  { %v3009_v27 = vmul.f32 -1.442695, %v1957_v23  ;;  %v3010_v11 = vmul.f32 -1.442695, %v1959_v13 }
 0x5c4   :  { %3393 = vpow2.f32 %v3008_v14 }
 0x5c5   :  { %3395 = vpow2.f32 %v3009_v27 }
 0x5c6   :  { %3397 = vpow2.f32 %v3010_v11  ;;  %v5063_v11 = vld [vmem:[#allocation3 + $0x2c] ss:$16 sps:$4 sm:$0xff]  }
 0x5c7   :  { %3399 = vtanh.f32 %v1958_v52 }
 0x5cb   :  { %v3392_v12 = vpop.eup %3391 }
 0x5cc   :  { %v1869_v3 = vmul.f32 %v3392_v12, %v3390_v37  ;;  %v5054_v37 = vld [vmem:[#allocation3] ss:$16 sps:$4 sm:$0xff]   ;;  %v5057_v12 = vld [vmem:[#allocation3 + $0x8] ss:$16 sps:$4 sm:$0xff]  }
 0x5ce   :  { %v3394_v54 = vpop.eup %3393  ;;  %v1985_v18 = vpack.c.bf16 %v1869_v3, %v1869_v3  ;;  %v5068_v3 = vld [vmem:[#allocation3 + $0x20] ss:$16 sps:$4 sm:$0xff]  }
 0x5cf   :  { %v3396_v48 = vpop.eup %3395  ;;  %v1963_v51 = vadd.f32 1.0, %v3394_v54  ;;  %v5071_v54 = vld [vmem:[#allocation3 + $0x28] ss:$16 sps:$4 sm:$0xff]  }
 0x5d0   :  { %v1969_v38 = vadd.f32 1.0, %v3396_v48  ;;  %2018 = vmatprep.mubr.bf16.mxu0 %v1985_v18  ;;  %2059 = vmatprep.mubr.bf16.mxu1 %v1985_v18  ;;  %v3398_v8 = vpop.eup %3397  ;;  %v5074_v18 = vld [vmem:[#allocation3 + $0x44] ss:$16 sps:$4 sm:$0xff]   ;;  %v5077_v48 = vld [vmem:[#allocation3 + $0x4c] ss:$16 sps:$4 sm:$0xff]  }
 0x5d1   :  { %3401 = vrcp.f32 %v1963_v51  ;;  %v3400_v21 = vpop.eup %3399  ;;  %v1976_v9 = vadd.f32 1.0, %v3398_v8  ;;  %v5080_v51 = vld [vmem:[#allocation3 + $0x40] ss:$16 sps:$4 sm:$0xff]   ;;  %v5086_v8 = vld [vmem:[#allocation3 + $0x64] ss:$16 sps:$4 sm:$0xff]  }
 0x5d2   :  { %3403 = vrcp.f32 %v1969_v38  ;;  %v5083_v38 = vld [vmem:[#allocation3 + $0x48] ss:$16 sps:$4 sm:$0xff]  }
 0x5d3   :  { %3405 = vrcp.f32 %v1976_v9  ;;  %v5101_v9 = vld [vmem:[#allocation3 + $0x8c] ss:$16 sps:$4 sm:$0xff]  }
 0x5d4   :  { %6305 = vst [vmem:[#allocation27_spill] sm:$0xff] %v5101_v9 }
 0x5db   :  { %v3402_v23 = vpop.eup %3401 }
 0x5dc   :  { %v3404_v28 = vpop.eup %3403  ;;  %v1980_v16 = vmul.f32 %v3402_v23, %v3400_v21  ;;  %v5089_v21 = vld [vmem:[#allocation3 + $0x6c] ss:$16 sps:$4 sm:$0xff]   ;;  %v5092_v23 = vld [vmem:[#allocation3 + $0x60] ss:$16 sps:$4 sm:$0xff]  }
 0x5dd   :  { %v1979_v13 = vmul.f32 %v3404_v28, %v4909_v19  ;;  %v3406_v22 = vpop.eup %3405  ;;  %v5060_v19 = vld [vmem:[#allocation3 + $0x24] ss:$16 sps:$4 sm:$0xff]   ;;  %v5095_v28 = vld [vmem:[#allocation3 + $0x68] ss:$16 sps:$4 sm:$0xff]  }
 0x5df   :  { %v5047_v14 = vadd.f32 %v1980_v16, %v1979_v13  ;;  %v5098_v16 = vld [vmem:[#allocation3 + $0x84] ss:$16 sps:$4 sm:$0xff]   ;;  %v5104_v13 = vld [vmem:[#allocation3 + $0x80] ss:$16 sps:$4 sm:$0xff]  }
 0x5e0   :  { %6304 = vst [vmem:[#allocation26_spill] sm:$0xff] %v5098_v16  ;;  %6306 = vst [vmem:[#allocation28_spill] sm:$0xff] %v5104_v13 }
 0x5e1   :  { %3407 = vtanh.f32 %v5047_v14 }
 0x5eb   :  { %v3408_v52 = vpop.eup %3407 }
 0x5ec   :  { %v1983_v32 = vmul.f32 %v3408_v52, %v3406_v22  ;;  %v5107_v22 = vld [vmem:[#allocation3 + $0x88] ss:$16 sps:$4 sm:$0xff]   ;;  %v5110_v52 = vld [vmem:[#allocation3 + $0xa4] ss:$16 sps:$4 sm:$0xff]  }
 0x5ed   :  { %6307 = vst [vmem:[#allocation76_spill] sm:$0xff] %v5107_v22  ;;  %6308 = vst [vmem:[#allocation77_spill] sm:$0xff] %v5110_v52 }
 0x5ee   :  { %v5050_v27 = vpack.c.bf16 %v1983_v32, %v1983_v32  ;;  %v5113_v32 = vld [vmem:[#allocation3 + $0xac] ss:$16 sps:$4 sm:$0xff]  }
 0x5ef   :  { %6309 = vst [vmem:[#allocation78_spill] sm:$0xff] %v5113_v32 }
 0x5f0   :  { %2019 = vmatmul.mubr.bf16.vlgmr.msra.gmra.mrb[52].mxu0 %v5050_v27  ;;  %2060 = vmatmul.mubr.bf16.vlgmr.msra.gmra.mrb[52].mxu1 %v5050_v27 }
 0x5f1   :  { %2097 = vmatpush1.bf16.msra.mxu0 %v5054_v37  ;;  %2138 = vmatpush1.bf16.msra.mxu1 %v5057_v12 }
 0x5f2   :  { %2098 = vmatprep.subr.bf16.mxu0 %v5060_v19  ;;  %2139 = vmatprep.subr.bf16.mxu1 %v5063_v11 }
 0x5f3   :  { %2128 = vmatprep.mubr.bf16.mxu0 %v6062_v0  ;;  %2169 = vmatprep.mubr.bf16.mxu1 %v6062_v0 }
 0x5f5   :  { %2099 = vmatpush1.bf16.msra.mxu0 %v5068_v3  ;;  %2140 = vmatpush1.bf16.msra.mxu1 %v5071_v54 }
 0x5f6   :  { %2100 = vmatprep.subr.bf16.mxu0 %v5074_v18  ;;  %2141 = vmatprep.subr.bf16.mxu1 %v5077_v48 }
 0x5f9   :  { %2101 = vmatpush1.bf16.msra.mxu0 %v5080_v51  ;;  %2142 = vmatpush1.bf16.msra.mxu1 %v5083_v38 }
 0x5fa   :  { %2102 = vmatprep.subr.bf16.mxu0 %v5086_v8  ;;  %2143 = vmatprep.subr.bf16.mxu1 %v5089_v21 }
 0x5fd   :  { %2103 = vmatpush1.bf16.msra.mxu0 %v5092_v23  ;;  %2144 = vmatpush1.bf16.msra.mxu1 %v5095_v28 }
 0x5fe   :  { %2104 = vmatprep.subr.bf16.mxu0 %v5098_v16  ;;  %2145 = vmatprep.subr.bf16.mxu1 %v5101_v9  ;;  %v5116_v16 = vld [vmem:[#allocation3 + $0xa0] ss:$16 sps:$4 sm:$0xff]   ;;  %v5119_v9 = vld [vmem:[#allocation3 + $0xa8] ss:$16 sps:$4 sm:$0xff]  }
 0x5ff   :  { %6310 = vst [vmem:[#allocation79_spill] sm:$0xff] %v5116_v16  ;;  %6311 = vst [vmem:[#allocation29_spill] sm:$0xff] %v5119_v9 }
 0x601   :  { %2105 = vmatpush1.bf16.msra.mxu0 %v5104_v13  ;;  %2146 = vmatpush1.bf16.msra.mxu1 %v5107_v22  ;;  %v5122_v13 = vld [vmem:[#allocation3 + $0xc4] ss:$16 sps:$4 sm:$0xff]   ;;  %v5125_v22 = vld [vmem:[#allocation3 + $0xcc] ss:$16 sps:$4 sm:$0xff]  }
 0x602   :  { %2106 = vmatprep.subr.bf16.mxu0 %v5110_v52  ;;  %2147 = vmatprep.subr.bf16.mxu1 %v5113_v32  ;;  %6312 = vst [vmem:[#allocation30_spill] sm:$0xff] %v5122_v13  ;;  %6313 = vst [vmem:[#allocation31_spill] sm:$0xff] %v5125_v22  ;;  %v5128_v52 = vld [vmem:[#allocation3 + $0xc0] ss:$16 sps:$4 sm:$0xff]   ;;  %v5131_v32 = vld [vmem:[#allocation3 + $0xc8] ss:$16 sps:$4 sm:$0xff]  }
 0x605   :  { %2107 = vmatpush1.bf16.msra.mxu0 %v5116_v16  ;;  %2148 = vmatpush1.bf16.msra.mxu1 %v5119_v9  ;;  %v5134_v16 = vld [vmem:[#allocation3 + $0xe4] ss:$16 sps:$4 sm:$0xff]   ;;  %v5137_v9 = vld [vmem:[#allocation3 + $0xec] ss:$16 sps:$4 sm:$0xff]  }
 0x606   :  { %2108 = vmatprep.subr.bf16.mxu0 %v5122_v13  ;;  %2149 = vmatprep.subr.bf16.mxu1 %v5125_v22  ;;  %v5140_v13 = vld [vmem:[#allocation3 + $0xe0] ss:$16 sps:$4 sm:$0xff]   ;;  %v5143_v22 = vld [vmem:[#allocation3 + $0xe8] ss:$16 sps:$4 sm:$0xff]  }
 0x609   :  { %2109 = vmatpush1.bf16.msra.mxu0 %v5128_v52  ;;  %2150 = vmatpush1.bf16.msra.mxu1 %v5131_v32 }
 0x60a   :  { %2110 = vmatprep.subr.bf16.mxu0 %v5134_v16  ;;  %2151 = vmatprep.subr.bf16.mxu1 %v5137_v9 }
 0x60d   :  { %2111 = vmatpush1.bf16.msra.mxu0 %v5140_v13  ;;  %2152 = vmatpush1.bf16.msra.mxu1 %v5143_v22 }
 0x60e   :  { %2208 = vmatprep.subr.bf16.mxu0 %v4702_v39  ;;  %2249 = vmatprep.subr.bf16.mxu1 %v4705_v41  ;;  %v6314_v39 = vld [vmem:[#allocation55_spill] sm:$0xff]  ;;  %v6315_v41 = vld [vmem:[#allocation56_spill] sm:$0xff] }
 0x610   :  { %2129 = vmatmul.mubr.bf16.vlgmr.msra.gmra.mrb[56].mxu0 %v5050_v27  ;;  %2170 = vmatmul.mubr.bf16.vlgmr.msra.gmra.mrb[56].mxu1 %v5050_v27  ;;  %v6342_v27 = vld [vmem:[#allocation24_spill] sm:$0xff] }
 0x611   :  { %2209 = vmatpush1.bf16.msra.mxu0 %v4708_v42  ;;  %2250 = vmatpush1.bf16.msra.mxu1 %v4711_v43  ;;  %v6316_v42 = vld [vmem:[#allocation57_spill] sm:$0xff]  ;;  %v6317_v43 = vld [vmem:[#allocation58_spill] sm:$0xff] }
 0x612   :  { %2210 = vmatprep.subr.bf16.mxu0 %v4714_v44  ;;  %2251 = vmatprep.subr.bf16.mxu1 %v4717_v5  ;;  %v6318_v44 = vld [vmem:[#allocation59_spill] sm:$0xff]  ;;  %v6319_v5 = vld [vmem:[#allocation60_spill] sm:$0xff] }
 0x615   :  { %2211 = vmatpush1.bf16.msra.mxu0 %v4720_v46  ;;  %2252 = vmatpush1.bf16.msra.mxu1 %v4723_v47  ;;  %v6320_v46 = vld [vmem:[#allocation61_spill] sm:$0xff]  ;;  %v6321_v47 = vld [vmem:[#allocation62_spill] sm:$0xff] }
 0x616   :  { %2212 = vmatprep.subr.bf16.mxu0 %v4726_v49  ;;  %2253 = vmatprep.subr.bf16.mxu1 %v4729_v50  ;;  %v6322_v49 = vld [vmem:[#allocation63_spill] sm:$0xff]  ;;  %v6323_v50 = vld [vmem:[#allocation64_spill] sm:$0xff] }
 0x619   :  { %2213 = vmatpush1.bf16.msra.mxu0 %v6240_v59  ;;  %2254 = vmatpush1.bf16.msra.mxu1 %v6241_v35  ;;  %v6324_v59 = vld [vmem:[#allocation65_spill] sm:$0xff]  ;;  %v6325_v35 = vld [vmem:[#allocation66_spill] sm:$0xff] }
 0x61a   :  { %2214 = vmatprep.subr.bf16.mxu0 %v6242_v61  ;;  %2255 = vmatprep.subr.bf16.mxu1 %v6243_v56  ;;  %v6326_v61 = vld [vmem:[#allocation67_spill] sm:$0xff]  ;;  %v6327_v56 = vld [vmem:[#allocation13_spill] sm:$0xff] }
 0x61d   :  { %2215 = vmatpush1.bf16.msra.mxu0 %v6244_v63  ;;  %2256 = vmatpush1.bf16.msra.mxu1 %v6245_v57  ;;  %v6328_v63 = vld [vmem:[#allocation14_spill] sm:$0xff]  ;;  %v6329_v57 = vld [vmem:[#allocation15_spill] sm:$0xff] }
 0x61e   :  { %2216 = vmatprep.subr.bf16.mxu0 %v6246_v45  ;;  %2257 = vmatprep.subr.bf16.mxu1 %v6247_v40  ;;  %v6330_v45 = vld [vmem:[#allocation16_spill] sm:$0xff]  ;;  %v6331_v40 = vld [vmem:[#allocation17_spill] sm:$0xff] }
 0x621   :  { %2217 = vmatpush1.bf16.msra.mxu0 %v6248_v60  ;;  %2258 = vmatpush1.bf16.msra.mxu1 %v6249_v2  ;;  %v6332_v60 = vld [vmem:[#allocation18_spill] sm:$0xff]  ;;  %v6333_v2 = vld [vmem:[#allocation19_spill] sm:$0xff] }
 0x622   :  { %2218 = vmatprep.subr.bf16.mxu0 %v6250_v10  ;;  %2259 = vmatprep.subr.bf16.mxu1 %v6251_v62  ;;  %v6334_v10 = vld [vmem:[#allocation72_spill] sm:$0xff]  ;;  %v6335_v62 = vld [vmem:[#allocation73_spill] sm:$0xff] }
 0x625   :  { %2219 = vmatpush1.bf16.msra.mxu0 %v6252_v58  ;;  %2260 = vmatpush1.bf16.msra.mxu1 %v6253_v6  ;;  %v6336_v58 = vld [vmem:[#allocation74_spill] sm:$0xff]  ;;  %v6337_v6 = vld [vmem:[#allocation75_spill] sm:$0xff] }
 0x626   :  { %2220 = vmatprep.subr.bf16.mxu0 %v6254_v4  ;;  %2261 = vmatprep.subr.bf16.mxu1 %v6255_v7  ;;  %v6338_v4 = vld [vmem:[#allocation20_spill] sm:$0xff]  ;;  %v6339_v7 = vld [vmem:[#allocation21_spill] sm:$0xff] }
 0x629   :  { %2221 = vmatpush1.bf16.msra.mxu0 %v6256_v30  ;;  %2262 = vmatpush1.bf16.msra.mxu1 %v6257_v1 }
 0x62a   :  { %2222 = vmatprep.subr.bf16.mxu0 %v6258_v20  ;;  %2263 = vmatprep.subr.bf16.mxu1 %v6259_v25  ;;  %v6340_v20 = vld [vmem:[#allocation22_spill] sm:$0xff] }
 0x62d   :  { %2223 = vmatpush1.bf16.msra.mxu0 %v6260_v15  ;;  %2264 = vmatpush1.bf16.msra.mxu1 %v6261_v17 }
 0x62e   :  { %2224 = vmatprep.subr.bf16.mxu0 %v6262_v55  ;;  %2265 = vmatprep.subr.bf16.mxu1 %v6263_v24  ;;  %v6341_v55 = vld [vmem:[#allocation23_spill] sm:$0xff] }
 0x631   :  { %2225 = vmatpush1.bf16.msra.mxu0 %v6264_v26  ;;  %2266 = vmatpush1.bf16.msra.mxu1 %v6265_v29 }
 0x632   :  { %2226 = vmatprep.subr.bf16.mxu0 %v6266_v31  ;;  %2267 = vmatprep.subr.bf16.mxu1 %v6267_v33 }
 0x635   :  { %2227 = vmatpush1.bf16.msra.mxu0 %v6268_v34  ;;  %2268 = vmatpush1.bf16.msra.mxu1 %v6269_v36 }
 0x636   :  { %2228 = vmatprep.subr.bf16.mxu0 %v6314_v39  ;;  %2269 = vmatprep.subr.bf16.mxu1 %v6315_v41 }
 0x639   :  { %2229 = vmatpush1.bf16.msra.mxu0 %v6316_v42  ;;  %2270 = vmatpush1.bf16.msra.mxu1 %v6317_v43  ;;  %v6343_v42 = vld [vmem:[#allocation25_spill] sm:$0xff] }
 0x63a   :  { %2230 = vmatprep.subr.bf16.mxu0 %v6318_v44  ;;  %2271 = vmatprep.subr.bf16.mxu1 %v6319_v5 }
 0x63d   :  { %2231 = vmatpush1.bf16.msra.mxu0 %v6320_v46  ;;  %2272 = vmatpush1.bf16.msra.mxu1 %v6321_v47 }
 0x63e   :  { %2232 = vmatprep.subr.bf16.mxu0 %v6322_v49  ;;  %2273 = vmatprep.subr.bf16.mxu1 %v6323_v50 }
 0x641   :  { %2233 = vmatpush1.bf16.msra.mxu0 %v6324_v59  ;;  %2274 = vmatpush1.bf16.msra.mxu1 %v6325_v35 }
 0x642   :  { %2234 = vmatprep.subr.bf16.mxu0 %v6326_v61  ;;  %2275 = vmatprep.subr.bf16.mxu1 %v6327_v56 }
 0x645   :  { %2235 = vmatpush1.bf16.msra.mxu0 %v6328_v63  ;;  %2276 = vmatpush1.bf16.msra.mxu1 %v6329_v57 }
 0x646   :  { %2236 = vmatprep.subr.bf16.mxu0 %v6330_v45  ;;  %2277 = vmatprep.subr.bf16.mxu1 %v6331_v40 }
 0x649   :  { %2237 = vmatpush1.bf16.msra.mxu0 %v6332_v60  ;;  %2278 = vmatpush1.bf16.msra.mxu1 %v6333_v2  ;;  %v6344_v60 = vld [vmem:[#allocation84_spill] sm:$0xff] }
 0x64a   :  { %2238 = vmatprep.subr.bf16.mxu0 %v6334_v10  ;;  %2279 = vmatprep.subr.bf16.mxu1 %v6335_v62  ;;  %v6345_v10 = vld [vmem:[#allocation85_spill] sm:$0xff] }
 0x64d   :  { %2239 = vmatpush1.bf16.msra.mxu0 %v6336_v58  ;;  %2280 = vmatpush1.bf16.msra.mxu1 %v6337_v6 }
 0x64e   :  { %2318 = vmatprep.subr.bf16.mxu0 %v6338_v4  ;;  %2359 = vmatprep.subr.bf16.mxu1 %v6339_v7 }
 0x6c3   :  { %v2020_v30 = vpop.f32.mrb[52].mxu0  ;;  %v2061_v1 = vpop.f32.mrb[52].mxu1 }
 0x6c4   :  { %v2021_v25 = vadd.f32 %v6340_v20, %v2020_v30  ;;  %v2022_v15 = vpop.f32.mrb[53].mxu0  ;;  %v2063_v17 = vpop.f32.mrb[53].mxu1  ;;  %v2062_v43 = vadd.f32 %v6343_v42, %v2061_v1  ;;  %v6346_v30 = vld [vmem:[#allocation86_spill] sm:$0xff] }
 0x6c5   :  { %v2023_v24 = vadd.f32 %v6341_v55, %v2022_v15  ;;  %v2024_v26 = vpop.f32.mrb[54].mxu0  ;;  %v2065_v29 = vpop.f32.mrb[54].mxu1  ;;  %v2064_v39 = vadd.f32 %v6342_v27, %v2063_v17 }
 0x6c6   :  { %v3011_v31 = vmul.f32 -1.442695, %v2021_v25  ;;  %v2025_v33 = vpop.f32.mrb[55].mxu0  ;;  %v2066_v34 = vpop.f32.mrb[55].mxu1  ;;  %v6347_v25 = vld [vmem:[#allocation87_spill] sm:$0xff] }
 0x6c7   :  { %v3012_v36 = vmul.f32 -1.442695, %v2023_v24  ;;  %v3013_v41 = vmul.f32 -1.442695, %v2064_v39 }
 0x6c8   :  { %3409 = vpow2.f32 %v3011_v31 }
 0x6c9   :  { %3411 = vpow2.f32 %v3012_v36 }
 0x6ca   :  { %3413 = vpow2.f32 %v3013_v41 }
 0x6cb   :  { %3415 = vtanh.f32 %v2062_v43 }
 0x6d2   :  { %v3410_v44 = vpop.eup %3409 }
 0x6d3   :  { %v3412_v5 = vpop.eup %3411  ;;  %v2071_v46 = vadd.f32 1.0, %v3410_v44 }
 0x6d4   :  { %v2077_v47 = vadd.f32 1.0, %v3412_v5  ;;  %v3414_v49 = vpop.eup %3413 }
 0x6d5   :  { %3417 = vrcp.f32 %v2071_v46  ;;  %v3416_v50 = vpop.eup %3415  ;;  %v2084_v56 = vadd.f32 1.0, %v3414_v49 }
 0x6d6   :  { %3419 = vrcp.f32 %v2077_v47 }
 0x6d7   :  { %3421 = vrcp.f32 %v2084_v56 }
 0x6df   :  { %v3418_v59 = vpop.eup %3417 }
 0x6e0   :  { %v3420_v35 = vpop.eup %3419  ;;  %v2088_v61 = vmul.f32 %v3418_v59, %v3416_v50 }
 0x6e1   :  { %v2087_v63 = vmul.f32 %v3420_v35, %v5039_v53  ;;  %v3422_v33 = vpop.eup %3421 }
 0x6e3   :  { %v2130_v57 = vpop.f32.mrb[56].mxu0  ;;  %v2171_v45 = vpop.f32.mrb[56].mxu1  ;;  %v5219_v40 = vadd.f32 %v2088_v61, %v2087_v63 }
 0x6e4   :  { %v2178_v2 = vadd.f32 %v2130_v57, %v6344_v60  ;;  %v2180_v62 = vadd.f32 %v2171_v45, %v6345_v10  ;;  %v2132_v58 = vpop.f32.mrb[57].mxu0  ;;  %v2173_v6 = vpop.f32.mrb[57].mxu1  ;;  %v6349_v10 = vld [vmem:[#allocation27_spill] sm:$0xff] }
 0x6e5   :  { %v2179_v1 = vadd.f32 %v2132_v58, %v6346_v30  ;;  %v2181_v15 = vadd.f32 %v2173_v6, %v6347_v25  ;;  %v2134_v17 = vpop.f32.mrb[58].mxu0  ;;  %v2175_v24 = vpop.f32.mrb[58].mxu1  ;;  %3423 = vtanh.f32 %v5219_v40  ;;  %v6351_v58 = vld [vmem:[#allocation76_spill] sm:$0xff]  ;;  %v6352_v6 = vld [vmem:[#allocation77_spill] sm:$0xff]  ;;  %v6353_v30 = vld [vmem:[#allocation78_spill] sm:$0xff] }
 0x6e6   :  { %v3014_v53 = vmul.f32 -1.442695, %v2178_v2  ;;  %v2135_v26 = vpop.f32.mrb[59].mxu0  ;;  %v2176_v29 = vpop.f32.mrb[59].mxu1  ;;  %v6355_v25 = vld [vmem:[#allocation29_spill] sm:$0xff]  ;;  %v6357_v17 = vld [vmem:[#allocation31_spill] sm:$0xff] }
 0x6e7   :  { %v3015_v31 = vmul.f32 -1.442695, %v2179_v1  ;;  %v3016_v36 = vmul.f32 -1.442695, %v2181_v15  ;;  %v6354_v1 = vld [vmem:[#allocation79_spill] sm:$0xff]  ;;  %v6356_v15 = vld [vmem:[#allocation30_spill] sm:$0xff] }
 0x6e8   :  { %3425 = vpow2.f32 %v3014_v53  ;;  %v5262_v24 = vld [vmem:[#allocation6 + $0x4] ss:$16 sps:$4 sm:$0xff]   ;;  %v5265_v53 = vld [vmem:[#allocation6 + $0xc] ss:$16 sps:$4 sm:$0xff]   ;;  %v5268_v26 = vld [vmem:[#allocation6] ss:$16 sps:$4 sm:$0xff]  }
 0x6e9   :  { %3427 = vpow2.f32 %v3015_v31  ;;  %v5271_v29 = vld [vmem:[#allocation6 + $0x8] ss:$16 sps:$4 sm:$0xff]   ;;  %v5274_v31 = vld [vmem:[#allocation6 + $0x24] ss:$16 sps:$4 sm:$0xff]  }
 0x6ea   :  { %3429 = vpow2.f32 %v3016_v36  ;;  %v5283_v36 = vld [vmem:[#allocation6 + $0x28] ss:$16 sps:$4 sm:$0xff]  }
 0x6eb   :  { %3431 = vtanh.f32 %v2180_v62  ;;  %v6350_v62 = vld [vmem:[#allocation28_spill] sm:$0xff] }
 0x6ef   :  { %v3424_v34 = vpop.eup %3423 }
 0x6f0   :  { %v2091_v39 = vmul.f32 %v3424_v34, %v3422_v33  ;;  %v5277_v33 = vld [vmem:[#allocation6 + $0x2c] ss:$16 sps:$4 sm:$0xff]   ;;  %v5280_v34 = vld [vmem:[#allocation6 + $0x20] ss:$16 sps:$4 sm:$0xff]  }
 0x6f2   :  { %v3426_v41 = vpop.eup %3425  ;;  %v2207_v43 = vpack.c.bf16 %v2091_v39, %v2091_v39  ;;  %v5286_v39 = vld [vmem:[#allocation6 + $0x44] ss:$16 sps:$4 sm:$0xff]  }
 0x6f3   :  { %v3428_v44 = vpop.eup %3427  ;;  %v2185_v5 = vadd.f32 1.0, %v3426_v41  ;;  %v5289_v41 = vld [vmem:[#allocation6 + $0x4c] ss:$16 sps:$4 sm:$0xff]  }
 0x6f4   :  { %v2191_v46 = vadd.f32 1.0, %v3428_v44  ;;  %2240 = vmatprep.mubr.bf16.mxu0 %v2207_v43  ;;  %2281 = vmatprep.mubr.bf16.mxu1 %v2207_v43  ;;  %v3430_v47 = vpop.eup %3429  ;;  %v5292_v43 = vld [vmem:[#allocation6 + $0x40] ss:$16 sps:$4 sm:$0xff]   ;;  %v5295_v44 = vld [vmem:[#allocation6 + $0x48] ss:$16 sps:$4 sm:$0xff]  }
 0x6f5   :  { %3433 = vrcp.f32 %v2185_v5  ;;  %v3432_v49 = vpop.eup %3431  ;;  %v2198_v61 = vadd.f32 1.0, %v3430_v47  ;;  %6358 = vst [vmem:[#allocation32_spill] sm:$0xff] %v5292_v43  ;;  %6359 = vst [vmem:[#allocation33_spill] sm:$0xff] %v5295_v44  ;;  %v5298_v5 = vld [vmem:[#allocation6 + $0x64] ss:$16 sps:$4 sm:$0xff]  }
 0x6f6   :  { %3435 = vrcp.f32 %v2191_v46  ;;  %6360 = vst [vmem:[#allocation34_spill] sm:$0xff] %v5298_v5  ;;  %v5301_v46 = vld [vmem:[#allocation6 + $0x6c] ss:$16 sps:$4 sm:$0xff]   ;;  %v5304_v47 = vld [vmem:[#allocation6 + $0x60] ss:$16 sps:$4 sm:$0xff]  }
 0x6f7   :  { %3437 = vrcp.f32 %v2198_v61  ;;  %6361 = vst [vmem:[#allocation35_spill] sm:$0xff] %v5301_v46  ;;  %6362 = vst [vmem:[#allocation36_spill] sm:$0xff] %v5304_v47  ;;  %v5319_v61 = vld [vmem:[#allocation6 + $0x88] ss:$16 sps:$4 sm:$0xff]  }
 0x6f8   :  { %6367 = vst [vmem:[#allocation41_spill] sm:$0xff] %v5319_v61 }
 0x6ff   :  { %v3434_v50 = vpop.eup %3433 }
 0x700   :  { %v3436_v59 = vpop.eup %3435  ;;  %v2202_v35 = vmul.f32 %v3434_v50, %v3432_v49  ;;  %v5307_v49 = vld [vmem:[#allocation6 + $0x68] ss:$16 sps:$4 sm:$0xff]   ;;  %v5310_v50 = vld [vmem:[#allocation6 + $0x84] ss:$16 sps:$4 sm:$0xff]  }
 0x701   :  { %v2201_v56 = vmul.f32 %v3436_v59, %v5047_v14  ;;  %v3438_v57 = vpop.eup %3437  ;;  %v6348_v14 = vld [vmem:[#allocation26_spill] sm:$0xff]  ;;  %6363 = vst [vmem:[#allocation37_spill] sm:$0xff] %v5307_v49  ;;  %6364 = vst [vmem:[#allocation38_spill] sm:$0xff] %v5310_v50  ;;  %v5313_v59 = vld [vmem:[#allocation6 + $0x8c] ss:$16 sps:$4 sm:$0xff]  }
 0x702   :  { %6365 = vst [vmem:[#allocation39_spill] sm:$0xff] %v5313_v59 }
 0x703   :  { %v5227_v63 = vadd.f32 %v2202_v35, %v2201_v56  ;;  %v5316_v35 = vld [vmem:[#allocation6 + $0x80] ss:$16 sps:$4 sm:$0xff]   ;;  %v5322_v56 = vld [vmem:[#allocation6 + $0xa4] ss:$16 sps:$4 sm:$0xff]  }
 0x704   :  { %6366 = vst [vmem:[#allocation40_spill] sm:$0xff] %v5316_v35  ;;  %6368 = vst [vmem:[#allocation42_spill] sm:$0xff] %v5322_v56 }
 0x705   :  { %3439 = vtanh.f32 %v5227_v63 }
 0x70f   :  { %v3440_v45 = vpop.eup %3439 }
 0x710   :  { %v2205_v60 = vmul.f32 %v3440_v45, %v3438_v57  ;;  %v5325_v57 = vld [vmem:[#allocation6 + $0xac] ss:$16 sps:$4 sm:$0xff]   ;;  %v5328_v45 = vld [vmem:[#allocation6 + $0xa0] ss:$16 sps:$4 sm:$0xff]  }
 0x711   :  { %6369 = vst [vmem:[#allocation43_spill] sm:$0xff] %v5325_v57  ;;  %6370 = vst [vmem:[#allocation68_spill] sm:$0xff] %v5328_v45 }
 0x712   :  { %v2206_v2 = vpack.c.bf16 %v2205_v60, %v2205_v60  ;;  %v5331_v60 = vld [vmem:[#allocation6 + $0xa8] ss:$16 sps:$4 sm:$0xff]  }
 0x713   :  { %6371 = vst [vmem:[#allocation69_spill] sm:$0xff] %v5331_v60 }
 0x714   :  { %2241 = vmatmul.mubr.bf16.vlgmr.msra.gmra.mrb[60].mxu0 %v2206_v2  ;;  %2282 = vmatmul.mubr.bf16.vlgmr.msra.gmra.mrb[60].mxu1 %v2206_v2 }
 0x715   :  { %2319 = vmatpush1.bf16.msra.mxu0 %v5054_v37  ;;  %2360 = vmatpush1.bf16.msra.mxu1 %v5057_v12 }
 0x716   :  { %2320 = vmatprep.subr.bf16.mxu0 %v5060_v19  ;;  %2361 = vmatprep.subr.bf16.mxu1 %v5063_v11 }
 0x717   :  { %2350 = vmatprep.mubr.bf16.mxu0 %v6062_v0  ;;  %2391 = vmatprep.mubr.bf16.mxu1 %v6062_v0 }
 0x719   :  { %2321 = vmatpush1.bf16.msra.mxu0 %v5068_v3  ;;  %2362 = vmatpush1.bf16.msra.mxu1 %v5071_v54 }
 0x71a   :  { %2322 = vmatprep.subr.bf16.mxu0 %v5074_v18  ;;  %2363 = vmatprep.subr.bf16.mxu1 %v5077_v48 }
 0x71d   :  { %2323 = vmatpush1.bf16.msra.mxu0 %v5080_v51  ;;  %2364 = vmatpush1.bf16.msra.mxu1 %v5083_v38 }
 0x71e   :  { %2324 = vmatprep.subr.bf16.mxu0 %v5086_v8  ;;  %2365 = vmatprep.subr.bf16.mxu1 %v5089_v21 }
 0x721   :  { %2325 = vmatpush1.bf16.msra.mxu0 %v5092_v23  ;;  %2366 = vmatpush1.bf16.msra.mxu1 %v5095_v28 }
 0x722   :  { %2326 = vmatprep.subr.bf16.mxu0 %v6348_v14  ;;  %2367 = vmatprep.subr.bf16.mxu1 %v6349_v10 }
 0x725   :  { %2327 = vmatpush1.bf16.msra.mxu0 %v6350_v62  ;;  %2368 = vmatpush1.bf16.msra.mxu1 %v6351_v58 }
 0x726   :  { %2328 = vmatprep.subr.bf16.mxu0 %v6352_v6  ;;  %2369 = vmatprep.subr.bf16.mxu1 %v6353_v30 }
 0x729   :  { %2329 = vmatpush1.bf16.msra.mxu0 %v6354_v1  ;;  %2370 = vmatpush1.bf16.msra.mxu1 %v6355_v25 }
 0x72a   :  { %2330 = vmatprep.subr.bf16.mxu0 %v6356_v15  ;;  %2371 = vmatprep.subr.bf16.mxu1 %v6357_v17 }
 0x72d   :  { %2331 = vmatpush1.bf16.msra.mxu0 %v5128_v52  ;;  %2372 = vmatpush1.bf16.msra.mxu1 %v5131_v32 }
 0x72e   :  { %2332 = vmatprep.subr.bf16.mxu0 %v5134_v16  ;;  %2373 = vmatprep.subr.bf16.mxu1 %v5137_v9 }
 0x731   :  { %2333 = vmatpush1.bf16.msra.mxu0 %v5140_v13  ;;  %2374 = vmatpush1.bf16.msra.mxu1 %v5143_v22 }
 0x732   :  { %2430 = vmatprep.subr.bf16.mxu0 %v5262_v24  ;;  %2471 = vmatprep.subr.bf16.mxu1 %v5265_v53 }
 0x734   :  { %2351 = vmatmul.mubr.bf16.vlgmr.msra.gmra.mrb[64].mxu0 %v2206_v2  ;;  %2392 = vmatmul.mubr.bf16.vlgmr.msra.gmra.mrb[64].mxu1 %v2206_v2  ;;  %v5334_v2 = vld [vmem:[#allocation6 + $0xc4] ss:$16 sps:$4 sm:$0xff]  }
 0x735   :  { %2431 = vmatpush1.bf16.msra.mxu0 %v5268_v26  ;;  %2472 = vmatpush1.bf16.msra.mxu1 %v5271_v29  ;;  %6372 = vst [vmem:[#allocation70_spill] sm:$0xff] %v5334_v2 }
 0x736   :  { %2432 = vmatprep.subr.bf16.mxu0 %v5274_v31  ;;  %2473 = vmatprep.subr.bf16.mxu1 %v5277_v33 }
 0x739   :  { %2433 = vmatpush1.bf16.msra.mxu0 %v5280_v34  ;;  %2474 = vmatpush1.bf16.msra.mxu1 %v5283_v36 }
 0x73a   :  { %2434 = vmatprep.subr.bf16.mxu0 %v5286_v39  ;;  %2475 = vmatprep.subr.bf16.mxu1 %v5289_v41 }
 0x73d   :  { %2435 = vmatpush1.bf16.msra.mxu0 %v5292_v43  ;;  %2476 = vmatpush1.bf16.msra.mxu1 %v5295_v44 }
 0x73e   :  { %2436 = vmatprep.subr.bf16.mxu0 %v5298_v5  ;;  %2477 = vmatprep.subr.bf16.mxu1 %v5301_v46 }
 0x741   :  { %2437 = vmatpush1.bf16.msra.mxu0 %v5304_v47  ;;  %2478 = vmatpush1.bf16.msra.mxu1 %v5307_v49 }
 0x742   :  { %2438 = vmatprep.subr.bf16.mxu0 %v5310_v50  ;;  %2479 = vmatprep.subr.bf16.mxu1 %v5313_v59 }
 0x745   :  { %2439 = vmatpush1.bf16.msra.mxu0 %v5316_v35  ;;  %2480 = vmatpush1.bf16.msra.mxu1 %v5319_v61  ;;  %v5337_v61 = vld [vmem:[#allocation6 + $0xcc] ss:$16 sps:$4 sm:$0xff]  }
 0x746   :  { %2440 = vmatprep.subr.bf16.mxu0 %v5322_v56  ;;  %2481 = vmatprep.subr.bf16.mxu1 %v5325_v57  ;;  %6373 = vst [vmem:[#allocation71_spill] sm:$0xff] %v5337_v61  ;;  %v5340_v56 = vld [vmem:[#allocation6 + $0xc0] ss:$16 sps:$4 sm:$0xff]   ;;  %v5343_v57 = vld [vmem:[#allocation6 + $0xc8] ss:$16 sps:$4 sm:$0xff]  }
 0x747   :  { %6374 = vst [vmem:[#allocation44_spill] sm:$0xff] %v5340_v56  ;;  %6375 = vst [vmem:[#allocation45_spill] sm:$0xff] %v5343_v57 }
 0x749   :  { %2441 = vmatpush1.bf16.msra.mxu0 %v5328_v45  ;;  %2482 = vmatpush1.bf16.msra.mxu1 %v5331_v60  ;;  %v5346_v45 = vld [vmem:[#allocation6 + $0xe4] ss:$16 sps:$4 sm:$0xff]   ;;  %v5349_v60 = vld [vmem:[#allocation6 + $0xec] ss:$16 sps:$4 sm:$0xff]  }
 0x74a   :  { %2442 = vmatprep.subr.bf16.mxu0 %v5334_v2  ;;  %2483 = vmatprep.subr.bf16.mxu1 %v5337_v61  ;;  %6376 = vst [vmem:[#allocation46_spill] sm:$0xff] %v5346_v45  ;;  %6377 = vst [vmem:[#allocation47_spill] sm:$0xff] %v5349_v60  ;;  %v5352_v2 = vld [vmem:[#allocation6 + $0xe0] ss:$16 sps:$4 sm:$0xff]   ;;  %v5355_v61 = vld [vmem:[#allocation6 + $0xe8] ss:$16 sps:$4 sm:$0xff]  }
 0x74b   :  { %6378 = vst [vmem:[#allocation48_spill] sm:$0xff] %v5352_v2  ;;  %6379 = vst [vmem:[#allocation49_spill] sm:$0xff] %v5355_v61 }
 0x74d   :  { %2443 = vmatpush1.bf16.msra.mxu0 %v5340_v56  ;;  %2484 = vmatpush1.bf16.msra.mxu1 %v5343_v57  ;;  %v5358_v56 = vld [vmem:[#allocation6 + $0x104] ss:$16 sps:$4 sm:$0xff]   ;;  %v5361_v57 = vld [vmem:[#allocation6 + $0x10c] ss:$16 sps:$4 sm:$0xff]  }
 0x74e   :  { %2444 = vmatprep.subr.bf16.mxu0 %v5346_v45  ;;  %2485 = vmatprep.subr.bf16.mxu1 %v5349_v60  ;;  %6380 = vst [vmem:[#allocation50_spill] sm:$0xff] %v5358_v56  ;;  %6381 = vst [vmem:[#allocation51_spill] sm:$0xff] %v5361_v57  ;;  %v5364_v45 = vld [vmem:[#allocation6 + $0x100] ss:$16 sps:$4 sm:$0xff]   ;;  %v5367_v60 = vld [vmem:[#allocation6 + $0x108] ss:$16 sps:$4 sm:$0xff]  }
 0x74f   :  { %6382 = vst [vmem:[#allocation52_spill] sm:$0xff] %v5364_v45  ;;  %6383 = vst [vmem:[#allocation53_spill] sm:$0xff] %v5367_v60 }
 0x751   :  { %2445 = vmatpush1.bf16.msra.mxu0 %v5352_v2  ;;  %2486 = vmatpush1.bf16.msra.mxu1 %v5355_v61  ;;  %v5370_v2 = vld [vmem:[#allocation6 + $0x124] ss:$16 sps:$4 sm:$0xff]   ;;  %v5373_v61 = vld [vmem:[#allocation6 + $0x12c] ss:$16 sps:$4 sm:$0xff]  }
 0x752   :  { %2446 = vmatprep.subr.bf16.mxu0 %v5358_v56  ;;  %2487 = vmatprep.subr.bf16.mxu1 %v5361_v57  ;;  %6384 = vst [vmem:[#allocation54_spill] sm:$0xff] %v5370_v2  ;;  %6385 = vst [vmem:[#allocation80_spill] sm:$0xff] %v5373_v61  ;;  %v5376_v56 = vld [vmem:[#allocation6 + $0x120] ss:$16 sps:$4 sm:$0xff]   ;;  %v5379_v57 = vld [vmem:[#allocation6 + $0x128] ss:$16 sps:$4 sm:$0xff]  }
 0x753   :  { %6386 = vst [vmem:[#allocation81_spill] sm:$0xff] %v5376_v56  ;;  %6387 = vst [vmem:[#allocation82_spill] sm:$0xff] %v5379_v57 }
 0x755   :  { %2447 = vmatpush1.bf16.msra.mxu0 %v5364_v45  ;;  %2488 = vmatpush1.bf16.msra.mxu1 %v5367_v60  ;;  %v5382_v45 = vld [vmem:[#allocation6 + $0x144] ss:$16 sps:$4 sm:$0xff]   ;;  %v5385_v60 = vld [vmem:[#allocation6 + $0x14c] ss:$16 sps:$4 sm:$0xff]  }
 0x756   :  { %2448 = vmatprep.subr.bf16.mxu0 %v5370_v2  ;;  %2489 = vmatprep.subr.bf16.mxu1 %v5373_v61  ;;  %6388 = vst [vmem:[#allocation83_spill] sm:$0xff] %v5382_v45  ;;  %6389 = vst [vmem:[#allocation55_spill] sm:$0xff] %v5385_v60  ;;  %v5388_v2 = vld [vmem:[#allocation6 + $0x140] ss:$16 sps:$4 sm:$0xff]   ;;  %v5391_v61 = vld [vmem:[#allocation6 + $0x148] ss:$16 sps:$4 sm:$0xff]  }
 0x757   :  { %6390 = vst [vmem:[#allocation56_spill] sm:$0xff] %v5388_v2  ;;  %6391 = vst [vmem:[#allocation57_spill] sm:$0xff] %v5391_v61 }
 0x759   :  { %2449 = vmatpush1.bf16.msra.mxu0 %v5376_v56  ;;  %2490 = vmatpush1.bf16.msra.mxu1 %v5379_v57  ;;  %v5394_v56 = vld [vmem:[#allocation6 + $0x164] ss:$16 sps:$4 sm:$0xff]   ;;  %v5397_v57 = vld [vmem:[#allocation6 + $0x16c] ss:$16 sps:$4 sm:$0xff]  }
 0x75a   :  { %2450 = vmatprep.subr.bf16.mxu0 %v5382_v45  ;;  %2491 = vmatprep.subr.bf16.mxu1 %v5385_v60  ;;  %6392 = vst [vmem:[#allocation58_spill] sm:$0xff] %v5394_v56  ;;  %6393 = vst [vmem:[#allocation59_spill] sm:$0xff] %v5397_v57  ;;  %v5400_v45 = vld [vmem:[#allocation6 + $0x160] ss:$16 sps:$4 sm:$0xff]   ;;  %v5403_v60 = vld [vmem:[#allocation6 + $0x168] ss:$16 sps:$4 sm:$0xff]  }
 0x75b   :  { %6394 = vst [vmem:[#allocation60_spill] sm:$0xff] %v5400_v45  ;;  %6395 = vst [vmem:[#allocation61_spill] sm:$0xff] %v5403_v60 }
 0x75d   :  { %2451 = vmatpush1.bf16.msra.mxu0 %v5388_v2  ;;  %2492 = vmatpush1.bf16.msra.mxu1 %v5391_v61  ;;  %v5406_v2 = vld [vmem:[#allocation6 + $0x184] ss:$16 sps:$4 sm:$0xff]   ;;  %v5409_v61 = vld [vmem:[#allocation6 + $0x18c] ss:$16 sps:$4 sm:$0xff]  }
 0x75e   :  { %2452 = vmatprep.subr.bf16.mxu0 %v5394_v56  ;;  %2493 = vmatprep.subr.bf16.mxu1 %v5397_v57  ;;  %6396 = vst [vmem:[#allocation62_spill] sm:$0xff] %v5406_v2  ;;  %6397 = vst [vmem:[#allocation63_spill] sm:$0xff] %v5409_v61  ;;  %v5412_v56 = vld [vmem:[#allocation6 + $0x180] ss:$16 sps:$4 sm:$0xff]   ;;  %v5415_v57 = vld [vmem:[#allocation6 + $0x188] ss:$16 sps:$4 sm:$0xff]  }
 0x75f   :  { %6398 = vst [vmem:[#allocation64_spill] sm:$0xff] %v5412_v56  ;;  %6399 = vst [vmem:[#allocation65_spill] sm:$0xff] %v5415_v57 }
 0x761   :  { %2453 = vmatpush1.bf16.msra.mxu0 %v5400_v45  ;;  %2494 = vmatpush1.bf16.msra.mxu1 %v5403_v60  ;;  %v5418_v45 = vld [vmem:[#allocation6 + $0x1a4] ss:$16 sps:$4 sm:$0xff]   ;;  %v5421_v60 = vld [vmem:[#allocation6 + $0x1ac] ss:$16 sps:$4 sm:$0xff]  }
 0x762   :  { %2454 = vmatprep.subr.bf16.mxu0 %v5406_v2  ;;  %2495 = vmatprep.subr.bf16.mxu1 %v5409_v61  ;;  %6400 = vst [vmem:[#allocation66_spill] sm:$0xff] %v5418_v45  ;;  %6401 = vst [vmem:[#allocation67_spill] sm:$0xff] %v5421_v60  ;;  %v5424_v2 = vld [vmem:[#allocation6 + $0x1a0] ss:$16 sps:$4 sm:$0xff]   ;;  %v5427_v61 = vld [vmem:[#allocation6 + $0x1a8] ss:$16 sps:$4 sm:$0xff]  }
 0x763   :  { %6402 = vst [vmem:[#allocation13_spill] sm:$0xff] %v5424_v2  ;;  %6403 = vst [vmem:[#allocation14_spill] sm:$0xff] %v5427_v61 }
 0x765   :  { %2455 = vmatpush1.bf16.msra.mxu0 %v5412_v56  ;;  %2496 = vmatpush1.bf16.msra.mxu1 %v5415_v57  ;;  %v5430_v56 = vld [vmem:[#allocation6 + $0x1c4] ss:$16 sps:$4 sm:$0xff]   ;;  %v5433_v57 = vld [vmem:[#allocation6 + $0x1cc] ss:$16 sps:$4 sm:$0xff]  }
 0x766   :  { %2456 = vmatprep.subr.bf16.mxu0 %v5418_v45  ;;  %2497 = vmatprep.subr.bf16.mxu1 %v5421_v60  ;;  %6404 = vst [vmem:[#allocation15_spill] sm:$0xff] %v5430_v56  ;;  %6405 = vst [vmem:[#allocation16_spill] sm:$0xff] %v5433_v57  ;;  %v5436_v45 = vld [vmem:[#allocation6 + $0x1c0] ss:$16 sps:$4 sm:$0xff]   ;;  %v5439_v60 = vld [vmem:[#allocation6 + $0x1c8] ss:$16 sps:$4 sm:$0xff]  }
 0x767   :  { %6406 = vst [vmem:[#allocation17_spill] sm:$0xff] %v5436_v45  ;;  %6407 = vst [vmem:[#allocation18_spill] sm:$0xff] %v5439_v60 }
 0x769   :  { %2457 = vmatpush1.bf16.msra.mxu0 %v5424_v2  ;;  %2498 = vmatpush1.bf16.msra.mxu1 %v5427_v61  ;;  %v5442_v2 = vld [vmem:[#allocation6 + $0x1e4] ss:$16 sps:$4 sm:$0xff]   ;;  %v5445_v61 = vld [vmem:[#allocation6 + $0x1ec] ss:$16 sps:$4 sm:$0xff]  }
 0x76a   :  { %2458 = vmatprep.subr.bf16.mxu0 %v5430_v56  ;;  %2499 = vmatprep.subr.bf16.mxu1 %v5433_v57  ;;  %6408 = vst [vmem:[#allocation19_spill] sm:$0xff] %v5442_v2  ;;  %6409 = vst [vmem:[#allocation72_spill] sm:$0xff] %v5445_v61  ;;  %v5448_v56 = vld [vmem:[#allocation6 + $0x1e0] ss:$16 sps:$4 sm:$0xff]   ;;  %v5451_v57 = vld [vmem:[#allocation6 + $0x1e8] ss:$16 sps:$4 sm:$0xff]  }
 0x76b   :  { %6410 = vst [vmem:[#allocation73_spill] sm:$0xff] %v5448_v56  ;;  %6411 = vst [vmem:[#allocation74_spill] sm:$0xff] %v5451_v57 }
 0x76d   :  { %2459 = vmatpush1.bf16.msra.mxu0 %v5436_v45  ;;  %2500 = vmatpush1.bf16.msra.mxu1 %v5439_v60 }
 0x76e   :  { %2460 = vmatprep.subr.bf16.mxu0 %v5442_v2  ;;  %2501 = vmatprep.subr.bf16.mxu1 %v5445_v61 }
 0x771   :  { %2461 = vmatpush1.bf16.msra.mxu0 %v5448_v56  ;;  %2502 = vmatpush1.bf16.msra.mxu1 %v5451_v57 }
 0x772   :  { %2540 = vmatprep.subr.bf16.mxu0 %v6338_v4  ;;  %2581 = vmatprep.subr.bf16.mxu1 %v6339_v7 }
 0x7e7   :  { %v2242_v60 = vpop.f32.mrb[60].mxu0  ;;  %v2283_v45 = vpop.f32.mrb[60].mxu1 }
 0x7e8   :  { %v2243_v2 = vadd.f32 %v6340_v20, %v2242_v60  ;;  %v2244_v35 = vpop.f32.mrb[61].mxu0  ;;  %v2285_v59 = vpop.f32.mrb[61].mxu1  ;;  %v2284_v7 = vadd.f32 %v6343_v42, %v2283_v45  ;;  %v6412_v42 = vld [vmem:[#allocation88_spill] sm:$0xff] }
 0x7e9   :  { %v2245_v61 = vadd.f32 %v6341_v55, %v2244_v35  ;;  %v2246_v50 = vpop.f32.mrb[62].mxu0  ;;  %v2287_v49 = vpop.f32.mrb[62].mxu1  ;;  %v2286_v4 = vadd.f32 %v6342_v27, %v2285_v59 }
 0x7ea   :  { %v3017_v47 = vmul.f32 -1.442695, %v2243_v2  ;;  %v2247_v56 = vpop.f32.mrb[63].mxu0  ;;  %v2288_v46 = vpop.f32.mrb[63].mxu1  ;;  %v6414_v2 = vld [vmem:[#allocation90_spill] sm:$0xff] }
 0x7eb   :  { %v3018_v5 = vmul.f32 -1.442695, %v2245_v61  ;;  %v3019_v57 = vmul.f32 -1.442695, %v2286_v4  ;;  %v6413_v56 = vld [vmem:[#allocation89_spill] sm:$0xff] }
 0x7ec   :  { %3441 = vpow2.f32 %v3017_v47 }
 0x7ed   :  { %3443 = vpow2.f32 %v3018_v5 }
 0x7ee   :  { %3445 = vpow2.f32 %v3019_v57 }
 0x7ef   :  { %3447 = vtanh.f32 %v2284_v7  ;;  %v6415_v7 = vld [vmem:[#allocation91_spill] sm:$0xff] }
 0x7f6   :  { %v3442_v44 = vpop.eup %3441 }
 0x7f7   :  { %v3444_v43 = vpop.eup %3443  ;;  %v2293_v20 = vadd.f32 1.0, %v3442_v44 }
 0x7f8   :  { %v2299_v60 = vadd.f32 1.0, %v3444_v43  ;;  %v3446_v55 = vpop.eup %3445 }
 0x7f9   :  { %3449 = vrcp.f32 %v2293_v20  ;;  %v3448_v49 = vpop.eup %3447  ;;  %v2306_v47 = vadd.f32 1.0, %v3446_v55 }
 0x7fa   :  { %3451 = vrcp.f32 %v2299_v60 }
 0x7fb   :  { %3453 = vrcp.f32 %v2306_v47 }
 0x803   :  { %v3450_v50 = vpop.eup %3449 }
 0x804   :  { %v3452_v46 = vpop.eup %3451  ;;  %v2310_v35 = vmul.f32 %v3450_v50, %v3448_v49 }
 0x805   :  { %v2309_v5 = vmul.f32 %v3452_v46, %v5219_v40 }
 0x807   :  { %v2352_v27 = vpop.f32.mrb[64].mxu0  ;;  %v2393_v59 = vpop.f32.mrb[64].mxu1  ;;  %v5461_v61 = vadd.f32 %v2310_v35, %v2309_v5 }
 0x808   :  { %v2400_v44 = vadd.f32 %v2352_v27, %v6412_v42  ;;  %v2402_v57 = vadd.f32 %v2393_v59, %v6413_v56  ;;  %v2354_v43 = vpop.f32.mrb[65].mxu0  ;;  %v2395_v45 = vpop.f32.mrb[65].mxu1 }
 0x809   :  { %v2401_v4 = vadd.f32 %v2354_v43, %v6414_v2  ;;  %v2403_v20 = vadd.f32 %v2395_v45, %v6415_v7  ;;  %v2356_v60 = vpop.f32.mrb[66].mxu0  ;;  %v2397_v49 = vpop.f32.mrb[66].mxu1  ;;  %3455 = vtanh.f32 %v5461_v61 }
 0x80a   :  { %v3020_v40 = vmul.f32 -1.442695, %v2400_v44  ;;  %v2357_v55 = vpop.f32.mrb[67].mxu0  ;;  %v2398_v50 = vpop.f32.mrb[67].mxu1 }
 0x80b   :  { %v3021_v46 = vmul.f32 -1.442695, %v2401_v4  ;;  %v3454_v35 = vpop.eup %3453  ;;  %v3022_v5 = vmul.f32 -1.442695, %v2403_v20 }
 0x80c   :  { %3457 = vpow2.f32 %v3020_v40 }
 0x80d   :  { %3459 = vpow2.f32 %v3021_v46 }
 0x80e   :  { %3461 = vpow2.f32 %v3022_v5  ;;  %v6460_v5 = vld [vmem:[#allocation13_spill] sm:$0xff] }
 0x80f   :  { %3463 = vtanh.f32 %v2402_v57 }
 0x813   :  { %v3456_v47 = vpop.eup %3455 }
 0x814   :  { %v2313_v27 = vmul.f32 %v3456_v47, %v3454_v35  ;;  %v6458_v35 = vld [vmem:[#allocation66_spill] sm:$0xff]  ;;  %v6459_v47 = vld [vmem:[#allocation67_spill] sm:$0xff] }
 0x816   :  { %v3458_v59 = vpop.eup %3457  ;;  %v2429_v42 = vpack.c.bf16 %v2313_v27, %v2313_v27  ;;  %v6461_v27 = vld [vmem:[#allocation14_spill] sm:$0xff] }
 0x817   :  { %v3460_v56 = vpop.eup %3459  ;;  %v2407_v43 = vadd.f32 1.0, %v3458_v59  ;;  %v6462_v59 = vld [vmem:[#allocation15_spill] sm:$0xff] }
 0x818   :  { %v2413_v45 = vadd.f32 1.0, %v3460_v56  ;;  %2462 = vmatprep.mubr.bf16.mxu0 %v2429_v42  ;;  %2503 = vmatprep.mubr.bf16.mxu1 %v2429_v42  ;;  %v3462_v44 = vpop.eup %3461  ;;  %v6463_v42 = vld [vmem:[#allocation16_spill] sm:$0xff]  ;;  %v6464_v56 = vld [vmem:[#allocation17_spill] sm:$0xff] }
 0x819   :  { %3465 = vrcp.f32 %v2407_v43  ;;  %v3464_v2 = vpop.eup %3463  ;;  %v2420_v49 = vadd.f32 1.0, %v3462_v44  ;;  %v6465_v43 = vld [vmem:[#allocation18_spill] sm:$0xff]  ;;  %v6467_v44 = vld [vmem:[#allocation72_spill] sm:$0xff] }
 0x81a   :  { %3467 = vrcp.f32 %v2413_v45  ;;  %v6466_v45 = vld [vmem:[#allocation19_spill] sm:$0xff] }
 0x81b   :  { %3469 = vrcp.f32 %v2420_v49 }
 0x823   :  { %v3466_v4 = vpop.eup %3465 }
 0x824   :  { %v3468_v7 = vpop.eup %3467  ;;  %v2424_v60 = vmul.f32 %v3466_v4, %v3464_v2  ;;  %v6468_v2 = vld [vmem:[#allocation73_spill] sm:$0xff]  ;;  %v6469_v4 = vld [vmem:[#allocation74_spill] sm:$0xff] }
 0x825   :  { %v2423_v20 = vmul.f32 %v3468_v7, %v5227_v63  ;;  %v3470_v55 = vpop.eup %3469  ;;  %v6437_v63 = vld [vmem:[#allocation49_spill] sm:$0xff]  ;;  %v6470_v7 = vmov 0.0|0.0  }
 0x827   :  { %v5469_v40 = vadd.f32 %v2424_v60, %v2423_v20  ;;  %v5572_v20 = vld [vmem:[%s5635_s5] sm:$0xff] }
 0x829   :  { %3471 = vtanh.f32 %v5469_v40 }
 0x833   :  { %v3472_v57 = vpop.eup %3471 }
 0x834   :  { %v2427_v50 = vmul.f32 %v3472_v57, %v3470_v55 }
 0x836   :  { %v2428_v46 = vpack.c.bf16 %v2427_v50, %v2427_v50 }
 0x838   :  { %2463 = vmatmul.mubr.bf16.vlgmr.msra.gmra.mrb[68].mxu0 %v2428_v46  ;;  %2504 = vmatmul.mubr.bf16.vlgmr.msra.gmra.mrb[68].mxu1 %v2428_v46 }
 0x839   :  { %2541 = vmatpush1.bf16.msra.mxu0 %v5054_v37  ;;  %2582 = vmatpush1.bf16.msra.mxu1 %v5057_v12  ;;  %v6417_v37 = vld [vmem:[#allocation33_spill] sm:$0xff]  ;;  %v6418_v12 = vld [vmem:[#allocation34_spill] sm:$0xff] }
 0x83a   :  { %2542 = vmatprep.subr.bf16.mxu0 %v5060_v19  ;;  %2583 = vmatprep.subr.bf16.mxu1 %v5063_v11  ;;  %v6419_v19 = vld [vmem:[#allocation35_spill] sm:$0xff]  ;;  %v6420_v11 = vld [vmem:[#allocation36_spill] sm:$0xff] }
 0x83b   :  { %2572 = vmatprep.mubr.bf16.mxu0 %v6062_v0  ;;  %2613 = vmatprep.mubr.bf16.mxu1 %v6062_v0  ;;  %v6416_v0 = vld [vmem:[#allocation32_spill] sm:$0xff] }
 0x83d   :  { %2543 = vmatpush1.bf16.msra.mxu0 %v5068_v3  ;;  %2584 = vmatpush1.bf16.msra.mxu1 %v5071_v54  ;;  %v6421_v3 = vld [vmem:[#allocation37_spill] sm:$0xff]  ;;  %v6422_v54 = vld [vmem:[#allocation38_spill] sm:$0xff] }
 0x83e   :  { %2544 = vmatprep.subr.bf16.mxu0 %v5074_v18  ;;  %2585 = vmatprep.subr.bf16.mxu1 %v5077_v48  ;;  %v6423_v18 = vld [vmem:[#allocation39_spill] sm:$0xff]  ;;  %v6424_v48 = vld [vmem:[#allocation40_spill] sm:$0xff] }
 0x841   :  { %2545 = vmatpush1.bf16.msra.mxu0 %v5080_v51  ;;  %2586 = vmatpush1.bf16.msra.mxu1 %v5083_v38  ;;  %v6425_v51 = vld [vmem:[#allocation41_spill] sm:$0xff]  ;;  %v6426_v38 = vld [vmem:[#allocation42_spill] sm:$0xff] }
 0x842   :  { %2546 = vmatprep.subr.bf16.mxu0 %v5086_v8  ;;  %2587 = vmatprep.subr.bf16.mxu1 %v5089_v21  ;;  %v6427_v8 = vld [vmem:[#allocation43_spill] sm:$0xff]  ;;  %v6428_v21 = vld [vmem:[#allocation68_spill] sm:$0xff] }
 0x845   :  { %2547 = vmatpush1.bf16.msra.mxu0 %v5092_v23  ;;  %2588 = vmatpush1.bf16.msra.mxu1 %v5095_v28  ;;  %v6429_v23 = vld [vmem:[#allocation69_spill] sm:$0xff]  ;;  %v6430_v28 = vld [vmem:[#allocation70_spill] sm:$0xff] }
 0x846   :  { %2548 = vmatprep.subr.bf16.mxu0 %v6348_v14  ;;  %2589 = vmatprep.subr.bf16.mxu1 %v6349_v10  ;;  %v6438_v14 = vld [vmem:[#allocation50_spill] sm:$0xff]  ;;  %v6439_v10 = vld [vmem:[#allocation51_spill] sm:$0xff] }
 0x849   :  { %2549 = vmatpush1.bf16.msra.mxu0 %v6350_v62  ;;  %2590 = vmatpush1.bf16.msra.mxu1 %v6351_v58  ;;  %v6440_v62 = vld [vmem:[#allocation52_spill] sm:$0xff]  ;;  %v6441_v58 = vld [vmem:[#allocation53_spill] sm:$0xff] }
 0x84a   :  { %2550 = vmatprep.subr.bf16.mxu0 %v6352_v6  ;;  %2591 = vmatprep.subr.bf16.mxu1 %v6353_v30  ;;  %v6442_v6 = vld [vmem:[#allocation54_spill] sm:$0xff]  ;;  %v6443_v30 = vld [vmem:[#allocation80_spill] sm:$0xff] }
 0x84d   :  { %2551 = vmatpush1.bf16.msra.mxu0 %v6354_v1  ;;  %2592 = vmatpush1.bf16.msra.mxu1 %v6355_v25  ;;  %v6444_v1 = vld [vmem:[#allocation81_spill] sm:$0xff]  ;;  %v6445_v25 = vld [vmem:[#allocation82_spill] sm:$0xff] }
 0x84e   :  { %2552 = vmatprep.subr.bf16.mxu0 %v6356_v15  ;;  %2593 = vmatprep.subr.bf16.mxu1 %v6357_v17  ;;  %v6446_v15 = vld [vmem:[#allocation83_spill] sm:$0xff] }
 0x84f   :  { %v6447_v17 = vld [vmem:[#allocation55_spill] sm:$0xff] }
 0x851   :  { %2553 = vmatpush1.bf16.msra.mxu0 %v5128_v52  ;;  %2594 = vmatpush1.bf16.msra.mxu1 %v5131_v32  ;;  %v6435_v52 = vld [vmem:[#allocation47_spill] sm:$0xff]  ;;  %v6436_v32 = vld [vmem:[#allocation48_spill] sm:$0xff] }
 0x852   :  { %2554 = vmatprep.subr.bf16.mxu0 %v5134_v16  ;;  %2595 = vmatprep.subr.bf16.mxu1 %v5137_v9  ;;  %v6431_v16 = vld [vmem:[#allocation71_spill] sm:$0xff]  ;;  %v6432_v9 = vld [vmem:[#allocation44_spill] sm:$0xff] }
 0x855   :  { %2555 = vmatpush1.bf16.msra.mxu0 %v5140_v13  ;;  %2596 = vmatpush1.bf16.msra.mxu1 %v5143_v22  ;;  %v6433_v13 = vld [vmem:[#allocation45_spill] sm:$0xff]  ;;  %v6434_v22 = vld [vmem:[#allocation46_spill] sm:$0xff] }
 0x856   :  { %2652 = vmatprep.subr.bf16.mxu0 %v5262_v24  ;;  %2693 = vmatprep.subr.bf16.mxu1 %v5265_v53  ;;  %v6448_v24 = vld [vmem:[#allocation56_spill] sm:$0xff]  ;;  %v6449_v53 = vld [vmem:[#allocation57_spill] sm:$0xff] }
 0x858   :  { %2573 = vmatmul.mubr.bf16.vlgmr.msra.gmra.mrb[72].mxu0 %v2428_v46  ;;  %2614 = vmatmul.mubr.bf16.vlgmr.msra.gmra.mrb[72].mxu1 %v2428_v46  ;;  %v5578_v46 = vld [vmem:[%s5635_s5 + $0x8] sm:$0xff] }
 0x859   :  { %2653 = vmatpush1.bf16.msra.mxu0 %v5268_v26  ;;  %2694 = vmatpush1.bf16.msra.mxu1 %v5271_v29  ;;  %v6450_v26 = vld [vmem:[#allocation58_spill] sm:$0xff]  ;;  %v6451_v29 = vld [vmem:[#allocation59_spill] sm:$0xff] }
 0x85a   :  { %2654 = vmatprep.subr.bf16.mxu0 %v5274_v31  ;;  %2695 = vmatprep.subr.bf16.mxu1 %v5277_v33  ;;  %v6452_v31 = vld [vmem:[#allocation60_spill] sm:$0xff]  ;;  %v6453_v33 = vld [vmem:[#allocation61_spill] sm:$0xff] }
 0x85d   :  { %2655 = vmatpush1.bf16.msra.mxu0 %v5280_v34  ;;  %2696 = vmatpush1.bf16.msra.mxu1 %v5283_v36  ;;  %v6454_v34 = vld [vmem:[#allocation62_spill] sm:$0xff]  ;;  %v6455_v36 = vld [vmem:[#allocation63_spill] sm:$0xff] }
 0x85e   :  { %2656 = vmatprep.subr.bf16.mxu0 %v5286_v39  ;;  %2697 = vmatprep.subr.bf16.mxu1 %v5289_v41  ;;  %v6456_v39 = vld [vmem:[#allocation64_spill] sm:$0xff]  ;;  %v6457_v41 = vld [vmem:[#allocation65_spill] sm:$0xff] }
 0x861   :  { %2657 = vmatpush1.bf16.msra.mxu0 %v6416_v0  ;;  %2698 = vmatpush1.bf16.msra.mxu1 %v6417_v37 }
 0x862   :  { %2658 = vmatprep.subr.bf16.mxu0 %v6418_v12  ;;  %2699 = vmatprep.subr.bf16.mxu1 %v6419_v19 }
 0x865   :  { %2659 = vmatpush1.bf16.msra.mxu0 %v6420_v11  ;;  %2700 = vmatpush1.bf16.msra.mxu1 %v6421_v3 }
 0x866   :  { %2660 = vmatprep.subr.bf16.mxu0 %v6422_v54  ;;  %2701 = vmatprep.subr.bf16.mxu1 %v6423_v18  ;;  %v5584_v18 = vld [vmem:[%s5635_s5 + $0x18] sm:$0xff] }
 0x869   :  { %2661 = vmatpush1.bf16.msra.mxu0 %v6424_v48  ;;  %2702 = vmatpush1.bf16.msra.mxu1 %v6425_v51 }
 0x86a   :  { %2662 = vmatprep.subr.bf16.mxu0 %v6426_v38  ;;  %2703 = vmatprep.subr.bf16.mxu1 %v6427_v8  ;;  %v5590_v38 = vld [vmem:[%s5635_s5 + $0x10] sm:$0xff] }
 0x86d   :  { %2663 = vmatpush1.bf16.msra.mxu0 %v6428_v21  ;;  %2704 = vmatpush1.bf16.msra.mxu1 %v6429_v23 }
 0x86e   :  { %2664 = vmatprep.subr.bf16.mxu0 %v6430_v28  ;;  %2705 = vmatprep.subr.bf16.mxu1 %v6431_v16 }
 0x871   :  { %2665 = vmatpush1.bf16.msra.mxu0 %v6432_v9  ;;  %2706 = vmatpush1.bf16.msra.mxu1 %v6433_v13 }
 0x872   :  { %2666 = vmatprep.subr.bf16.mxu0 %v6434_v22  ;;  %2707 = vmatprep.subr.bf16.mxu1 %v6435_v52 }
 0x875   :  { %2667 = vmatpush1.bf16.msra.mxu0 %v6436_v32  ;;  %2708 = vmatpush1.bf16.msra.mxu1 %v6437_v63 }
 0x876   :  { %2668 = vmatprep.subr.bf16.mxu0 %v6438_v14  ;;  %2709 = vmatprep.subr.bf16.mxu1 %v6439_v10 }
 0x879   :  { %2669 = vmatpush1.bf16.msra.mxu0 %v6440_v62  ;;  %2710 = vmatpush1.bf16.msra.mxu1 %v6441_v58 }
 0x87a   :  { %2670 = vmatprep.subr.bf16.mxu0 %v6442_v6  ;;  %2711 = vmatprep.subr.bf16.mxu1 %v6443_v30  ;;  %v6471_v6 = vld [vmem:[#allocation92_spill] sm:$0xff] }
 0x87d   :  { %2671 = vmatpush1.bf16.msra.mxu0 %v6444_v1  ;;  %2712 = vmatpush1.bf16.msra.mxu1 %v6445_v25  ;;  %v6472_v1 = vld [vmem:[#allocation93_spill] sm:$0xff] }
 0x87e   :  { %2672 = vmatprep.subr.bf16.mxu0 %v6446_v15  ;;  %2713 = vmatprep.subr.bf16.mxu1 %v6447_v17 }
 0x881   :  { %2673 = vmatpush1.bf16.msra.mxu0 %v6448_v24  ;;  %2714 = vmatpush1.bf16.msra.mxu1 %v6449_v53  ;;  %v6473_v24 = vld [vmem:[#allocation94_spill] sm:$0xff] }
 0x882   :  { %2674 = vmatprep.subr.bf16.mxu0 %v6450_v26  ;;  %2715 = vmatprep.subr.bf16.mxu1 %v6451_v29  ;;  %v6474_v26 = vld [vmem:[#allocation95_spill] sm:$0xff] }
 0x885   :  { %2675 = vmatpush1.bf16.msra.mxu0 %v6452_v31  ;;  %2716 = vmatpush1.bf16.msra.mxu1 %v6453_v33 }
 0x886   :  { %2676 = vmatprep.subr.bf16.mxu0 %v6454_v34  ;;  %2717 = vmatprep.subr.bf16.mxu1 %v6455_v36 }
 0x889   :  { %2677 = vmatpush1.bf16.msra.mxu0 %v6456_v39  ;;  %2718 = vmatpush1.bf16.msra.mxu1 %v6457_v41 }
 0x88a   :  { %2678 = vmatprep.subr.bf16.mxu0 %v6458_v35  ;;  %2719 = vmatprep.subr.bf16.mxu1 %v6459_v47 }
 0x88d   :  { %2679 = vmatpush1.bf16.msra.mxu0 %v6460_v5  ;;  %2720 = vmatpush1.bf16.msra.mxu1 %v6461_v27 }
 0x88e   :  { %2680 = vmatprep.subr.bf16.mxu0 %v6462_v59  ;;  %2721 = vmatprep.subr.bf16.mxu1 %v6463_v42 }
 0x891   :  { %2681 = vmatpush1.bf16.msra.mxu0 %v6464_v56  ;;  %2722 = vmatpush1.bf16.msra.mxu1 %v6465_v43 }
 0x892   :  { %2682 = vmatprep.subr.bf16.mxu0 %v6466_v45  ;;  %2723 = vmatprep.subr.bf16.mxu1 %v6467_v44 }
 0x895   :  { %2683 = vmatpush1.bf16.msra.mxu0 %v6468_v2  ;;  %2724 = vmatpush1.bf16.msra.mxu1 %v6469_v4 }
 0x896   :  { %3085 = vmatprep.subr.bf16.mxu0 %v6470_v7 }
 0x90b   :  { %v2464_v60 = vpop.f32.mrb[68].mxu0  ;;  %v2505_v49 = vpop.f32.mrb[68].mxu1 }
 0x90c   :  { %v2465_v55 = vadd.f32 %v5572_v20, %v2464_v60  ;;  %v2466_v57 = vpop.f32.mrb[69].mxu0  ;;  %v2507_v50 = vpop.f32.mrb[69].mxu1  ;;  %v2506_v8 = vadd.f32 %v5590_v38, %v2505_v49 }
 0x90d   :  { %v2467_v0 = vadd.f32 %v5578_v46, %v2466_v57  ;;  %v2468_v37 = vpop.f32.mrb[70].mxu0  ;;  %v2509_v12 = vpop.f32.mrb[70].mxu1  ;;  %v2508_v48 = vadd.f32 %v5584_v18, %v2507_v50 }
 0x90e   :  { %v3023_v19 = vmul.f32 -1.442695, %v2465_v55  ;;  %v2469_v11 = vpop.f32.mrb[71].mxu0  ;;  %v2510_v3 = vpop.f32.mrb[71].mxu1 }
 0x90f   :  { %v3024_v54 = vmul.f32 -1.442695, %v2467_v0  ;;  %v3025_v51 = vmul.f32 -1.442695, %v2508_v48  ;;  %v2759_v11 = vld [vmem:[#allocation8 + $0x8] sm:$0xff]  ;;  %v2761_v48 = vld [vmem:[#allocation8 + $0x18] sm:$0xff] }
 0x910   :  { %3473 = vpow2.f32 %v3023_v19  ;;  %v2758_v19 = vld [vmem:[#allocation8] sm:$0xff] }
 0x911   :  { %3475 = vpow2.f32 %v3024_v54  ;;  %v3086_v3 = vpack.c.bf16 %v2759_v11, %v2758_v19  ;;  %v2760_v54 = vld [vmem:[#allocation8 + $0x10] sm:$0xff] }
 0x912   :  { %3477 = vpow2.f32 %v3025_v51  ;;  %v3089_v51 = vpack.c.bf16 %v2761_v48, %v2760_v54 }
 0x913   :  { %3479 = vtanh.f32 %v2506_v8  ;;  %v2763_v8 = vld [vmem:[#allocation8 + $0x28] sm:$0xff] }
 0x91a   :  { %v3474_v21 = vpop.eup %3473 }
 0x91b   :  { %v3476_v23 = vpop.eup %3475  ;;  %v2515_v28 = vadd.f32 1.0, %v3474_v21 }
 0x91c   :  { %v2521_v16 = vadd.f32 1.0, %v3476_v23  ;;  %v3478_v9 = vpop.eup %3477  ;;  %v2764_v23 = vld [vmem:[#allocation8 + $0x30] sm:$0xff] }
 0x91d   :  { %3481 = vrcp.f32 %v2515_v28  ;;  %v3480_v13 = vpop.eup %3479  ;;  %v2528_v63 = vadd.f32 1.0, %v3478_v9  ;;  %v2765_v28 = vld [vmem:[#allocation8 + $0x38] sm:$0xff]  ;;  %v2766_v9 = vld [vmem:[#allocation8 + $0x40] sm:$0xff] }
 0x91e   :  { %3483 = vrcp.f32 %v2521_v16  ;;  %v3095_v16 = vpack.c.bf16 %v2765_v28, %v2764_v23 }
 0x91f   :  { %3485 = vrcp.f32 %v2528_v63  ;;  %v2770_v63 = vld [vmem:[#allocation8 + $0x60] sm:$0xff] }
 0x927   :  { %v3482_v22 = vpop.eup %3481 }
 0x928   :  { %v3484_v52 = vpop.eup %3483  ;;  %v2532_v32 = vmul.f32 %v3482_v22, %v3480_v13  ;;  %v2767_v13 = vld [vmem:[#allocation8 + $0x48] sm:$0xff] }
 0x929   :  { %v2531_v14 = vmul.f32 %v3484_v52, %v5461_v61  ;;  %v3486_v41 = vpop.eup %3485  ;;  %v3098_v22 = vpack.c.bf16 %v2767_v13, %v2766_v9  ;;  %v2768_v52 = vld [vmem:[#allocation8 + $0x50] sm:$0xff] }
 0x92b   :  { %v2574_v10 = vpop.f32.mrb[72].mxu0  ;;  %v2615_v62 = vpop.f32.mrb[72].mxu1  ;;  %v5594_v58 = vadd.f32 %v2532_v32, %v2531_v14  ;;  %v2769_v32 = vld [vmem:[#allocation8 + $0x58] sm:$0xff] }
 0x92c   :  { %v2622_v30 = vadd.f32 %v2574_v10, %v6471_v6  ;;  %v2624_v25 = vadd.f32 %v2615_v62, %v6472_v1  ;;  %v2576_v15 = vpop.f32.mrb[73].mxu0  ;;  %v2617_v17 = vpop.f32.mrb[73].mxu1  ;;  %v3101_v14 = vpack.c.bf16 %v2769_v32, %v2768_v52  ;;  %v2771_v10 = vld [vmem:[#allocation8 + $0x68] sm:$0xff]  ;;  %v6475_v62 = vmov 0.0   ;;  %v2773_v1 = vld [vmem:[#allocation8 + $0x78] sm:$0xff] }
 0x92d   :  { %v2623_v53 = vadd.f32 %v2576_v15, %v6473_v24  ;;  %v2625_v29 = vadd.f32 %v2617_v17, %v6474_v26  ;;  %v2578_v31 = vpop.f32.mrb[74].mxu0  ;;  %v2619_v33 = vpop.f32.mrb[74].mxu1  ;;  %3487 = vtanh.f32 %v5594_v58  ;;  %v3104_v6 = vpack.c.bf16 %v2771_v10, %v2770_v63 }
 0x92e   :  { %v3026_v61 = vmul.f32 -1.442695, %v2622_v30  ;;  %v2579_v34 = vpop.f32.mrb[75].mxu0  ;;  %v2620_v36 = vpop.f32.mrb[75].mxu1  ;;  %v2772_v30 = vld [vmem:[#allocation8 + $0x70] sm:$0xff] }
 0x92f   :  { %v3027_v39 = vmul.f32 -1.442695, %v2623_v53  ;;  %v3028_v47 = vmul.f32 -1.442695, %v2625_v29 }
 0x930   :  { %3489 = vpow2.f32 %v3026_v61 }
 0x931   :  { %3491 = vpow2.f32 %v3027_v39 }
 0x932   :  { %3493 = vpow2.f32 %v3028_v47 }
 0x933   :  { %3495 = vtanh.f32 %v2624_v25  ;;  %v3107_v25 = vpack.c.bf16 %v2773_v1, %v2772_v30 }
 0x937   :  { %v3488_v35 = vpop.eup %3487 }
 0x938   :  { %v2535_v5 = vmul.f32 %v3488_v35, %v3486_v41 }
 0x93a   :  { %v3490_v27 = vpop.eup %3489  ;;  %v2651_v59 = vpack.c.bf16 %v2535_v5, %v2535_v5 }
 0x93b   :  { %v3492_v42 = vpop.eup %3491  ;;  %v2629_v56 = vadd.f32 1.0, %v3490_v27 }
 0x93c   :  { %v2635_v43 = vadd.f32 1.0, %v3492_v42  ;;  %2684 = vmatprep.mubr.bf16.mxu0 %v2651_v59  ;;  %2725 = vmatprep.mubr.bf16.mxu1 %v2651_v59  ;;  %v3494_v45 = vpop.eup %3493 }
 0x93d   :  { %3497 = vrcp.f32 %v2629_v56  ;;  %v3496_v44 = vpop.eup %3495  ;;  %v2642_v49 = vadd.f32 1.0, %v3494_v45 }
 0x93e   :  { %3499 = vrcp.f32 %v2635_v43 }
 0x93f   :  { %3501 = vrcp.f32 %v2642_v49 }
 0x947   :  { %v3498_v2 = vpop.eup %3497 }
 0x948   :  { %v3500_v4 = vpop.eup %3499  ;;  %v2646_v60 = vmul.f32 %v3498_v2, %v3496_v44 }
 0x949   :  { %v2645_v55 = vmul.f32 %v3500_v4, %v5469_v40  ;;  %v3502_v50 = vpop.eup %3501  ;;  %v2762_v40 = vld [vmem:[#allocation8 + $0x20] sm:$0xff] }
 0x94a   :  { %v3092_v21 = vpack.c.bf16 %v2763_v8, %v2762_v40 }
 0x94b   :  { %v2647_v57 = vadd.f32 %v2646_v60, %v2645_v55  ;;  %v3032_v60 = vld [vmem:[%s5637_s7] ss:$0 sm:$0xff] }
 0x94d   :  { %3503 = vtanh.f32 %v2647_v57 }
 0x957   :  { %v3504_v0 = vpop.eup %3503 }
 0x958   :  { %v2649_v37 = vmul.f32 %v3504_v0, %v3502_v50 }
 0x95a   :  { %v2650_v12 = vpack.c.bf16 %v2649_v37, %v2649_v37 }
 0x95c   :  { %2685 = vmatmul.mubr.bf16.vlgmr.msra.gmra.mrb[76].mxu0 %v2650_v12  ;;  %2726 = vmatmul.mubr.bf16.vlgmr.msra.gmra.mrb[76].mxu1 %v2650_v12 }
 0x95d   :  { %3087 = vmatpush3.bf16.msra.mxu0 %v3086_v3  ;;  %3082 = vmatprep.mubr.msk.f32.mxu0 %vm3825_vm2, %v6475_v62 }
 0x95e   :  { %3088 = vmatprep.subr.bf16.mxu0 %v6470_v7 }
 0x961   :  { %3090 = vmatpush3.bf16.msra.mxu0 %v3089_v51 }
 0x962   :  { %3091 = vmatprep.subr.bf16.mxu0 %v6470_v7 }
 0x965   :  { %3093 = vmatpush3.bf16.msra.mxu0 %v3092_v21 }
 0x966   :  { %3094 = vmatprep.subr.bf16.mxu0 %v6470_v7 }
 0x969   :  { %3096 = vmatpush3.bf16.msra.mxu0 %v3095_v16 }
 0x96a   :  { %3097 = vmatprep.subr.bf16.mxu0 %v6470_v7 }
 0x96d   :  { %3099 = vmatpush3.bf16.msra.mxu0 %v3098_v22 }
 0x96e   :  { %3100 = vmatprep.subr.bf16.mxu0 %v6470_v7 }
 0x971   :  { %3102 = vmatpush3.bf16.msra.mxu0 %v3101_v14 }
 0x972   :  { %3103 = vmatprep.subr.bf16.mxu0 %v6470_v7 }
 0x975   :  { %3105 = vmatpush3.bf16.msra.mxu0 %v3104_v6 }
 0x976   :  { %3106 = vmatprep.subr.bf16.mxu0 %v6470_v7 }
 0x979   :  { %3108 = vmatpush3.bf16.msra.mxu0 %v3107_v25 }
 0xa2f   :  { %v2686_v15 = vpop.f32.mrb[76].mxu0  ;;  %v2727_v17 = vpop.f32.mrb[76].mxu1 }
 0xa30   :  { %v2687_v24 = vadd.f32 %v5572_v20, %v2686_v15  ;;  %v2688_v53 = vpop.f32.mrb[77].mxu0  ;;  %v2729_v26 = vpop.f32.mrb[77].mxu1  ;;  %v2728_v35 = vadd.f32 %v5590_v38, %v2727_v17 }
 0xa31   :  { %v2689_v29 = vadd.f32 %v5578_v46, %v2688_v53  ;;  %v2690_v31 = vpop.f32.mrb[78].mxu0  ;;  %v2731_v33 = vpop.f32.mrb[78].mxu1  ;;  %v2730_v41 = vadd.f32 %v5584_v18, %v2729_v26 }
 0xa32   :  { %v3029_v61 = vmul.f32 -1.442695, %v2687_v24  ;;  %v2691_v34 = vpop.f32.mrb[79].mxu0  ;;  %v2732_v36 = vpop.f32.mrb[79].mxu1 }
 0xa33   :  { %v3030_v39 = vmul.f32 -1.442695, %v2689_v29  ;;  %v3031_v7 = vmul.f32 -1.442695, %v2730_v41 }
 0xa34   :  { %3505 = vpow2.f32 %v3029_v61 }
 0xa35   :  { %3507 = vpow2.f32 %v3030_v39 }
 0xa36   :  { %3509 = vpow2.f32 %v3031_v7 }
 0xa37   :  { %3511 = vtanh.f32 %v2728_v35 }
 0xa3e   :  { %v3506_v47 = vpop.eup %3505 }
 0xa3f   :  { %v3508_v5 = vpop.eup %3507  ;;  %v2737_v20 = vadd.f32 1.0, %v3506_v47 }
 0xa40   :  { %v2743_v27 = vadd.f32 1.0, %v3508_v5  ;;  %v3510_v46 = vpop.eup %3509 }
 0xa41   :  { %3513 = vrcp.f32 %v2737_v20  ;;  %v3512_v59 = vpop.eup %3511  ;;  %v2750_v45 = vadd.f32 1.0, %v3510_v46 }
 0xa42   :  { %3515 = vrcp.f32 %v2743_v27 }
 0xa43   :  { %3517 = vrcp.f32 %v2750_v45 }
 0xa4b   :  { %v3514_v42 = vpop.eup %3513 }
 0xa4c   :  { %v3516_v56 = vpop.eup %3515  ;;  %v2754_v43 = vmul.f32 %v3514_v42, %v3512_v59 }
 0xa4d   :  { %v2753_v44 = vmul.f32 %v3516_v56, %v5594_v58  ;;  %v3518_v38 = vpop.eup %3517 }
 0xa4f   :  { %v2755_v18 = vadd.f32 %v2754_v43, %v2753_v44 }
 0xa51   :  { %3519 = vtanh.f32 %v2755_v18 }
 0xa5b   :  { %v3520_v2 = vpop.eup %3519 }
 0xa5c   :  { %v2757_v4 = vmul.f32 %v3520_v2, %v3518_v38 }
 0xa5e   :  { %3083 = vmatmul.mubr.f32.vlgmr.msra.gmra.mrb[80].mxu0 %v2757_v4 }
 0xb31   :  { %v2847_v49 = vpop.f32.mrb[80].mxu0 }
 0xb32   :  { %v2848_v55 = vadd.f32 %v3032_v60, %v2847_v49  ;;  %v3084_v57 = vpop.f32.mrb[81].mxu0 }
 0xb34   :  { %2851 = vst [vmem:[#allocation9] sm:$0xff] %v2848_v55 }
 0xb35   :  { %3798 = shalt.err (!%p3795_p0)
}
 0xb36   :  { %s3799_s21 = scalar_lea.hbm %s5638_s8, 128 }
 0xb37   :  { %p3800_p1 = scmp.ne.s32.totalorder %s5638_s8, %s3799_s21  ;;  %p3803_p2 = scmp.lt.u32.totalorder %s3799_s21, %s5638_s8 }
 0xb39   :  { %p3805_p3 = pnand %p3803_p2, %p3800_p1 }
 0xb3b   :  { %3808 = shalt.err (!%p3805_p3)
}
 0xb3c   :  { %2861 = dma.vmem_to_hbm [thread:$0]  %s2859_s0, 128, %s5638_s8, [#allocation5]  }
 0xb3d   :  { %3813 = dma.done.wait [#allocation5], 128  }
 0xb3e   :  { %3814 = vsyncadd [#allocation5], 4294967168 }
 0xb3f   :  { %2865 = vsyncpa [#allocation4], 1 }
 0xb40   :  { %2866 = vsyncpa [#allocation7], 1 }
 0xb41   :  { %2867 = vsyncpa [#allocation5], 1 }

</bundles_post_ra>
